<compile_context>
chip_gen: v7x
topology: tpu7x:2x2x1
jax: 0.10.0
libtpu: 0.0.40
codegen_flags: <defaults>
</compile_context>

<pallas_src>
import functools
import math

import numpy as np

import jax
import jax.numpy as jnp
from jax.experimental import pallas as pl
from jax.experimental.pallas import tpu as pltpu


def _attention_kernel(q_ref, k_ref, v_ref,
                      wq_ref, bq_ref, wk_ref, bk_ref, wv_ref, bv_ref,
                      wo_ref, bo_ref,
                      sel_ref, thr_ref, bds_ref, bdk_ref, bdv_ref,
                      out_ref, *, d_k, h):
    scale = 1.0 / math.sqrt(d_k)

    wq = wq_ref[...]; bq = bq_ref[...]
    wk = wk_ref[...]; bk = bk_ref[...]
    wv = wv_ref[...]; bv = bv_ref[...]
    wo = wo_ref[...]; bo = bo_ref[...]
    sel = sel_ref[...]          # (nq, nq*h*nk)   constant row selector
    thr = thr_ref[...]          # (1, h*nk)       per-column top-k threshold
    bd_s = bds_ref[...]         # (h*nk, h*nk)    same-head block-diagonal mask
    bd_k = bdk_ref[...]         # (h*nk, h*d_k)   block-diag mask for K
    bd_v = bdv_ref[...]         # (h*nk, h*d_v)   block-diag mask for V

    batch_block = q_ref.shape[0]
    for bi in range(batch_block):                       # static, unrolled
        # Fused projections (fc_q / fc_k / fc_v): lane width h*d_k = 128.
        q_all = jnp.dot(q_ref[bi], wq, preferred_element_type=jnp.float32) + bq  # (nq, h*d_k)
        k_all = jnp.dot(k_ref[bi], wk, preferred_element_type=jnp.float32) + bk  # (nk, h*d_k)
        v_all = jnp.dot(v_ref[bi], wv, preferred_element_type=jnp.float32) + bv  # (nk, h*d_v)

        # Block-diagonal K / V: cheap sublane replication + constant mask.
        kbd = jnp.tile(k_all, (h, 1)) * bd_k            # (h*nk, h*d_k)
        vbd = jnp.tile(v_all, (h, 1)) * bd_v            # (h*nk, h*d_v)

        # Scores for all heads at once, lane-dense (nq, h*nk) = (32, 128).
        att = jax.lax.dot_general(q_all, kbd, (((1,), (1,)), ((), ())),
                                  preferred_element_type=jnp.float32) * scale

        # Top-k mask along keys (per head): keep att[i,j] iff fewer than k_head
        # elements of the same head's row are strictly greater than it.
        # gtm[i,c,j] = 1 iff att[i,c] > att[i,j] AND c,j belong to the same head;
        # rank = sel @ gtm  runs the whole reduction on the MXU, output already
        # in the dense (nq, h*nk) layout.
        gt = att[:, :, None] > att[:, None, :]                       # (nq, h*nk, h*nk)
        gtm = jnp.where(gt, bd_s[None, :, :], 0.0)
        rank = jnp.dot(sel, gtm.reshape(-1, gtm.shape[-1]),
                       preferred_element_type=jnp.float32)           # (nq, h*nk)
        att = jnp.where(rank < thr, att, 0.0)

        # Per-head softmax over keys (zeroed entries participate, matching the
        # reference).  The row-global max is a valid per-head shift; per-head
        # denominators come from one MXU matmul with the same-head mask, which
        # broadcasts each head's sum across its own lanes.
        m_row = jnp.max(att, axis=-1, keepdims=True)
        e = jnp.exp(att - m_row)
        denom = jnp.dot(e, bd_s, preferred_element_type=jnp.float32)  # (nq, h*nk)
        p = e / denom                                                 # exact divide

        # p @ block-diagonal V = concatenated head outputs (nq, h*d_v); then fc_o.
        out_cat = jnp.dot(p, vbd, preferred_element_type=jnp.float32)
        out = jnp.dot(out_cat, wo, preferred_element_type=jnp.float32) + bo
        out_ref[bi] = out.astype(out_ref.dtype)


def scaled_dot_product_attention_topk(queries, keys, values, params, arr, *,
                                      d_k, d_v, h, batch_block=1,
                                      attention_mask=None, attention_weights=None):
    # TODO(synk): attention_mask / attention_weights paths not implemented.
    assert attention_mask is None and attention_weights is None
    b_s, nq, d_model = queries.shape
    nk = keys.shape[1]
    assert b_s % batch_block == 0, "batch_block must divide the batch size"
    arr = list(arr)[:h]
    if len(arr) < h:
        raise ValueError("arr must provide one top-k size per head")
    if any(int(a) > nk for a in arr):
        raise ValueError("top-k size larger than nk (torch.topk would raise)")

    wq, bq, wk, bk, wv, bv, wo, bo = params
    bq2 = bq.reshape(1, h * d_k)
    bk2 = bk.reshape(1, h * d_k)
    bv2 = bv.reshape(1, h * d_v)
    bo2 = bo.reshape(1, d_model)

    # ---- host-built constants (fetched once: constant index_maps) ----------
    hnk = h * nk
    head_nk = np.repeat(np.arange(h), nk)
    head_dk = np.repeat(np.arange(h), d_k)
    head_dv = np.repeat(np.arange(h), d_v)
    bd_s = jnp.asarray(head_nk[:, None] == head_nk[None, :], jnp.float32)   # (hnk, hnk)
    bd_k = jnp.asarray(head_nk[:, None] == head_dk[None, :], jnp.float32)   # (hnk, h*d_k)
    bd_v = jnp.asarray(head_nk[:, None] == head_dv[None, :], jnp.float32)   # (hnk, h*d_v)
    sel_np = np.zeros((nq, nq * hnk), np.float32)
    for i in range(nq):
        sel_np[i, i * hnk:(i + 1) * hnk] = 1.0
    sel = jnp.asarray(sel_np)                                                # (nq, nq*hnk)
    thr = jnp.asarray(np.repeat(np.asarray(arr, np.float32), nk)[None, :])   # (1, hnk)

    kernel = functools.partial(_attention_kernel, d_k=d_k, h=h)

    grid_spec = pltpu.PrefetchScalarGridSpec(
        num_scalar_prefetch=0,
        grid=(b_s // batch_block,),
        in_specs=[
            pl.BlockSpec((batch_block, nq, d_model), lambda b: (b, 0, 0)),  # queries
            pl.BlockSpec((batch_block, nk, d_model), lambda b: (b, 0, 0)),  # keys
            pl.BlockSpec((batch_block, nk, d_model), lambda b: (b, 0, 0)),  # values
            pl.BlockSpec((d_model, h * d_k), lambda b: (0, 0)),             # Wq
            pl.BlockSpec((1, h * d_k),       lambda b: (0, 0)),             # bq
            pl.BlockSpec((d_model, h * d_k), lambda b: (0, 0)),             # Wk
            pl.BlockSpec((1, h * d_k),       lambda b: (0, 0)),             # bk
            pl.BlockSpec((d_model, h * d_v), lambda b: (0, 0)),             # Wv
            pl.BlockSpec((1, h * d_v),       lambda b: (0, 0)),             # bv
            pl.BlockSpec((h * d_v, d_model), lambda b: (0, 0)),             # Wo
            pl.BlockSpec((1, d_model),       lambda b: (0, 0)),             # bo
            pl.BlockSpec((nq, nq * hnk),     lambda b: (0, 0)),             # sel
            pl.BlockSpec((1, hnk),           lambda b: (0, 0)),             # thr
            pl.BlockSpec((hnk, hnk),         lambda b: (0, 0)),             # bd_s
            pl.BlockSpec((hnk, h * d_k),     lambda b: (0, 0)),             # bd_k
            pl.BlockSpec((hnk, h * d_v),     lambda b: (0, 0)),             # bd_v
        ],
        out_specs=pl.BlockSpec((batch_block, nq, d_model), lambda b: (b, 0, 0)),
    )

    return pl.pallas_call(
        kernel,
        out_shape=jax.ShapeDtypeStruct((b_s, nq, d_model), queries.dtype),
        grid_spec=grid_spec,
        compiler_params=pltpu.CompilerParams(
            dimension_semantics=("parallel",)),
    )(queries, keys, values, wq, bq2, wk, bk2, wv, bv2, wo, bo2,
      sel, thr, bd_s, bd_k, bd_v)


def reference(queries, keys, values, params, arr, *, d_k, d_v, h):
    """Pure-JAX reference mirroring the PyTorch forward."""
    hp = jax.lax.Precision.HIGHEST
    wq, bq, wk, bk, wv, bv, wo, bo = params
    b_s, nq, d_model = queries.shape
    nk = keys.shape[1]
    q = (jnp.dot(queries, wq, precision=hp) + bq).reshape(b_s, nq, h, d_k).transpose(0, 2, 1, 3)
    k = (jnp.dot(keys,    wk, precision=hp) + bk).reshape(b_s, nk, h, d_k).transpose(0, 2, 3, 1)
    v = (jnp.dot(values,  wv, precision=hp) + bv).reshape(b_s, nk, h, d_v).transpose(0, 2, 1, 3)
    att = jnp.matmul(q, k, precision=hp) / jnp.sqrt(jnp.float32(d_k))
    masks = []
    for i in range(h):
        _, idx = jax.lax.top_k(att[:, i], arr[i])
        m = jax.nn.one_hot(idx, nk, dtype=att.dtype).sum(axis=-2)
        masks.append(m)
    attmask = jnp.stack(masks, axis=1)
    att = att * attmask
    att = jax.nn.softmax(att, axis=-1)
    out = jnp.matmul(att, v, precision=hp).transpose(0, 2, 1, 3).reshape(b_s, nq, h * d_v)
    out = jnp.dot(out, wo, precision=hp) + bo
    return out


if __name__ == "__main__":
    b_s, nq, nk = 2, 32, 32
    d_model, d_k, d_v, h = 64, 32, 32, 4
    arr = [1, 9, 16, 25, 36, 49, 64, 81][:h]

    key = jax.random.PRNGKey(0)
    ks = jax.random.split(key, 7)

    def xavier(k, shape):
        bound = (6.0 / (shape[0] + shape[1])) ** 0.5
        return jax.random.uniform(k, shape, jnp.float32, -bound, bound)

    # Weights stored in "x @ W + b" layout (transpose of torch's (out, in)); biases zero.
    wq = xavier(ks[0], (d_model, h * d_k)); bq = jnp.zeros((h * d_k,), jnp.float32)
    wk = xavier(ks[1], (d_model, h * d_k)); bk = jnp.zeros((h * d_k,), jnp.float32)
    wv = xavier(ks[2], (d_model, h * d_v)); bv = jnp.zeros((h * d_v,), jnp.float32)
    wo = xavier(ks[3], (h * d_v, d_model)); bo = jnp.zeros((d_model,), jnp.float32)
    params = (wq, bq, wk, bk, wv, bv, wo, bo)

    queries = jax.random.normal(ks[4], (b_s, nq, d_model), jnp.float32)
    keys_in = jax.random.normal(ks[5], (b_s, nk, d_model), jnp.float32)
    values = jax.random.normal(ks[6], (b_s, nk, d_model), jnp.float32)

    ref = reference(queries, keys_in, values, params, arr, d_k=d_k, d_v=d_v, h=h)

    # v7x-style config: one batch per grid step ("parallel" -> one per TensorCore).
    out = scaled_dot_product_attention_topk(queries, keys_in, values, params, arr,
                                            d_k=d_k, d_v=d_v, h=h, batch_block=1)
    out = jax.block_until_ready(out)
    err = float(jnp.max(jnp.abs(out - ref)))
    assert jnp.allclose(out, ref, atol=2e-3, rtol=2e-3), f"max abs err = {err}"

    # v5e / v6e-style config: whole batch folded into a single grid step.
    out2 = scaled_dot_product_attention_topk(queries, keys_in, values, params, arr,
                                             d_k=d_k, d_v=d_v, h=h, batch_block=b_s)
    out2 = jax.block_until_ready(out2)
    err2 = float(jnp.max(jnp.abs(out2 - ref)))
    assert jnp.allclose(out2, ref, atol=2e-3, rtol=2e-3), f"max abs err = {err2}"

    print("KERNEL_OK")
</pallas_src>

<mosaic_0001>
module attributes {stable_mosaic.version = 11 : i64} {
  func.func @_attention_kernel(%arg0: i32, %arg1: memref<1x32x64xf32, #tpu.memory_space<vmem>>, %arg2: memref<1x32x64xf32, #tpu.memory_space<vmem>>, %arg3: memref<1x32x64xf32, #tpu.memory_space<vmem>>, %arg4: memref<64x128xf32, #tpu.memory_space<vmem>>, %arg5: memref<1x128xf32, #tpu.memory_space<vmem>>, %arg6: memref<64x128xf32, #tpu.memory_space<vmem>>, %arg7: memref<1x128xf32, #tpu.memory_space<vmem>>, %arg8: memref<64x128xf32, #tpu.memory_space<vmem>>, %arg9: memref<1x128xf32, #tpu.memory_space<vmem>>, %arg10: memref<128x64xf32, #tpu.memory_space<vmem>>, %arg11: memref<1x64xf32, #tpu.memory_space<vmem>>, %arg12: memref<32x4096xf32, #tpu.memory_space<vmem>>, %arg13: memref<1x128xf32, #tpu.memory_space<vmem>>, %arg14: memref<128x128xf32, #tpu.memory_space<vmem>>, %arg15: memref<128x128xf32, #tpu.memory_space<vmem>>, %arg16: memref<128x128xf32, #tpu.memory_space<vmem>>, %arg17: memref<1x32x64xf32, #tpu.memory_space<vmem>>) attributes {dimension_semantics = [#tpu.dimension_semantics<parallel>], iteration_bounds = array<i64: 2>, scalar_prefetch = 0 : i64, scratch_operands = 0 : i64, tpu.core_type = #tpu.core_type<tc>, window_params = [{transform_indices = @transform_0, window_bounds = array<i64: 1, 32, 64>}, {transform_indices = @transform_1, window_bounds = array<i64: 1, 32, 64>}, {transform_indices = @transform_2, window_bounds = array<i64: 1, 32, 64>}, {pipeline_mode = #tpu.pipeline_mode<synchronous>, transform_indices = @transform_3, window_bounds = array<i64: 64, 128>}, {pipeline_mode = #tpu.pipeline_mode<synchronous>, transform_indices = @transform_4, window_bounds = array<i64: 1, 128>}, {pipeline_mode = #tpu.pipeline_mode<synchronous>, transform_indices = @transform_5, window_bounds = array<i64: 64, 128>}, {pipeline_mode = #tpu.pipeline_mode<synchronous>, transform_indices = @transform_6, window_bounds = array<i64: 1, 128>}, {pipeline_mode = #tpu.pipeline_mode<synchronous>, transform_indices = @transform_7, window_bounds = array<i64: 64, 128>}, {pipeline_mode = #tpu.pipeline_mode<synchronous>, transform_indices = @transform_8, window_bounds = array<i64: 1, 128>}, {pipeline_mode = #tpu.pipeline_mode<synchronous>, transform_indices = @transform_9, window_bounds = array<i64: 128, 64>}, {pipeline_mode = #tpu.pipeline_mode<synchronous>, transform_indices = @transform_10, window_bounds = array<i64: 1, 64>}, {pipeline_mode = #tpu.pipeline_mode<synchronous>, transform_indices = @transform_11, window_bounds = array<i64: 32, 4096>}, {pipeline_mode = #tpu.pipeline_mode<synchronous>, transform_indices = @transform_12, window_bounds = array<i64: 1, 128>}, {pipeline_mode = #tpu.pipeline_mode<synchronous>, transform_indices = @transform_13, window_bounds = array<i64: 128, 128>}, {pipeline_mode = #tpu.pipeline_mode<synchronous>, transform_indices = @transform_14, window_bounds = array<i64: 128, 128>}, {pipeline_mode = #tpu.pipeline_mode<synchronous>, transform_indices = @transform_15, window_bounds = array<i64: 128, 128>}, {transform_indices = @transform_16, window_bounds = array<i64: 1, 32, 64>}]} {
    %c0 = arith.constant 0 : index
    %c0_0 = arith.constant 0 : index
    %0 = vector.load %arg4[%c0, %c0_0] : memref<64x128xf32, #tpu.memory_space<vmem>>, vector<64x128xf32>
    %c0_1 = arith.constant 0 : index
    %c0_2 = arith.constant 0 : index
    %1 = vector.load %arg5[%c0_1, %c0_2] : memref<1x128xf32, #tpu.memory_space<vmem>>, vector<1x128xf32>
    %c0_3 = arith.constant 0 : index
    %c0_4 = arith.constant 0 : index
    %2 = vector.load %arg6[%c0_3, %c0_4] : memref<64x128xf32, #tpu.memory_space<vmem>>, vector<64x128xf32>
    %c0_5 = arith.constant 0 : index
    %c0_6 = arith.constant 0 : index
    %3 = vector.load %arg7[%c0_5, %c0_6] : memref<1x128xf32, #tpu.memory_space<vmem>>, vector<1x128xf32>
    %c0_7 = arith.constant 0 : index
    %c0_8 = arith.constant 0 : index
    %4 = vector.load %arg8[%c0_7, %c0_8] : memref<64x128xf32, #tpu.memory_space<vmem>>, vector<64x128xf32>
    %c0_9 = arith.constant 0 : index
    %c0_10 = arith.constant 0 : index
    %5 = vector.load %arg9[%c0_9, %c0_10] : memref<1x128xf32, #tpu.memory_space<vmem>>, vector<1x128xf32>
    %c0_11 = arith.constant 0 : index
    %c0_12 = arith.constant 0 : index
    %6 = vector.load %arg10[%c0_11, %c0_12] : memref<128x64xf32, #tpu.memory_space<vmem>>, vector<128x64xf32>
    %c0_13 = arith.constant 0 : index
    %c0_14 = arith.constant 0 : index
    %7 = vector.load %arg11[%c0_13, %c0_14] : memref<1x64xf32, #tpu.memory_space<vmem>>, vector<1x64xf32>
    %c0_15 = arith.constant 0 : index
    %c0_16 = arith.constant 0 : index
    %8 = vector.load %arg12[%c0_15, %c0_16] : memref<32x4096xf32, #tpu.memory_space<vmem>>, vector<32x4096xf32>
    %c0_17 = arith.constant 0 : index
    %c0_18 = arith.constant 0 : index
    %9 = vector.load %arg13[%c0_17, %c0_18] : memref<1x128xf32, #tpu.memory_space<vmem>>, vector<1x128xf32>
    %c0_19 = arith.constant 0 : index
    %c0_20 = arith.constant 0 : index
    %10 = vector.load %arg14[%c0_19, %c0_20] : memref<128x128xf32, #tpu.memory_space<vmem>>, vector<128x128xf32>
    %c0_21 = arith.constant 0 : index
    %c0_22 = arith.constant 0 : index
    %11 = vector.load %arg15[%c0_21, %c0_22] : memref<128x128xf32, #tpu.memory_space<vmem>>, vector<128x128xf32>
    %c0_23 = arith.constant 0 : index
    %c0_24 = arith.constant 0 : index
    %12 = vector.load %arg16[%c0_23, %c0_24] : memref<128x128xf32, #tpu.memory_space<vmem>>, vector<128x128xf32>
    %c0_25 = arith.constant 0 : index
    %c0_26 = arith.constant 0 : index
    %c0_27 = arith.constant 0 : index
    %13 = vector.load %arg1[%c0_25, %c0_26, %c0_27] : memref<1x32x64xf32, #tpu.memory_space<vmem>>, vector<1x32x64xf32>
    %14 = vector.shape_cast %13 : vector<1x32x64xf32> to vector<32x64xf32>
    %cst = arith.constant dense<0.000000e+00> : vector<32x128xf32>
    %15 = tpu.matmul %14, %0, %cst {dimension_numbers = #tpu.dot_dimension_numbers<[1], [0], [0], [1], [0, 0, 1, 1], [], []>} : vector<32x64xf32>, vector<64x128xf32>, vector<32x128xf32> -> vector<32x128xf32>
    %16 = vector.broadcast %1 : vector<1x128xf32> to vector<32x128xf32>
    %17 = arith.addf %15, %16 : vector<32x128xf32>
    %c0_28 = arith.constant 0 : index
    %c0_29 = arith.constant 0 : index
    %c0_30 = arith.constant 0 : index
    %18 = vector.load %arg2[%c0_28, %c0_29, %c0_30] : memref<1x32x64xf32, #tpu.memory_space<vmem>>, vector<1x32x64xf32>
    %19 = vector.shape_cast %18 : vector<1x32x64xf32> to vector<32x64xf32>
    %cst_31 = arith.constant dense<0.000000e+00> : vector<32x128xf32>
    %20 = tpu.matmul %19, %2, %cst_31 {dimension_numbers = #tpu.dot_dimension_numbers<[1], [0], [0], [1], [0, 0, 1, 1], [], []>} : vector<32x64xf32>, vector<64x128xf32>, vector<32x128xf32> -> vector<32x128xf32>
    %21 = vector.broadcast %3 : vector<1x128xf32> to vector<32x128xf32>
    %22 = arith.addf %20, %21 : vector<32x128xf32>
    %c0_32 = arith.constant 0 : index
    %c0_33 = arith.constant 0 : index
    %c0_34 = arith.constant 0 : index
    %23 = vector.load %arg3[%c0_32, %c0_33, %c0_34] : memref<1x32x64xf32, #tpu.memory_space<vmem>>, vector<1x32x64xf32>
    %24 = vector.shape_cast %23 : vector<1x32x64xf32> to vector<32x64xf32>
    %cst_35 = arith.constant dense<0.000000e+00> : vector<32x128xf32>
    %25 = tpu.matmul %24, %4, %cst_35 {dimension_numbers = #tpu.dot_dimension_numbers<[1], [0], [0], [1], [0, 0, 1, 1], [], []>} : vector<32x64xf32>, vector<64x128xf32>, vector<32x128xf32> -> vector<32x128xf32>
    %26 = vector.broadcast %5 : vector<1x128xf32> to vector<32x128xf32>
    %27 = arith.addf %25, %26 : vector<32x128xf32>
    %28 = tpu.concatenate %22, %22, %22, %22 in 0 : vector<32x128xf32>, vector<32x128xf32>, vector<32x128xf32>, vector<32x128xf32> -> vector<128x128xf32>
    %29 = arith.mulf %28, %11 : vector<128x128xf32>
    %30 = tpu.concatenate %27, %27, %27, %27 in 0 : vector<32x128xf32>, vector<32x128xf32>, vector<32x128xf32>, vector<32x128xf32> -> vector<128x128xf32>
    %31 = arith.mulf %30, %12 : vector<128x128xf32>
    %cst_36 = arith.constant dense<0.000000e+00> : vector<32x128xf32>
    %32 = tpu.matmul %17, %29, %cst_36 {dimension_numbers = #tpu.dot_dimension_numbers<[1], [1], [0], [0], [0, 0, 1, 0], [], []>} : vector<32x128xf32>, vector<128x128xf32>, vector<32x128xf32> -> vector<32x128xf32>
    %cst_37 = arith.constant 0.176776692 : f32
    %33 = vector.broadcast %cst_37 : f32 to vector<32x128xf32>
    %34 = arith.mulf %32, %33 : vector<32x128xf32>
    %35 = vector.shape_cast %34 : vector<32x128xf32> to vector<32x128x1xf32>
    %36 = vector.shape_cast %34 : vector<32x128xf32> to vector<32x1x128xf32>
    %37 = vector.broadcast %35 : vector<32x128x1xf32> to vector<32x128x128xf32>
    %38 = vector.broadcast %36 : vector<32x1x128xf32> to vector<32x128x128xf32>
    %39 = arith.cmpf ogt, %37, %38 : vector<32x128x128xf32>
    %40 = vector.shape_cast %10 : vector<128x128xf32> to vector<1x128x128xf32>
    %cst_38 = arith.constant 0.000000e+00 : f32
    %41 = vector.shape_cast %40 : vector<1x128x128xf32> to vector<1x128x128xf32>
    %42 = vector.broadcast %41 : vector<1x128x128xf32> to vector<32x128x128xf32>
    %43 = vector.broadcast %cst_38 : f32 to vector<32x128x128xf32>
    %44 = arith.select %39, %42, %43 : vector<32x128x128xi1>, vector<32x128x128xf32>
    %45 = vector.shape_cast %44 : vector<32x128x128xf32> to vector<4096x128xf32>
    %cst_39 = arith.constant dense<0.000000e+00> : vector<32x128xf32>
    %46 = tpu.matmul %8, %45, %cst_39 {dimension_numbers = #tpu.dot_dimension_numbers<[1], [0], [0], [1], [0, 0, 1, 1], [], []>} : vector<32x4096xf32>, vector<4096x128xf32>, vector<32x128xf32> -> vector<32x128xf32>
    %47 = vector.broadcast %9 : vector<1x128xf32> to vector<32x128xf32>
    %48 = arith.cmpf olt, %46, %47 : vector<32x128xf32>
    %cst_40 = arith.constant 0.000000e+00 : f32
    %49 = vector.broadcast %cst_40 : f32 to vector<32x128xf32>
    %50 = arith.select %48, %34, %49 : vector<32x128xi1>, vector<32x128xf32>
    %cst_41 = arith.constant dense<0xFF800000> : vector<32xf32>
    %51 = vector.multi_reduction <maximumf>, %50, %cst_41 [1] : vector<32x128xf32> to vector<32xf32>
    %52 = vector.shape_cast %51 : vector<32xf32> to vector<32x1xf32>
    %53 = vector.broadcast %52 : vector<32x1xf32> to vector<32x128xf32>
    %54 = arith.subf %50, %53 : vector<32x128xf32>
    %55 = math.exp %54 : vector<32x128xf32>
    %cst_42 = arith.constant dense<0.000000e+00> : vector<32x128xf32>
    %56 = tpu.matmul %55, %10, %cst_42 {dimension_numbers = #tpu.dot_dimension_numbers<[1], [0], [0], [1], [0, 0, 1, 1], [], []>} : vector<32x128xf32>, vector<128x128xf32>, vector<32x128xf32> -> vector<32x128xf32>
    %57 = arith.divf %55, %56 : vector<32x128xf32>
    %cst_43 = arith.constant dense<0.000000e+00> : vector<32x128xf32>
    %58 = tpu.matmul %57, %31, %cst_43 {dimension_numbers = #tpu.dot_dimension_numbers<[1], [0], [0], [1], [0, 0, 1, 1], [], []>} : vector<32x128xf32>, vector<128x128xf32>, vector<32x128xf32> -> vector<32x128xf32>
    %cst_44 = arith.constant dense<0.000000e+00> : vector<32x64xf32>
    %59 = tpu.matmul %58, %6, %cst_44 {dimension_numbers = #tpu.dot_dimension_numbers<[1], [0], [0], [1], [0, 0, 1, 1], [], []>} : vector<32x128xf32>, vector<128x64xf32>, vector<32x64xf32> -> vector<32x64xf32>
    %60 = vector.broadcast %7 : vector<1x64xf32> to vector<32x64xf32>
    %61 = arith.addf %59, %60 : vector<32x64xf32>
    %c0_45 = arith.constant 0 : index
    %c0_46 = arith.constant 0 : index
    %c0_47 = arith.constant 0 : index
    %62 = vector.load %arg17[%c0_45, %c0_46, %c0_47] : memref<1x32x64xf32, #tpu.memory_space<vmem>>, vector<1x32x64xf32>
    %63 = vector.shape_cast %62 : vector<1x32x64xf32> to vector<32x64xf32>
    %64 = vector.shape_cast %61 : vector<32x64xf32> to vector<1x32x64xf32>
    tpu.vector_store %arg17[%c0_45, %c0_46, %c0_47], %64 {strides = array<i32>} : memref<1x32x64xf32, #tpu.memory_space<vmem>>, vector<1x32x64xf32>,
    return
  }
  func.func @transform_0(%arg0: i32) -> (i32, i32, i32) {
    %c0_i32 = arith.constant 0 : i32
    %c0_i32_0 = arith.constant 0 : i32
    %c0_i32_1 = arith.constant 0 : i32
    return %arg0, %c0_i32, %c0_i32_0 : i32, i32, i32
  }
  func.func @transform_1(%arg0: i32) -> (i32, i32, i32) {
    %c0_i32 = arith.constant 0 : i32
    %c0_i32_0 = arith.constant 0 : i32
    %c0_i32_1 = arith.constant 0 : i32
    return %arg0, %c0_i32, %c0_i32_0 : i32, i32, i32
  }
  func.func @transform_2(%arg0: i32) -> (i32, i32, i32) {
    %c0_i32 = arith.constant 0 : i32
    %c0_i32_0 = arith.constant 0 : i32
    %c0_i32_1 = arith.constant 0 : i32
    return %arg0, %c0_i32, %c0_i32_0 : i32, i32, i32
  }
  func.func @transform_3(%arg0: i32) -> (i32, i32) {
    %c0_i32 = arith.constant 0 : i32
    %c0_i32_0 = arith.constant 0 : i32
    %c0_i32_1 = arith.constant 0 : i32
    return %c0_i32, %c0_i32_0 : i32, i32
  }
  func.func @transform_4(%arg0: i32) -> (i32, i32) {
    %c0_i32 = arith.constant 0 : i32
    %c0_i32_0 = arith.constant 0 : i32
    %c0_i32_1 = arith.constant 0 : i32
    return %c0_i32, %c0_i32_0 : i32, i32
  }
  func.func @transform_5(%arg0: i32) -> (i32, i32) {
    %c0_i32 = arith.constant 0 : i32
    %c0_i32_0 = arith.constant 0 : i32
    %c0_i32_1 = arith.constant 0 : i32
    return %c0_i32, %c0_i32_0 : i32, i32
  }
  func.func @transform_6(%arg0: i32) -> (i32, i32) {
    %c0_i32 = arith.constant 0 : i32
    %c0_i32_0 = arith.constant 0 : i32
    %c0_i32_1 = arith.constant 0 : i32
    return %c0_i32, %c0_i32_0 : i32, i32
  }
  func.func @transform_7(%arg0: i32) -> (i32, i32) {
    %c0_i32 = arith.constant 0 : i32
    %c0_i32_0 = arith.constant 0 : i32
    %c0_i32_1 = arith.constant 0 : i32
    return %c0_i32, %c0_i32_0 : i32, i32
  }
  func.func @transform_8(%arg0: i32) -> (i32, i32) {
    %c0_i32 = arith.constant 0 : i32
    %c0_i32_0 = arith.constant 0 : i32
    %c0_i32_1 = arith.constant 0 : i32
    return %c0_i32, %c0_i32_0 : i32, i32
  }
  func.func @transform_9(%arg0: i32) -> (i32, i32) {
    %c0_i32 = arith.constant 0 : i32
    %c0_i32_0 = arith.constant 0 : i32
    %c0_i32_1 = arith.constant 0 : i32
    return %c0_i32, %c0_i32_0 : i32, i32
  }
  func.func @transform_10(%arg0: i32) -> (i32, i32) {
    %c0_i32 = arith.constant 0 : i32
    %c0_i32_0 = arith.constant 0 : i32
    %c0_i32_1 = arith.constant 0 : i32
    return %c0_i32, %c0_i32_0 : i32, i32
  }
  func.func @transform_11(%arg0: i32) -> (i32, i32) {
    %c0_i32 = arith.constant 0 : i32
    %c0_i32_0 = arith.constant 0 : i32
    %c0_i32_1 = arith.constant 0 : i32
    return %c0_i32, %c0_i32_0 : i32, i32
  }
  func.func @transform_12(%arg0: i32) -> (i32, i32) {
    %c0_i32 = arith.constant 0 : i32
    %c0_i32_0 = arith.constant 0 : i32
    %c0_i32_1 = arith.constant 0 : i32
    return %c0_i32, %c0_i32_0 : i32, i32
  }
  func.func @transform_13(%arg0: i32) -> (i32, i32) {
    %c0_i32 = arith.constant 0 : i32
    %c0_i32_0 = arith.constant 0 : i32
    %c0_i32_1 = arith.constant 0 : i32
    return %c0_i32, %c0_i32_0 : i32, i32
  }
  func.func @transform_14(%arg0: i32) -> (i32, i32) {
    %c0_i32 = arith.constant 0 : i32
    %c0_i32_0 = arith.constant 0 : i32
    %c0_i32_1 = arith.constant 0 : i32
    return %c0_i32, %c0_i32_0 : i32, i32
  }
  func.func @transform_15(%arg0: i32) -> (i32, i32) {
    %c0_i32 = arith.constant 0 : i32
    %c0_i32_0 = arith.constant 0 : i32
    %c0_i32_1 = arith.constant 0 : i32
    return %c0_i32, %c0_i32_0 : i32, i32
  }
  func.func @transform_16(%arg0: i32) -> (i32, i32, i32) {
    %c0_i32 = arith.constant 0 : i32
    %c0_i32_0 = arith.constant 0 : i32
    %c0_i32_1 = arith.constant 0 : i32
    return %arg0, %c0_i32, %c0_i32_0 : i32, i32, i32
  }
}

</mosaic_0001>

<bundles_post_ra>
// kernel: tpu_custom_call.1
= control target key start
LH: loop header
LB: loop body
LE: loop exit
PB: predicated region body
PF: predicated region fallthrough
CT: control target
= control target key end

     0   :  { %s13208_s0 = inlined_call_operand.vmem [shape: f32[2,32,64], index: 0, kind: input, shape index: {}]   ;;  %s13209_s1 = inlined_call_operand.hbm [shape: f32[2,32,64], index: 1, kind: input, shape index: {}]   ;;  %s13210_s2 = inlined_call_operand.hbm [shape: f32[2,32,64], index: 2, kind: input, shape index: {}]   ;;  %s13211_s3 = inlined_call_operand.hbm [shape: f32[64,128], index: 3, kind: input, shape index: {}]   ;;  %s13212_s4 = inlined_call_operand.vmem [shape: f32[1,128], index: 4, kind: input, shape index: {}]   ;;  %s13213_s5 = inlined_call_operand.hbm [shape: f32[64,128], index: 5, kind: input, shape index: {}]   ;;  %s13214_s6 = inlined_call_operand.vmem [shape: f32[1,128], index: 6, kind: input, shape index: {}]   ;;  %s13215_s7 = inlined_call_operand.hbm [shape: f32[64,128], index: 7, kind: input, shape index: {}]   ;;  %s13216_s8 = inlined_call_operand.vmem [shape: f32[1,128], index: 8, kind: input, shape index: {}]   ;;  %s13217_s9 = inlined_call_operand.vmem [shape: f32[128,64], index: 9, kind: input, shape index: {}]   ;;  %s13218_s10 = inlined_call_operand.vmem [shape: f32[1,64], index: 10, kind: input, shape index: {}]   ;;  %s13219_s11 = inlined_call_operand.hbm [shape: f32[32,4096], index: 11, kind: input, shape index: {}]   ;;  %s13220_s12 = inlined_call_operand.vmem [shape: f32[1,128], index: 12, kind: input, shape index: {}]   ;;  %s13221_s13 = inlined_call_operand.vmem [shape: f32[128,128], index: 13, kind: input, shape index: {}]   ;;  %s13222_s14 = inlined_call_operand.hbm [shape: f32[128,128], index: 14, kind: input, shape index: {}]   ;;  %s13223_s15 = inlined_call_operand.hbm [shape: f32[128,128], index: 15, kind: input, shape index: {}]   ;;  %s13224_s16 = inlined_call_operand.hbm [shape: f32[2,32,64], index: 16, kind: output, shape index: {}]  }
   0x1   :  { %13341 = sst [smem:[#allocation127_spill]] %s13208_s0 }
   0x2   :  { %13342 = sst [smem:[#allocation128_spill]] %s13211_s3 }
   0x3   :  { %13343 = sst [smem:[#allocation129_spill]] %s13212_s4 }
   0x4   :  { %13344 = sst [smem:[#allocation130_spill]] %s13213_s5 }
   0x5   :  { %13345 = sst [smem:[#allocation131_spill]] %s13215_s7 }
   0x6   :  { %13346 = sst [smem:[#allocation132_spill]] %s13216_s8 }
   0x7   :  { %13347 = sst [smem:[#allocation133_spill]] %s13217_s9 }
   0x8   :  { %13348 = sst [smem:[#allocation134_spill]] %s13218_s10 }
   0x9   :  { %13349 = sst [smem:[#allocation135_spill]] %s13219_s11 }
   0xa   :  { %13350 = sst [smem:[#allocation136_spill]] %s13220_s12 }
   0xb   :  { %13351 = sst [smem:[#allocation137_spill]] %s13221_s13 }
   0xc   :  { %13352 = sst [smem:[#allocation138_spill]] %s13222_s14 }
   0xd   :  { %13353 = sst [smem:[#allocation139_spill]] %s13223_s15 }
   0xe   :  { %13354 = sst [smem:[#allocation140_spill]] %s13224_s16 }
   0xf   :  { %21 = vsyncpa [#allocation3], 0 }
  0x10   :  { %23 = vsyncpa [#allocation3 + $0x1], 0 }
  0x11   :  { %24 = vsyncpa [#allocation6], 0 }
  0x12   :  { %26 = vsyncpa [#allocation6 + $0x1], 0 }
  0x13   :  { %27 = vsyncpa [#allocation9], 0 }
  0x14   :  { %28 = vsyncpa [#allocation12], 0 }
  0x15   :  { %29 = vsyncpa [#allocation15], 0 }
  0x16   :  { %30 = vsyncpa [#allocation4], 0 }
  0x17   :  { %32 = vsyncpa [#allocation4 + $0x1], 0  ;;  %s9824_s21 = smov 0   ;;  %s9826_s22 = smov 0  }
  0x18   :  { %s9828_s23 = smov 0   ;;  %s9830_s24 = smov 0  }
  0x19 LB: > { %s9723_s25 = smov [#allocation7]   ;;  %s9845_s27 = sadd.s32 4294967295, %s9721_s24   ;;  %s9721_s24 = sphi %s9830_s24, %s13678_s24   ;;  %s9717_s23 = sphi %s9828_s23, %s13677_s23   ;;  %s9713_s22 = sphi %s9826_s22, %s13676_s22   ;;  %s9709_s21 = sphi %s9824_s21, %s13675_s21  }
  0x1a   : > { %s432_s26 = sshll.u32 %s9723_s25, 4  ;;  %p6726_p0 = scmp.ge.s32.totalorder %s9721_s24, 1  ;;  %s9850_s26 = int_to_ptr.vmem [resolvable:$true] %s432_s26 }
  0x1b   : > { %p13232_p1 = scmp.eq.s32.totalorder %s9845_s27, 0  ;;  %p420_p2 = scmp.lt.s32.totalorder %s9721_s24, 3 }
  0x1c   : > { %s9724_s29 = smov [#allocation8]   ;;  %s9725_s17 = smov [#allocation11]  }
  0x1d   : > { %p9852_p3 = pnand %p6726_p0, %p420_p2  ;;  %s448_s30 = sshll.u32 %s9724_s29, 4  ;;  %s9865_s30 = int_to_ptr.vmem [resolvable:$true] %s448_s30 }
  0x1e   : > { %s486_s18 = sshll.u32 %s9725_s17, 4  ;;  %s13357_s3 = sld [smem:[#allocation128_spill]]  ;;  %s9867_s18 = int_to_ptr.vmem [resolvable:$true] %s486_s18 }
  0x1f   : > { %s13355_s28 = scalar_select %p9852_p3, 1, 0 }
  0x20   : > { %p9302_p5 = pneg %p9852_p3 }
  0x22   : > { %p9861_p6 = pnand %p9302_p5, %p13232_p1 }
  0x24   : > { %s9407_s25 = scalar_lea.hbm %s13357_s3, 1024  ;;  %p9877_p8 = pneg %p9861_p6 }
  0x25   : > { %p9408_p7 = scmp.ne.s32.totalorder %s13357_s3, %s9407_s25  ;;  %p9414_p11 = scmp.lt.u32.totalorder %s9407_s25, %s13357_s3 }
  0x27   : > { %p9410_p9 = pnand %p9877_p8, %p9408_p7 }
  0x29   : > { %p9411_p10 = pneg %p9410_p9 }
  0x2b   : > { %p9416_p12 = pnand %p9414_p11, %p9411_p10 }
  0x2d   : > { %9419 = shalt.err (!%p9416_p12)
}
  0x2e   : > { %s9420_s10 = scalar_lea.vmem %s9850_s26, 1024  ;;  %p9428_p5 = scmp.lt.s32.totalorder %s9850_s26, %s9850_s26 }
  0x2f   : > { %p9421_p13 = scmp.ne.s32.totalorder %s9850_s26, %s9420_s10  ;;  %p9429_p4 = scmp.lt.s32.totalorder %s9420_s10, %s9420_s10 }
  0x31   : > { %p9423_p0 = pnand %p9421_p13, %p9877_p8  ;;  %p9430_p7 = por %p9429_p4, %p9428_p5 }
  0x33   : > { %p9424_p2 = pneg %p9423_p0 }
  0x35   : > { %p9431_p9 = pnand %p9430_p7, %p9424_p2 }
  0x37   : > { %9434 = shalt.err (!%p9431_p9)
}
  0x38   : > { %s13228_s16 = smov 128   ;;  %s13230_s9 = smov 8  }
  0x39   : > { %9305 = dma.hbm_to_vmem [thread:$0]  (!%p9861_p6), %s13357_s3, 1024, %s9850_s26, [#allocation6], %s13228_s16, %s13228_s16, %s13230_s9  }
  0x3a   : > { %s13359_s5 = sld [smem:[#allocation130_spill]] }
  0x40   : > { %s9435_s10 = scalar_lea.hbm %s13359_s5, 1024 }
  0x41   : > { %p9436_p4 = scmp.ne.s32.totalorder %s13359_s5, %s9435_s10  ;;  %p9442_p12 = scmp.lt.u32.totalorder %s9435_s10, %s13359_s5 }
  0x43   : > { %p9438_p10 = pnand %p9436_p4, %p9877_p8 }
  0x45   : > { %p9439_p11 = pneg %p9438_p10 }
  0x47   : > { %p9444_p13 = pnand %p9442_p12, %p9439_p11 }
  0x49   : > { %9447 = shalt.err (!%p9444_p13)
}
  0x4a   : > { %s9448_s26 = scalar_lea.vmem %s9865_s30, 1024  ;;  %p9456_p7 = scmp.lt.s32.totalorder %s9865_s30, %s9865_s30 }
  0x4b   : > { %p9449_p0 = scmp.ne.s32.totalorder %s9865_s30, %s9448_s26  ;;  %p9457_p9 = scmp.lt.s32.totalorder %s9448_s26, %s9448_s26 }
  0x4d   : > { %p9451_p2 = pnand %p9449_p0, %p9877_p8  ;;  %p9458_p4 = por %p9457_p9, %p9456_p7 }
  0x4f   : > { %p9452_p5 = pneg %p9451_p2 }
  0x51   : > { %p9459_p10 = pnand %p9458_p4, %p9452_p5 }
  0x53   : > { %9462 = shalt.err (!%p9459_p10)
}
  0x54   : > { %9308 = dma.hbm_to_vmem [thread:$0]  (!%p9861_p6), %s13359_s5, 1024, %s9865_s30, [#allocation9], %s13228_s16, %s13228_s16, %s13230_s9  }
  0x55   : > { %s13360_s11 = sld [smem:[#allocation135_spill]] }
  0x5b   : > { %s9463_s19 = scalar_lea.hbm %s13360_s11, 16384 }
  0x5c   : > { %p9464_p11 = scmp.ne.s32.totalorder %s13360_s11, %s9463_s19  ;;  %p9470_p0 = scmp.lt.u32.totalorder %s9463_s19, %s13360_s11 }
  0x5e   : > { %p9466_p12 = pnand %p9464_p11, %p9877_p8 }
  0x60   : > { %p9467_p13 = pneg %p9466_p12 }
  0x62   : > { %p9472_p2 = pnand %p9470_p0, %p9467_p13 }
  0x64   : > { %9475 = shalt.err (!%p9472_p2)
}
  0x65   : > { %s9476_s30 = scalar_lea.vmem %s9867_s18, 16384  ;;  %p9484_p4 = scmp.lt.s32.totalorder %s9867_s18, %s9867_s18 }
  0x66   : > { %p9477_p5 = scmp.ne.s32.totalorder %s9867_s18, %s9476_s30  ;;  %p9485_p10 = scmp.lt.s32.totalorder %s9476_s30, %s9476_s30 }
  0x68   : > { %p9479_p7 = pnand %p9477_p5, %p9877_p8  ;;  %p9486_p11 = por %p9485_p10, %p9484_p4 }
  0x6a   : > { %p9480_p9 = pneg %p9479_p7 }
  0x6c   : > { %p9487_p12 = pnand %p9486_p11, %p9480_p9 }
  0x6e   : > { %9490 = shalt.err (!%p9487_p12)
}
  0x6f   : > { %s9728_s26 = smov 4096   ;;  %s9729_s4 = smov 256  }
  0x70   : > { %9314 = dma.hbm_to_vmem [thread:$0]  (!%p9861_p6), %s13360_s11, 16384, %s9867_s18, [#allocation12], %s9728_s26, %s9728_s26, %s9729_s4  }
  0x71   : > { %s9730_s13 = smov [#allocation10]   ;;  %s9731_s20 = smov [#allocation13]  }
  0x72   : > { %s464_s19 = sshll.u32 %s9730_s13, 4  ;;  %s505_s25 = sshll.u32 %s9731_s20, 4  ;;  %s465_s19 = int_to_ptr.vmem [resolvable:$true] %s464_s19  ;;  %s506_s25 = int_to_ptr.vmem [resolvable:$true] %s505_s25 }
  0x73   : > { %s13361_s7 = sld [smem:[#allocation131_spill]] }
  0x79   : > { %s9491_s30 = scalar_lea.hbm %s13361_s7, 1024 }
  0x7a   : > { %p9492_p13 = scmp.ne.s32.totalorder %s13361_s7, %s9491_s30  ;;  %p9498_p5 = scmp.lt.u32.totalorder %s9491_s30, %s13361_s7 }
  0x7c   : > { %p9494_p0 = pnand %p9492_p13, %p9877_p8 }
  0x7e   : > { %p9495_p2 = pneg %p9494_p0 }
  0x80   : > { %p9500_p7 = pnand %p9498_p5, %p9495_p2 }
  0x82   : > { %9503 = shalt.err (!%p9500_p7)
}
  0x83   : > { %s9504_s18 = scalar_lea.vmem %s465_s19, 1024  ;;  %p9512_p11 = scmp.lt.s32.totalorder %s465_s19, %s465_s19 }
  0x84   : > { %p9505_p9 = scmp.ne.s32.totalorder %s465_s19, %s9504_s18  ;;  %p9513_p12 = scmp.lt.s32.totalorder %s9504_s18, %s9504_s18 }
  0x86   : > { %p9507_p4 = pnand %p9505_p9, %p9877_p8  ;;  %p9514_p1 = por %p9513_p12, %p9512_p11 }
  0x88   : > { %p9508_p10 = pneg %p9507_p4 }
  0x8a   : > { %p9515_p3 = pnand %p9514_p1, %p9508_p10 }
  0x8c   : > { %9518 = shalt.err (!%p9515_p3)
}
  0x8d   : > { %s13362_s16 = smov 8   ;;  %s13363_s9 = smov 128  }
  0x8e   : > { %9311 = dma.hbm_to_vmem [thread:$0]  (!%p9861_p6), %s13361_s7, 1024, %s465_s19, [#allocation9], %s13363_s9, %s13363_s9, %s13362_s16  }
  0x8f   : > { %s13364_s14 = sld [smem:[#allocation138_spill]] }
  0x95   : > { %s9519_s8 = scalar_lea.hbm %s13364_s14, 2048 }
  0x96   : > { %p9520_p1 = scmp.ne.s32.totalorder %s13364_s14, %s9519_s8  ;;  %p9526_p0 = scmp.lt.u32.totalorder %s9519_s8, %s13364_s14 }
  0x98   : > { %p9522_p3 = pnand %p9520_p1, %p9877_p8 }
  0x9a   : > { %p9523_p13 = pneg %p9522_p3 }
  0x9c   : > { %p9528_p2 = pnand %p9526_p0, %p9523_p13 }
  0x9e   : > { %9531 = shalt.err (!%p9528_p2)
}
  0x9f   : > { %s9532_s10 = scalar_lea.vmem %s506_s25, 2048  ;;  %p9540_p4 = scmp.lt.s32.totalorder %s506_s25, %s506_s25 }
  0xa0   : > { %p9533_p5 = scmp.ne.s32.totalorder %s506_s25, %s9532_s10  ;;  %p9541_p10 = scmp.lt.s32.totalorder %s9532_s10, %s9532_s10 }
  0xa2   : > { %p9535_p7 = pnand %p9533_p5, %p9877_p8  ;;  %p9542_p11 = por %p9541_p10, %p9540_p4 }
  0xa4   : > { %p9536_p9 = pneg %p9535_p7 }
  0xa6   : > { %p9543_p12 = pnand %p9542_p11, %p9536_p9 }
  0xa8   : > { %9546 = shalt.err (!%p9543_p12)
}
  0xa9   : > { %9317 = dma.hbm_to_vmem [thread:$0]  (!%p9861_p6), %s13364_s14, 2048, %s506_s25, [#allocation12], %s13363_s9, %s13363_s9, %s13362_s16  }
  0xaa   : > { %s9732_s18 = smov [#allocation14]   ;;  %s13365_s15 = sld [smem:[#allocation139_spill]] }
  0xab   : > { %s518_s3 = sshll.u32 %s9732_s18, 4  ;;  %s519_s3 = int_to_ptr.vmem [resolvable:$true] %s518_s3 }
  0xb0   : > { %s9547_s4 = scalar_lea.hbm %s13365_s15, 2048 }
  0xb1   : > { %p9548_p1 = scmp.ne.s32.totalorder %s13365_s15, %s9547_s4  ;;  %p9554_p0 = scmp.lt.u32.totalorder %s9547_s4, %s13365_s15 }
  0xb3   : > { %p9550_p3 = pnand %p9548_p1, %p9877_p8 }
  0xb5   : > { %p9551_p13 = pneg %p9550_p3 }
  0xb7   : > { %p9556_p2 = pnand %p9554_p0, %p9551_p13 }
  0xb9   : > { %9559 = shalt.err (!%p9556_p2)
}
  0xba   : > { %s9560_s25 = scalar_lea.vmem %s519_s3, 2048  ;;  %p9568_p4 = scmp.lt.s32.totalorder %s519_s3, %s519_s3 }
  0xbb   : > { %p9561_p5 = scmp.ne.s32.totalorder %s519_s3, %s9560_s25  ;;  %p9569_p10 = scmp.lt.s32.totalorder %s9560_s25, %s9560_s25 }
  0xbd   : > { %p9563_p7 = pnand %p9561_p5, %p9877_p8  ;;  %p9570_p11 = por %p9569_p10, %p9568_p4 }
  0xbf   : > { %p9564_p9 = pneg %p9563_p7 }
  0xc1   : > { %p9571_p12 = pnand %p9570_p11, %p9564_p9 }
  0xc3   : > { %9574 = shalt.err (!%p9571_p12)
}
  0xc4   : > { %9320 = dma.hbm_to_vmem [thread:$0]  (!%p9861_p6), %s13365_s15, 2048, %s519_s3, [#allocation15], %s13363_s9, %s13363_s9, %s13362_s16  }
  0xc5   : > { %s6725_s0 = sadd.s32 4294967294, %s9721_s24   ;;  %s10015_s29 = sadd.s32 1, %s9721_s24  }
  0xc6   : > { %s68_s19 = ssub.s32 %s9721_s24, %s10015_s29  ;;  %s71_s30 = sadd.s32 1, %s9717_s23 }
  0xc7   : > { %p69_p8 = scmp.eq.s32.totalorder %s68_s19, 0  ;;  %p78_p1 = scmp.ne.s32.totalorder %s9717_s23, %s9713_s22 }
  0xc8   : > { %p79_p3 = scmp.eq.s32.totalorder %s9721_s24, 0  ;;  %p84_p13 = scmp.ne.s32.totalorder %s9713_s22, %s9709_s21 }
  0xc9   : > { %s10026_s18 = scalar_select %p69_p8, %s9717_s23, %s71_s30  }
  0xca   : > { %p10028_p0 = por %p79_p3, %p78_p1  ;;  %p13367_p2 = scmp.eq.s32.totalorder %s9845_s27, 0 }
  0xcb   : > { %p407_p5 = scmp.eq.s32.totalorder %s9845_s27, 1  ;;  %p413_p7 = scmp.eq.s32.totalorder %s6725_s0, 1 }
  0xcc   : > { %p10034_p6 = por %p13367_p2, %p84_p13  ;;  %p9338_p9 = scmp.lt.s32.totalorder %s9721_s24, 2 }
  0xcd   : > { %s540_s26 = sand.u32 1, %s9717_s23   ;;  %p10041_p4 = por %p407_p5, %p78_p1 }
  0xce   : > { %p10045_p10 = por %p413_p7, %p84_p13  ;;  %s6734_s12 = sshll.u32 %s540_s26, 5 }
  0xcf   : > { %s13369_s4 = scalar_select %p10041_p4, 1, 0 }
  0xd0   : > { %s13370_s8 = scalar_select %p10045_p10, 1, 0 }
  0xd1   : > { %s7286_s13 = sshll.u32 %s9721_s24, 9  ;;  %s544_s10 = scalar_lea.vmem [#allocation2], %s6734_s12 }
  0xd2   : > { %s10053_s17 = scalar_lea.hbm %s13209_s1, %s7286_s13  ;;  %s551_s0 = sshll.u32 %s544_s10, 4  ;;  %s10055_s0 = int_to_ptr.vmem [resolvable:$true] %s551_s0 }
  0xd3   : > { %p10059_p11 = pnand %p9338_p9, %p10028_p0  ;;  %s10066_s20 = scalar_lea.hbm %s13210_s2, %s7286_s13 }
  0xd4   : > { %s565_s25 = scalar_lea.vmem [#allocation5], %s6734_s12  ;;  %s10070_s14 = scalar_lea.sflag [#allocation3], %s540_s26 }
  0xd5   : > { %s10068_s11 = sshll.u32 %s565_s25, 4  ;;  %s9575_s10 = scalar_lea.hbm %s10053_s17, 512  ;;  %s10102_s11 = int_to_ptr.vmem [resolvable:$true] %s10068_s11 }
  0xd6   : > { %p9576_p12 = scmp.ne.s32.totalorder %s10053_s17, %s9575_s10  ;;  %p9577_p8 = pneg %p10059_p11 }
  0xd7   : > { %s9580_s7 = scalar_lea.hbm %s13209_s1, 1024  ;;  %p9581_p13 = scmp.lt.u32.totalorder %s10053_s17, %s13209_s1 }
  0xd8   : > { %p9578_p1 = pnand %p9577_p8, %p9576_p12  ;;  %p9582_p0 = scmp.lt.u32.totalorder %s9580_s7, %s9575_s10 }
  0xd9   : > { %p9584_p5 = scmp.lt.u32.totalorder %s9575_s10, %s10053_s17 }
  0xda   : > { %p9579_p3 = pneg %p9578_p1  ;;  %p9583_p2 = por %p9582_p0, %p9581_p13 }
  0xdc   : > { %p9585_p7 = por %p9584_p5, %p9583_p2 }
  0xde   : > { %p9586_p9 = pnand %p9585_p7, %p9579_p3 }
  0xe0   : > { %9589 = shalt.err (!%p9586_p9)
}
  0xe1   : > { %s9590_s26 = scalar_lea.vmem %s10055_s0, 512  ;;  %s9733_s15 = smov [#allocation2]  }
  0xe2   : > { %p9591_p12 = scmp.ne.s32.totalorder %s10055_s0, %s9590_s26  ;;  %s9595_s12 = sshll.u32 %s9733_s15, 4  ;;  %s9596_s12 = int_to_ptr.vmem [resolvable:$false] %s9595_s12 }
  0xe3   : > { %s9597_s25 = scalar_lea.vmem %s9596_s12, 1024  ;;  %p9598_p4 = scmp.lt.s32.totalorder %s10055_s0, %s9596_s12 }
  0xe4   : > { %p9593_p1 = pnand %p9591_p12, %p9577_p8  ;;  %p9599_p13 = scmp.lt.s32.totalorder %s9597_s25, %s9590_s26 }
  0xe6   : > { %p9594_p10 = pneg %p9593_p1  ;;  %p9600_p0 = por %p9599_p13, %p9598_p4 }
  0xe8   : > { %p9601_p2 = pnand %p9600_p0, %p9594_p10 }
  0xea   : > { %9604 = shalt.err (!%p9601_p2)
}
  0xeb   : > { %9324 = dma.hbm_to_vmem [thread:$0]  (!%p10059_p11), %s10053_s17, 512, %s10055_s0, %s10070_s14, %s13363_s9, %s13363_s9, %s13362_s16  }
  0xec   : > { %s561_s10 = sand.u32 1, %s9721_s24   ;;  %s9605_s7 = scalar_lea.hbm %s10066_s20, 512 }
  0xed   : > { %s10105_s5 = scalar_lea.sflag [#allocation6], %s561_s10  ;;  %p9606_p4 = scmp.ne.s32.totalorder %s10066_s20, %s9605_s7 }
  0xee   : > { %s9610_s26 = scalar_lea.hbm %s13210_s2, 1024  ;;  %p9611_p5 = scmp.lt.u32.totalorder %s10066_s20, %s13210_s2 }
  0xef   : > { %p9608_p10 = pnand %p9606_p4, %p9577_p8  ;;  %p9612_p7 = scmp.lt.u32.totalorder %s9610_s26, %s9605_s7 }
  0xf0   : > { %p9614_p12 = scmp.lt.u32.totalorder %s9605_s7, %s10066_s20 }
  0xf1   : > { %p9609_p3 = pneg %p9608_p10  ;;  %p9613_p9 = por %p9612_p7, %p9611_p5 }
  0xf3   : > { %p9615_p1 = por %p9614_p12, %p9613_p9 }
  0xf5   : > { %p9616_p13 = pnand %p9615_p1, %p9609_p3 }
  0xf7   : > { %9619 = shalt.err (!%p9616_p13)
}
  0xf8   : > { %s9620_s14 = scalar_lea.vmem %s10102_s11, 512  ;;  %s9734_s17 = smov [#allocation5]  }
  0xf9   : > { %p9621_p0 = scmp.ne.s32.totalorder %s10102_s11, %s9620_s14  ;;  %s9625_s0 = sshll.u32 %s9734_s17, 4  ;;  %s9626_s0 = int_to_ptr.vmem [resolvable:$false] %s9625_s0 }
  0xfa   : > { %s9627_s25 = scalar_lea.vmem %s9626_s0, 1024  ;;  %p9628_p10 = scmp.lt.s32.totalorder %s10102_s11, %s9626_s0 }
  0xfb   : > { %p9623_p2 = pnand %p9621_p0, %p9577_p8  ;;  %p9629_p5 = scmp.lt.s32.totalorder %s9627_s25, %s9620_s14 }
  0xfd   : > { %p9624_p4 = pneg %p9623_p2  ;;  %p9630_p7 = por %p9629_p5, %p9628_p10 }
  0xff   : > { %p9631_p9 = pnand %p9630_p7, %p9624_p4 }
 0x101   : > { %9634 = shalt.err (!%p9631_p9)
}
 0x102   : > { %9327 = dma.hbm_to_vmem [thread:$0]  (!%p10059_p11), %s10066_s20, 512, %s10102_s11, %s10105_s5, %s13363_s9, %s13363_s9, %s13362_s16  }
 0x103   : > { %p13372_p8 = scmp.ne.s32.totalorder %s13355_s28, 0 }
 0x105   : > { %584 = sbr.rel (%p13372_p8) target bundleno = 3006 (0xbbe), region = 84 }
 0x10c   : > { %s10137_s10 = sand.u32 1, %s9713_s22  }
 0x10d   : > { %s10140_s7 = sshll.u32 %s10137_s10, 5  ;;  %s587_s19 = scalar_lea.sflag [#allocation3], %s10137_s10 }
 0x10e   : > { %s10144_s30 = scalar_lea.vmem [#allocation2], %s10140_s7 }
 0x10f   : > { %9680 = dma.done.wait (%p10034_p6), %s587_s19, 512  }
 0x110   : > { %9682 = vsyncadd (%p10034_p6), %s587_s19, 4294966784  ;;  %s595_s11 = sand.u32 1, %s9845_s27   ;;  %s10152_s16 = scalar_lea.vmem [#allocation5], %s10140_s7 }
 0x111   : > { %s596_s28 = scalar_lea.sflag [#allocation6], %s595_s11 }
 0x112   : > { %9684 = dma.done.wait (%p10034_p6), %s596_s28, 512  }
 0x113   : > { %9686 = vsyncadd (%p10034_p6), %s596_s28, 4294966784  ;;  %p13373_p11 = scmp.eq.s32.totalorder %s9845_s27, 0 }
 0x115   : > { %9688 = dma.done.wait (%p13373_p11), [#allocation6], 1024   ;;  %p13374_p3 = pmov %p13373_p11 }
 0x117   : > { %9690 = vsyncadd (%p13374_p3), [#allocation6], 4294966272  ;;  %p13375_p12 = pmov %p13374_p3 }
 0x118   : > { %p13376_p1 = pmov %p13374_p3 }
 0x119   : > { %9692 = dma.done.wait (%p13375_p12), [#allocation9], 2048  }
 0x11a   : > { %9694 = vsyncadd (%p13376_p1), [#allocation9], 4294965248  ;;  %p13377_p13 = pmov %p13376_p1 }
 0x11b   : > { %p13378_p0 = pmov %p13376_p1 }
 0x11c   : > { %9696 = dma.done.wait (%p13377_p13), [#allocation12], 18432  }
 0x11d   : > { %9698 = vsyncadd (%p13378_p0), [#allocation12], 4294948864  ;;  %p13379_p6 = pmov %p13378_p0 }
 0x11e   : > { %p13380_p2 = pmov %p13378_p0 }
 0x11f   : > { %9700 = dma.done.wait (%p13379_p6), [#allocation15], 2048  }
 0x120   : > { %9702 = vsyncadd (%p13380_p2), [#allocation15], 4294965248  ;;  %p682_p4 = scmp.lt.s32.totalorder %s9845_s27, 1  ;;  %v696_v0 = vld [vmem:[#allocation8] sm:$0xff]  ;;  %v697_v1 = vld [vmem:[#allocation8 + $0x8] sm:$0xff]  ;;  %vm918_vm0 = vcmask 523264  }
 0x121   : > { %v698_v2 = vld [vmem:[#allocation8 + $0x10] sm:$0xff]  ;;  %v8344_v3 = vpack.c.bf16 %v697_v1, %v696_v0  ;;  %v699_v4 = vld [vmem:[#allocation8 + $0x18] sm:$0xff]  ;;  %v700_v6 = vld [vmem:[#allocation8 + $0x20] sm:$0xff]  ;;  %s13381_s13 = sld [smem:[#allocation127_spill]]  ;;  %s13382_s0 = sld [smem:[#allocation129_spill]] }
 0x122   : > { %s683_s9 = scalar_select %p682_p4, %s9845_s27, 1  ;;  %v8348_v5 = vpack.c.bf16 %v699_v4, %v698_v2  ;;  %v701_v7 = vld [vmem:[#allocation8 + $0x28] sm:$0xff]  ;;  %v1016_v8 = vld [vmem:[%s10144_s30] sm:$0xff]  ;;  %v689_v11 = vld [vmem:[#allocation7 + $0x10] sm:$0xff] }
 0x123   : > { %8345 = vmatprep.subr.bf16.mxu1 %v8344_v3  ;;  %8148 = vmatprep.mubr.msk.f32.mxu1 %vm918_vm0, %v1016_v8  ;;  %v687_v9 = vld [vmem:[#allocation7] sm:$0xff]  ;;  %v688_v10 = vld [vmem:[#allocation7 + $0x8] sm:$0xff]  ;;  %v8352_v12 = vpack.c.bf16 %v701_v7, %v700_v6  ;;  %v702_v13 = vld [vmem:[#allocation8 + $0x30] sm:$0xff]  ;;  %s13665_s11 = sld [smem:[#allocation132_spill]]  ;;  %s13669_s5 = sld [smem:[#allocation133_spill]] }
 0x124   : > { %s7288_s3 = sshll.u32 %s683_s9, 5  ;;  %8347 = vmatpush3.bf16.msra.mxu1 %v8344_v3  ;;  %v703_v14 = vld [vmem:[#allocation8 + $0x38] sm:$0xff]  ;;  %v8328_v15 = vpack.c.bf16 %v688_v10, %v687_v9  ;;  %v691_v18 = vld [vmem:[#allocation7 + $0x20] sm:$0xff]  ;;  %v692_v19 = vld [vmem:[#allocation7 + $0x28] sm:$0xff]  ;;  %s13666_s9 = sld [smem:[#allocation136_spill]] }
 0x125   : > { %8349 = vmatprep.subr.bf16.mxu1 %v8348_v5  ;;  %v690_v16 = vld [vmem:[#allocation7 + $0x18] sm:$0xff]  ;;  %v8356_v21 = vpack.c.bf16 %v703_v14, %v702_v13  ;;  %v8336_v22 = vpack.c.bf16 %v692_v19, %v691_v18  ;;  %v693_v23 = vld [vmem:[#allocation7 + $0x30] sm:$0xff]  ;;  %v1017_v26 = vld [vmem:[%s10144_s30 + $0x8] sm:$0xff]  ;;  %s13670_s15 = sld [smem:[#allocation134_spill]]  ;;  %s681_s12 = scalar_lea.vmem [#allocation16], %s10140_s7 }
 0x126   : > { %v8332_v17 = vpack.c.bf16 %v690_v16, %v689_v11  ;;  %8329 = vmatprep.subr.bf16.mxu0 %v8328_v15  ;;  %v694_v24 = vld [vmem:[#allocation7 + $0x38] sm:$0xff]  ;;  %v1018_v27 = vld [vmem:[%s10144_s30 + $0x10] sm:$0xff]  ;;  %v6757_v30 = vld [vmem:[%s13214_s6] ss:$0 sm:$0xff]  ;;  %s6560_s14 = sshll.u32 %s681_s12, 4  ;;  %s7289_s17 = sshll.u32 %s9845_s27, 9  ;;  %s13157_s14 = int_to_ptr.vmem [resolvable:$true] %s6560_s14 }
 0x127   : > { %s10181_s26 = scalar_lea.vmem %s13381_s13, %s7288_s3  ;;  %8331 = vmatpush3.bf16.msra.mxu0 %v8328_v15  ;;  %v8340_v25 = vpack.c.bf16 %v694_v24, %v693_v23  ;;  %v1019_v28 = vld [vmem:[%s10144_s30 + $0x18] sm:$0xff]  ;;  %v877_v31 = vld [vmem:[#allocation13 + $0x8] sm:$0xff]  ;;  %v876_v34 = vld [vmem:[#allocation13] sm:$0xff]  ;;  %s13485_s30 = sld [smem:[#allocation137_spill]] }
 0x128   : > { %v908_v20 = vld [vmem:[%s10181_s26] sm:$0xff]  ;;  %8351 = vmatpush3.bf16.msra.mxu1 %v8348_v5  ;;  %8333 = vmatprep.subr.bf16.mxu0 %v8332_v17  ;;  %v909_v29 = vld [vmem:[%s10181_s26 + $0x8] sm:$0xff]  ;;  %v878_v44 = vld [vmem:[#allocation13 + $0x10] sm:$0xff]  ;;  %s13671_s19 = sld [smem:[#allocation140_spill]]  ;;  %s6547_s7 = scalar_lea.sflag [#allocation4], %s10137_s10 }
 0x129   : > { %8126 = vmatprep.mubr.msk.f32.mxu0 %vm918_vm0, %v908_v20  ;;  %8353 = vmatprep.subr.bf16.mxu1 %v8352_v12  ;;  %v881_v32 = vld [vmem:[#allocation13 + $0x28] sm:$0xff]  ;;  %v880_v39 = vld [vmem:[#allocation13 + $0x20] sm:$0xff]  ;;  %v879_v50 = vld [vmem:[#allocation13 + $0x18] sm:$0xff]  ;;  %s9635_s27 = scalar_lea.vmem %s13157_s14, 512  ;;  %p13672_p5 = scmp.ne.s32.totalorder %s13369_s4, 0 }
 0x12a   : > { %v885_v35 = vld [vmem:[#allocation13 + $0x48] sm:$0xff]  ;;  %v884_v40 = vld [vmem:[#allocation13 + $0x40] sm:$0xff]  ;;  %v883_v52 = vld [vmem:[#allocation13 + $0x38] sm:$0xff]  ;;  %p9636_p10 = scmp.ne.s32.totalorder %s13157_s14, %s9635_s27  ;;  %s9736_s28 = smov [#allocation16]  }
 0x12b   : > { %8335 = vmatpush3.bf16.msra.mxu0 %v8332_v17  ;;  %v889_v36 = vld [vmem:[#allocation13 + $0x68] sm:$0xff]  ;;  %v888_v41 = vld [vmem:[#allocation13 + $0x60] sm:$0xff]  ;;  %v887_v54 = vld [vmem:[#allocation13 + $0x58] sm:$0xff] }
 0x12c   : > { %8355 = vmatpush3.bf16.msra.mxu1 %v8352_v12  ;;  %8337 = vmatprep.subr.bf16.mxu0 %v8336_v22  ;;  %v882_v59 = vld [vmem:[#allocation13 + $0x30] sm:$0xff]  ;;  %v891_v3 = vld [vmem:[#allocation13 + $0x78] sm:$0xff]  ;;  %v10199_v4 = vld [vmem:[%s13382_s0] ss:$0 sm:$0xff]  ;;  %p9637_p7 = pnand %p9636_p10, %p13672_p5 }
 0x12d   : > { %8357 = vmatprep.subr.bf16.mxu1 %v8356_v21  ;;  %v886_v60 = vld [vmem:[#allocation13 + $0x50] sm:$0xff] }
 0x12e   : > { %v890_v61 = vld [vmem:[#allocation13 + $0x70] sm:$0xff]  ;;  %p9638_p9 = pneg %p9637_p7 }
 0x12f   : > { %8339 = vmatpush3.bf16.msra.mxu0 %v8336_v22  ;;  %v910_v20 = vld [vmem:[%s10181_s26 + $0x10] sm:$0xff]  ;;  %v1351_v22 = vlaneseq }
 0x130   : > { %8359 = vmatpush3.bf16.msra.mxu1 %v8356_v21  ;;  %8341 = vmatprep.subr.bf16.mxu0 %v8340_v25  ;;  %v911_v21 = vld [vmem:[%s10181_s26 + $0x18] sm:$0xff] }
 0x131   : > { %v10207_v23 = vshrl.u32 %v1351_v22, 7 }
 0x133   : > { %8149 = vmatmul.mubr.msk.f32.vlgmr.msra.gmra.mrb[0].mxu1 %vm918_vm0, %v1017_v26  ;;  %8343 = vmatpush3.bf16.msra.mxu0 %v8340_v25  ;;  %v10210_v24 = vsub.s32 1, %v10207_v23 }
 0x134   : > { %8151 = vmatprep.mubr.msk.f32.mxu1 %vm918_vm0, %v1018_v27 }
 0x136   : > { %8127 = vmatmul.mubr.msk.f32.vlgmr.msra.gmra.mrb[0].mxu0 %vm918_vm0, %v909_v29 }
 0x137   : > { %8152 = vmatmul.mubr.msk.f32.gmra.mrb[2].mxu1 %vm918_vm0, %v1019_v28  ;;  %8129 = vmatprep.mubr.msk.f32.mxu0 %vm918_vm0, %v910_v20  ;;  %v10217_v28 = vsub.s32 0, %v10207_v23 }
 0x13a   : > { %8130 = vmatmul.mubr.msk.f32.gmra.mrb[2].mxu0 %vm918_vm0, %v911_v21 }
 0x206   : > { %v8150_v33 = vpop.f32.mrb[0].mxu1 }
 0x207   : > { %v1110_v37 = vadd.f32 %v8150_v33, %v6757_v30  ;;  %v1104_v38 = vpop.f32.mrb[1].mxu1 }
 0x208   : > { %v1105_v42 = vadd.f32 %v6757_v30, %v1104_v38 }
 0x209   : > { %v1231_v43 = vmul.f32 %v1110_v37, %v877_v31  ;;  %v1235_v45 = vmul.f32 %v1110_v37, %v881_v32  ;;  %v1239_v46 = vmul.f32 %v1110_v37, %v885_v35  ;;  %v1243_v47 = vmul.f32 %v1110_v37, %v889_v36  ;;  %v8128_v56 = vpop.f32.mrb[0].mxu0 }
 0x20a   : > { %v8153_v48 = vpop.f32.mrb[2].mxu1  ;;  %v1230_v49 = vmul.f32 %v1105_v42, %v876_v34  ;;  %v1234_v51 = vmul.f32 %v1105_v42, %v880_v39  ;;  %v1238_v53 = vmul.f32 %v1105_v42, %v884_v40  ;;  %v1242_v55 = vmul.f32 %v1105_v42, %v888_v41  ;;  %v997_v62 = vpop.f32.mrb[1].mxu0 }
 0x20b   : > { %v1120_v57 = vadd.f32 %v8153_v48, %v6757_v30  ;;  %v1114_v58 = vpop.f32.mrb[3].mxu1  ;;  %v998_v14 = vadd.f32 %v10199_v4, %v997_v62  ;;  %v1003_v19 = vadd.f32 %v8128_v56, %v10199_v4  ;;  %v10227_v32 = vsub.s32 2, %v10207_v23 }
 0x20c   : > { %v1115_v63 = vadd.f32 %v6757_v30, %v1114_v58  ;;  %v8376_v0 = vpack.c.bf16 %v1231_v43, %v1230_v49  ;;  %v8384_v1 = vpack.c.bf16 %v1235_v45, %v1234_v51  ;;  %v8392_v2 = vpack.c.bf16 %v1239_v46, %v1238_v53 }
 0x20d   : > { %v1233_v5 = vmul.f32 %v1120_v57, %v879_v50  ;;  %v1237_v6 = vmul.f32 %v1120_v57, %v883_v52  ;;  %v1241_v7 = vmul.f32 %v1120_v57, %v887_v54  ;;  %v8400_v8 = vpack.c.bf16 %v1243_v47, %v1242_v55  ;;  %8208 = vmatprep.mubr.f32.mxu1 %v998_v14 }
 0x20e   : > { %8377 = vmatprep.subr.bf16.mxu1 %v8376_v0  ;;  %v1232_v9 = vmul.f32 %v1115_v63, %v878_v44  ;;  %v1236_v10 = vmul.f32 %v1115_v63, %v882_v59  ;;  %v1240_v11 = vmul.f32 %v1115_v63, %v886_v60  ;;  %v1244_v12 = vmul.f32 %v1115_v63, %v890_v61 }
 0x20f   : > { %8379 = vmatpush3.bf16.xpose.msra.mxu1 %v8376_v0  ;;  %v1245_v13 = vmul.f32 %v1120_v57, %v891_v3  ;;  %v10222_v30 = vsub.s32 3, %v10207_v23  ;;  %13384 = vst [vmem:[#allocation25_spill] sm:$0xff] %v10227_v32  ;;  %v10258_v39 = vsub.s32 5, %v10207_v23  ;;  %v10267_v42 = vsub.s32 4, %v10207_v23  ;;  %v8131_v3 = vpop.f32.mrb[2].mxu0 }
 0x210   : > { %v8380_v15 = vpack.c.bf16 %v1233_v5, %v1232_v9  ;;  %v8388_v16 = vpack.c.bf16 %v1237_v6, %v1236_v10  ;;  %v8396_v17 = vpack.c.bf16 %v1241_v7, %v1240_v11  ;;  %v10280_v46 = vsub.s32 7, %v10207_v23  ;;  %v1007_v7 = vpop.f32.mrb[3].mxu0 }
 0x211   : > { %v8404_v18 = vpack.c.bf16 %v1245_v13, %v1244_v12  ;;  %13385 = vst [vmem:[#allocation26_spill] sm:$0xff] %v10258_v39  ;;  %13386 = vst [vmem:[#allocation27_spill] sm:$0xff] %v10267_v42  ;;  %v10293_v50 = vsub.s32 6, %v10207_v23  ;;  %v1013_v6 = vadd.f32 %v8131_v3, %v10199_v4  ;;  %v1008_v9 = vadd.f32 %v10199_v4, %v1007_v7 }
 0x212   : > { %8381 = vmatprep.subr.bf16.mxu1 %v8380_v15  ;;  %13387 = vst [vmem:[#allocation28_spill] sm:$0xff] %v10280_v46 }
 0x213   : > { %13388 = vst [vmem:[#allocation29_spill] sm:$0xff] %v10293_v50 }
 0x217   : > { %8383 = vmatpush3.bf16.xpose.msra.mxu1 %v8380_v15 }
 0x218   : > { %8385 = vmatprep.subr.bf16.mxu1 %v8384_v1 }
 0x21f   : > { %8387 = vmatpush3.bf16.xpose.msra.mxu1 %v8384_v1 }
 0x220   : > { %8389 = vmatprep.subr.bf16.mxu1 %v8388_v16 }
 0x227   : > { %8391 = vmatpush3.bf16.xpose.msra.mxu1 %v8388_v16 }
 0x228   : > { %8393 = vmatprep.subr.bf16.mxu1 %v8392_v2 }
 0x22f   : > { %8395 = vmatpush3.bf16.xpose.msra.mxu1 %v8392_v2 }
 0x230   : > { %8397 = vmatprep.subr.bf16.mxu1 %v8396_v17 }
 0x237   : > { %8399 = vmatpush3.bf16.xpose.msra.mxu1 %v8396_v17 }
 0x238   : > { %8401 = vmatprep.subr.bf16.mxu1 %v8400_v8 }
 0x23f   : > { %8403 = vmatpush3.bf16.xpose.msra.mxu1 %v8400_v8 }
 0x240   : > { %8405 = vmatprep.subr.bf16.mxu1 %v8404_v18 }
 0x247   : > { %8407 = vmatpush3.bf16.xpose.msra.mxu1 %v8404_v18 }
 0x24e   : > { %8209 = vmatmul.mubr.f32.vlgmr.msra.gmra.mrb[4].mxu1 %v1003_v19 }
 0x24f   : > { %8211 = vmatprep.mubr.f32.mxu1 %v1008_v9 }
 0x252   : > { %8212 = vmatmul.mubr.f32.gmra.mrb[6].mxu1 %v1013_v6 }
 0x321   : > { %v8210_v25 = vpop.f32.mrb[4].mxu1 }
 0x322   : > { %v10212_v26 = vmul.f32 0.17677669, %v8210_v25  ;;  %v10214_v27 = vpop.f32.mrb[5].mxu1 }
 0x324   : > { %13383 = vst [vmem:[#allocation24_spill] sm:$0xff] %v10212_v26  ;;  %v1957_v29 = vrot.slane %v10212_v26, %v10210_v24  ;;  %v1890_v31 = vrot.slane %v10212_v26, %v10217_v28  ;;  %v2091_v33 = vrot.slane %v10212_v26, %v10222_v30  ;;  %v10233_v34 = vrot.slane %v10212_v26, %v10227_v32 }
 0x325   : > { %v10271_v43 = vrot.slane %v10212_v26, %v10258_v39  ;;  %v10284_v47 = vrot.slane %v10212_v26, %v10267_v42  ;;  %v10297_v51 = vrot.slane %v10212_v26, %v10280_v46  ;;  %v10307_v54 = vrot.slane %v10212_v26, %v10293_v50 }
 0x326   : > { %1963 = vbcast.lane.b32.xlu1 %v1957_v29, 264  ;;  %1959 = vbcast.lane.b32.xlu0 %v1957_v29, 256 }
 0x32a   : > { %1896 = vbcast.lane.b32.xlu1 %v1890_v31, 264  ;;  %1892 = vbcast.lane.b32.xlu0 %v1890_v31, 256 }
 0x32e   : > { %2097 = vbcast.lane.b32.xlu1 %v2091_v33, 264  ;;  %2093 = vbcast.lane.b32.xlu0 %v2091_v33, 256 }
 0x332   : > { %2030 = vbcast.lane.b32.xlu1 %v10233_v34, 264  ;;  %2026 = vbcast.lane.b32.xlu0 %v10233_v34, 256 }
 0x336   : > { %1971 = vbcast.lane.b32.xlu1 %v1957_v29, 280  ;;  %1967 = vbcast.lane.b32.xlu0 %v1957_v29, 272 }
 0x33a   : > { %1904 = vbcast.lane.b32.xlu1 %v1890_v31, 280  ;;  %1900 = vbcast.lane.b32.xlu0 %v1890_v31, 272 }
 0x33e   : > { %2105 = vbcast.lane.b32.xlu1 %v2091_v33, 280  ;;  %2101 = vbcast.lane.b32.xlu0 %v2091_v33, 272 }
 0x342   : > { %2038 = vbcast.lane.b32.xlu1 %v10233_v34, 280  ;;  %2034 = vbcast.lane.b32.xlu0 %v10233_v34, 272 }
 0x346   : > { %1979 = vbcast.lane.b32.xlu1 %v1957_v29, 296  ;;  %1975 = vbcast.lane.b32.xlu0 %v1957_v29, 288 }
 0x34a   : > { %1912 = vbcast.lane.b32.xlu1 %v1890_v31, 296  ;;  %1908 = vbcast.lane.b32.xlu0 %v1890_v31, 288 }
 0x34e   : > { %2113 = vbcast.lane.b32.xlu1 %v2091_v33, 296  ;;  %2109 = vbcast.lane.b32.xlu0 %v2091_v33, 288 }
 0x352   : > { %2046 = vbcast.lane.b32.xlu1 %v10233_v34, 296  ;;  %2042 = vbcast.lane.b32.xlu0 %v10233_v34, 288 }
 0x356   : > { %1987 = vbcast.lane.b32.xlu1 %v1957_v29, 312  ;;  %1983 = vbcast.lane.b32.xlu0 %v1957_v29, 304 }
 0x35a   : > { %1920 = vbcast.lane.b32.xlu1 %v1890_v31, 312  ;;  %1916 = vbcast.lane.b32.xlu0 %v1890_v31, 304 }
 0x35e   : > { %2121 = vbcast.lane.b32.xlu1 %v2091_v33, 312  ;;  %2117 = vbcast.lane.b32.xlu0 %v2091_v33, 304 }
 0x362   : > { %2054 = vbcast.lane.b32.xlu1 %v10233_v34, 312  ;;  %2050 = vbcast.lane.b32.xlu0 %v10233_v34, 304 }
 0x366   : > { %1995 = vbcast.lane.b32.xlu1 %v1957_v29, 328  ;;  %1991 = vbcast.lane.b32.xlu0 %v1957_v29, 320 }
 0x36a   : > { %1928 = vbcast.lane.b32.xlu1 %v1890_v31, 328  ;;  %1924 = vbcast.lane.b32.xlu0 %v1890_v31, 320 }
 0x36e   : > { %2129 = vbcast.lane.b32.xlu1 %v2091_v33, 328  ;;  %2125 = vbcast.lane.b32.xlu0 %v2091_v33, 320 }
 0x372   : > { %2062 = vbcast.lane.b32.xlu1 %v10233_v34, 328  ;;  %2058 = vbcast.lane.b32.xlu0 %v10233_v34, 320 }
 0x376   : > { %2003 = vbcast.lane.b32.xlu1 %v1957_v29, 344  ;;  %1999 = vbcast.lane.b32.xlu0 %v1957_v29, 336 }
 0x37a   : > { %1936 = vbcast.lane.b32.xlu1 %v1890_v31, 344  ;;  %1932 = vbcast.lane.b32.xlu0 %v1890_v31, 336 }
 0x37e   : > { %2137 = vbcast.lane.b32.xlu1 %v2091_v33, 344  ;;  %2133 = vbcast.lane.b32.xlu0 %v2091_v33, 336 }
 0x382   : > { %2070 = vbcast.lane.b32.xlu1 %v10233_v34, 344  ;;  %2066 = vbcast.lane.b32.xlu0 %v10233_v34, 336 }
 0x386   : > { %2011 = vbcast.lane.b32.xlu1 %v1957_v29, 360  ;;  %2007 = vbcast.lane.b32.xlu0 %v1957_v29, 352 }
 0x38a   : > { %1944 = vbcast.lane.b32.xlu1 %v1890_v31, 360  ;;  %1940 = vbcast.lane.b32.xlu0 %v1890_v31, 352 }
 0x38e   : > { %2145 = vbcast.lane.b32.xlu1 %v2091_v33, 360  ;;  %2141 = vbcast.lane.b32.xlu0 %v2091_v33, 352 }
 0x392   : > { %2078 = vbcast.lane.b32.xlu1 %v10233_v34, 360  ;;  %2074 = vbcast.lane.b32.xlu0 %v10233_v34, 352 }
 0x396   : > { %2019 = vbcast.lane.b32.xlu1 %v1957_v29, 376  ;;  %2015 = vbcast.lane.b32.xlu0 %v1957_v29, 368 }
 0x398   : > { %v10249_v35 = vpop.permute.xlu1 %1963  ;;  %v10251_v36 = vpop.permute.xlu0 %1959 }
 0x39a   : > { %1952 = vbcast.lane.b32.xlu1 %v1890_v31, 376  ;;  %1948 = vbcast.lane.b32.xlu0 %v1890_v31, 368 }
 0x39c   : > { %v10253_v37 = vpop.permute.xlu1 %1896  ;;  %v10255_v38 = vpop.permute.xlu0 %1892 }
 0x39e   : > { %2153 = vbcast.lane.b32.xlu1 %v2091_v33, 376  ;;  %2149 = vbcast.lane.b32.xlu0 %v2091_v33, 368 }
 0x3a0   : > { %v10260_v40 = vpop.permute.xlu1 %2097  ;;  %v10262_v41 = vpop.permute.xlu0 %2093 }
 0x3a2   : > { %2086 = vbcast.lane.b32.xlu1 %v10233_v34, 376  ;;  %2082 = vbcast.lane.b32.xlu0 %v10233_v34, 368 }
 0x3a4   : > { %v10273_v44 = vpop.permute.xlu1 %2030  ;;  %v10275_v45 = vpop.permute.xlu0 %2026 }
 0x3a6   : > { %2231 = vbcast.lane.b32.xlu1 %v10271_v43, 264  ;;  %2227 = vbcast.lane.b32.xlu0 %v10271_v43, 256 }
 0x3a8   : > { %v10286_v48 = vpop.permute.xlu1 %1971  ;;  %v10288_v49 = vpop.permute.xlu0 %1967 }
 0x3aa   : > { %2164 = vbcast.lane.b32.xlu1 %v10284_v47, 264  ;;  %2160 = vbcast.lane.b32.xlu0 %v10284_v47, 256 }
 0x3ac   : > { %v10299_v52 = vpop.permute.xlu1 %1904  ;;  %v10301_v53 = vpop.permute.xlu0 %1900 }
 0x3ae   : > { %2365 = vbcast.lane.b32.xlu1 %v10297_v51, 264  ;;  %2361 = vbcast.lane.b32.xlu0 %v10297_v51, 256 }
 0x3b0   : > { %v10309_v55 = vpop.permute.xlu1 %2105  ;;  %v10311_v56 = vpop.permute.xlu0 %2101 }
 0x3b2   : > { %2298 = vbcast.lane.b32.xlu1 %v10307_v54, 264  ;;  %2294 = vbcast.lane.b32.xlu0 %v10307_v54, 256 }
 0x3b4   : > { %v10315_v57 = vpop.permute.xlu1 %2038  ;;  %v10317_v58 = vpop.permute.xlu0 %2034 }
 0x3b6   : > { %2239 = vbcast.lane.b32.xlu1 %v10271_v43, 280  ;;  %2235 = vbcast.lane.b32.xlu0 %v10271_v43, 272 }
 0x3b8   : > { %v10321_v59 = vpop.permute.xlu1 %1979  ;;  %v10323_v60 = vpop.permute.xlu0 %1975 }
 0x3ba   : > { %2172 = vbcast.lane.b32.xlu1 %v10284_v47, 280  ;;  %2168 = vbcast.lane.b32.xlu0 %v10284_v47, 272 }
 0x3bc   : > { %v10327_v61 = vpop.permute.xlu1 %1912  ;;  %v10329_v62 = vpop.permute.xlu0 %1908 }
 0x3be   : > { %2373 = vbcast.lane.b32.xlu1 %v10297_v51, 280  ;;  %2369 = vbcast.lane.b32.xlu0 %v10297_v51, 272 }
 0x3c0   : > { %v10333_v63 = vpop.permute.xlu1 %2113  ;;  %v10335_v0 = vpop.permute.xlu0 %2109 }
 0x3c2   : > { %2306 = vbcast.lane.b32.xlu1 %v10307_v54, 280  ;;  %2302 = vbcast.lane.b32.xlu0 %v10307_v54, 272 }
 0x3c4   : > { %v10339_v1 = vpop.permute.xlu1 %2046  ;;  %v10341_v2 = vpop.permute.xlu0 %2042 }
 0x3c6   : > { %2247 = vbcast.lane.b32.xlu1 %v10271_v43, 296  ;;  %2243 = vbcast.lane.b32.xlu0 %v10271_v43, 288 }
 0x3c8   : > { %v10345_v5 = vpop.permute.xlu1 %1987  ;;  %v10348_v8 = vpop.permute.xlu0 %1983 }
 0x3ca   : > { %2180 = vbcast.lane.b32.xlu1 %v10284_v47, 296  ;;  %2176 = vbcast.lane.b32.xlu0 %v10284_v47, 288 }
 0x3cc   : > { %v10353_v10 = vpop.permute.xlu1 %1920  ;;  %v10355_v11 = vpop.permute.xlu0 %1916 }
 0x3ce   : > { %2381 = vbcast.lane.b32.xlu1 %v10297_v51, 296  ;;  %2377 = vbcast.lane.b32.xlu0 %v10297_v51, 288 }
 0x3d0   : > { %v10359_v12 = vpop.permute.xlu1 %2121  ;;  %v10361_v13 = vpop.permute.xlu0 %2117 }
 0x3d2   : > { %2314 = vbcast.lane.b32.xlu1 %v10307_v54, 296  ;;  %2310 = vbcast.lane.b32.xlu0 %v10307_v54, 288 }
 0x3d4   : > { %v10365_v4 = vpop.permute.xlu1 %2054  ;;  %v10367_v14 = vpop.permute.xlu0 %2050 }
 0x3d5   : > { %13389 = vst [vmem:[#allocation30_spill] sm:$0xff] %v10365_v4  ;;  %13390 = vst [vmem:[#allocation31_spill] sm:$0xff] %v10367_v14 }
 0x3d6   : > { %2255 = vbcast.lane.b32.xlu1 %v10271_v43, 312  ;;  %2251 = vbcast.lane.b32.xlu0 %v10271_v43, 304 }
 0x3d8   : > { %v10371_v15 = vpop.permute.xlu1 %1995  ;;  %v10373_v16 = vpop.permute.xlu0 %1991 }
 0x3da   : > { %2188 = vbcast.lane.b32.xlu1 %v10284_v47, 312  ;;  %2184 = vbcast.lane.b32.xlu0 %v10284_v47, 304 }
 0x3dc   : > { %v10377_v17 = vpop.permute.xlu1 %1928  ;;  %v10379_v18 = vpop.permute.xlu0 %1924 }
 0x3dd   : > { %13391 = vst [vmem:[#allocation32_spill] sm:$0xff] %v10379_v18 }
 0x3de   : > { %2389 = vbcast.lane.b32.xlu1 %v10297_v51, 312  ;;  %2385 = vbcast.lane.b32.xlu0 %v10297_v51, 304 }
 0x3e0   : > { %v10383_v19 = vpop.permute.xlu1 %2129  ;;  %v10385_v20 = vpop.permute.xlu0 %2125 }
 0x3e1   : > { %13392 = vst [vmem:[#allocation33_spill] sm:$0xff] %v10383_v19  ;;  %13393 = vst [vmem:[#allocation34_spill] sm:$0xff] %v10385_v20  ;;  %v863_v19 = vld [vmem:[%s13485_s30 + $0x18] sm:$0xff] }
 0x3e2   : > { %2322 = vbcast.lane.b32.xlu1 %v10307_v54, 312  ;;  %2318 = vbcast.lane.b32.xlu0 %v10307_v54, 304 }
 0x3e4   : > { %v10389_v21 = vpop.permute.xlu1 %2062  ;;  %v10391_v22 = vpop.permute.xlu0 %2058 }
 0x3e5   : > { %13394 = vst [vmem:[#allocation35_spill] sm:$0xff] %v10389_v21  ;;  %13395 = vst [vmem:[#allocation36_spill] sm:$0xff] %v10391_v22 }
 0x3e6   : > { %2263 = vbcast.lane.b32.xlu1 %v10271_v43, 328  ;;  %2259 = vbcast.lane.b32.xlu0 %v10271_v43, 320 }
 0x3e8   : > { %v10395_v25 = vpop.permute.xlu1 %2003  ;;  %v10397_v29 = vpop.permute.xlu0 %1999 }
 0x3e9   : > { %13396 = vst [vmem:[#allocation37_spill] sm:$0xff] %v10395_v25  ;;  %13397 = vst [vmem:[#allocation38_spill] sm:$0xff] %v10397_v29 }
 0x3ea   : > { %2196 = vbcast.lane.b32.xlu1 %v10284_v47, 328  ;;  %2192 = vbcast.lane.b32.xlu0 %v10284_v47, 320 }
 0x3ec   : > { %v10401_v31 = vpop.permute.xlu1 %1936  ;;  %v10403_v33 = vpop.permute.xlu0 %1932 }
 0x3ed   : > { %13398 = vst [vmem:[#allocation39_spill] sm:$0xff] %v10401_v31  ;;  %13399 = vst [vmem:[#allocation40_spill] sm:$0xff] %v10403_v33 }
 0x3ee   : > { %2397 = vbcast.lane.b32.xlu1 %v10297_v51, 328  ;;  %2393 = vbcast.lane.b32.xlu0 %v10297_v51, 320 }
 0x3f0   : > { %v10407_v34 = vpop.permute.xlu1 %2137  ;;  %v10409_v3 = vpop.permute.xlu0 %2133 }
 0x3f1   : > { %13400 = vst [vmem:[#allocation41_spill] sm:$0xff] %v10407_v34  ;;  %13401 = vst [vmem:[#allocation42_spill] sm:$0xff] %v10409_v3 }
 0x3f2   : > { %2330 = vbcast.lane.b32.xlu1 %v10307_v54, 328  ;;  %2326 = vbcast.lane.b32.xlu0 %v10307_v54, 320 }
 0x3f4   : > { %v10413_v6 = vpop.permute.xlu1 %2070  ;;  %v10415_v7 = vpop.permute.xlu0 %2066 }
 0x3f5   : > { %13402 = vst [vmem:[#allocation43_spill] sm:$0xff] %v10413_v6  ;;  %13403 = vst [vmem:[#allocation44_spill] sm:$0xff] %v10415_v7 }
 0x3f6   : > { %2271 = vbcast.lane.b32.xlu1 %v10271_v43, 344  ;;  %2267 = vbcast.lane.b32.xlu0 %v10271_v43, 336 }
 0x3f8   : > { %v10419_v9 = vpop.permute.xlu1 %2011  ;;  %v10421_v22 = vpop.permute.xlu0 %2007 }
 0x3f9   : > { %13404 = vst [vmem:[#allocation45_spill] sm:$0xff] %v10419_v9  ;;  %13405 = vst [vmem:[#allocation46_spill] sm:$0xff] %v10421_v22 }
 0x3fa   : > { %2204 = vbcast.lane.b32.xlu1 %v10284_v47, 344  ;;  %2200 = vbcast.lane.b32.xlu0 %v10284_v47, 336 }
 0x3fc   : > { %v10425_v3 = vpop.permute.xlu1 %1944  ;;  %v10427_v34 = vpop.permute.xlu0 %1940 }
 0x3fd   : > { %13406 = vst [vmem:[#allocation47_spill] sm:$0xff] %v10425_v3  ;;  %13407 = vst [vmem:[#allocation48_spill] sm:$0xff] %v10427_v34 }
 0x3fe   : > { %2405 = vbcast.lane.b32.xlu1 %v10297_v51, 344  ;;  %2401 = vbcast.lane.b32.xlu0 %v10297_v51, 336 }
 0x400   : > { %v10431_v7 = vpop.permute.xlu1 %2145  ;;  %v10433_v6 = vpop.permute.xlu0 %2141 }
 0x401   : > { %13408 = vst [vmem:[#allocation49_spill] sm:$0xff] %v10431_v7  ;;  %13409 = vst [vmem:[#allocation50_spill] sm:$0xff] %v10433_v6 }
 0x402   : > { %2338 = vbcast.lane.b32.xlu1 %v10307_v54, 344  ;;  %2334 = vbcast.lane.b32.xlu0 %v10307_v54, 336 }
 0x404   : > { %v10437_v21 = vpop.permute.xlu1 %2078  ;;  %v10439_v22 = vpop.permute.xlu0 %2074 }
 0x405   : > { %13410 = vst [vmem:[#allocation51_spill] sm:$0xff] %v10437_v21  ;;  %13411 = vst [vmem:[#allocation52_spill] sm:$0xff] %v10439_v22  ;;  %v705_v22 = vld [vmem:[#allocation10] sm:$0xff]  ;;  %v706_v21 = vld [vmem:[#allocation10 + $0x8] sm:$0xff] }
 0x406   : > { %2279 = vbcast.lane.b32.xlu1 %v10271_v43, 360  ;;  %2275 = vbcast.lane.b32.xlu0 %v10271_v43, 352  ;;  %v8360_v33 = vpack.c.bf16 %v706_v21, %v705_v22  ;;  %v709_v21 = vld [vmem:[#allocation10 + $0x20] sm:$0xff]  ;;  %v710_v22 = vld [vmem:[#allocation10 + $0x28] sm:$0xff] }
 0x408   : > { %v10443_v34 = vpop.permute.xlu1 %2019  ;;  %v10445_v3 = vpop.permute.xlu0 %2015  ;;  %8361 = vmatprep.subr.bf16.mxu0 %v8360_v33 }
 0x409   : > { %13412 = vst [vmem:[#allocation53_spill] sm:$0xff] %v10443_v34  ;;  %13413 = vst [vmem:[#allocation54_spill] sm:$0xff] %v10445_v3  ;;  %8363 = vmatpush3.bf16.msra.mxu0 %v8360_v33  ;;  %v708_v3 = vld [vmem:[#allocation10 + $0x18] sm:$0xff] }
 0x40a   : > { %2212 = vbcast.lane.b32.xlu1 %v10284_v47, 360  ;;  %2208 = vbcast.lane.b32.xlu0 %v10284_v47, 352 }
 0x40c   : > { %v10449_v6 = vpop.permute.xlu1 %1952  ;;  %v10451_v7 = vpop.permute.xlu0 %1948 }
 0x40d   : > { %13414 = vst [vmem:[#allocation55_spill] sm:$0xff] %v10449_v6  ;;  %13415 = vst [vmem:[#allocation56_spill] sm:$0xff] %v10451_v7  ;;  %v707_v6 = vld [vmem:[#allocation10 + $0x10] sm:$0xff] }
 0x40e   : > { %2413 = vbcast.lane.b32.xlu1 %v10297_v51, 360  ;;  %2409 = vbcast.lane.b32.xlu0 %v10297_v51, 352  ;;  %v8364_v31 = vpack.c.bf16 %v708_v3, %v707_v6  ;;  %v711_v3 = vld [vmem:[#allocation10 + $0x30] sm:$0xff]  ;;  %v712_v6 = vld [vmem:[#allocation10 + $0x38] sm:$0xff] }
 0x410   : > { %v10455_v9 = vpop.permute.xlu1 %2153  ;;  %v10457_v34 = vpop.permute.xlu0 %2149  ;;  %8365 = vmatprep.subr.bf16.mxu0 %v8364_v31 }
 0x411   : > { %13416 = vst [vmem:[#allocation57_spill] sm:$0xff] %v10455_v9  ;;  %13417 = vst [vmem:[#allocation58_spill] sm:$0xff] %v10457_v34  ;;  %8367 = vmatpush3.bf16.msra.mxu0 %v8364_v31  ;;  %v8368_v9 = vpack.c.bf16 %v710_v22, %v709_v21  ;;  %v1123_v21 = vld [vmem:[%s10152_s16] sm:$0xff]  ;;  %v10481_v22 = vmul.f32 0.17677669, %v10214_v27 }
 0x412   : > { %2346 = vbcast.lane.b32.xlu1 %v10307_v54, 360  ;;  %2342 = vbcast.lane.b32.xlu0 %v10307_v54, 352 }
 0x413   : > { %8369 = vmatprep.subr.bf16.mxu0 %v8368_v9  ;;  %13424 = vst [vmem:[#allocation65_spill] sm:$0xff] %v10481_v22  ;;  %8170 = vmatprep.mubr.msk.f32.mxu0 %vm918_vm0, %v1123_v21  ;;  %v1421_v27 = vrot.slane %v10481_v22, %v10210_v24 }
 0x414   : > { %v10461_v7 = vpop.permute.xlu1 %2086  ;;  %v10463_v20 = vpop.permute.xlu0 %2082 }
 0x415   : > { %13418 = vst [vmem:[#allocation59_spill] sm:$0xff] %v10461_v7  ;;  %13419 = vst [vmem:[#allocation60_spill] sm:$0xff] %v10463_v20  ;;  %8371 = vmatpush3.bf16.msra.mxu0 %v8368_v9 }
 0x416   : > { %2287 = vbcast.lane.b32.xlu1 %v10271_v43, 376  ;;  %2283 = vbcast.lane.b32.xlu0 %v10271_v43, 368  ;;  %v8372_v43 = vpack.c.bf16 %v712_v6, %v711_v3 }
 0x418   : > { %v10467_v34 = vpop.permute.xlu1 %2231  ;;  %v10469_v33 = vpop.permute.xlu0 %2227  ;;  %8373 = vmatprep.subr.bf16.mxu0 %v8372_v43 }
 0x419   : > { %13420 = vst [vmem:[#allocation61_spill] sm:$0xff] %v10467_v34  ;;  %13421 = vst [vmem:[#allocation62_spill] sm:$0xff] %v10469_v33  ;;  %8375 = vmatpush3.bf16.msra.mxu0 %v8372_v43  ;;  %v862_v34 = vld [vmem:[%s13485_s30 + $0x10] sm:$0xff] }
 0x41a   : > { %2220 = vbcast.lane.b32.xlu1 %v10284_v47, 376  ;;  %2216 = vbcast.lane.b32.xlu0 %v10284_v47, 368  ;;  %v1124_v47 = vld [vmem:[%s10152_s16 + $0x8] sm:$0xff] }
 0x41c   : > { %v10473_v20 = vpop.permute.xlu1 %2164  ;;  %v10475_v31 = vpop.permute.xlu0 %2160  ;;  %8171 = vmatmul.mubr.msk.f32.vlgmr.msra.gmra.mrb[4].mxu0 %vm918_vm0, %v1124_v47 }
 0x41d   : > { %13422 = vst [vmem:[#allocation63_spill] sm:$0xff] %v10473_v20  ;;  %13423 = vst [vmem:[#allocation64_spill] sm:$0xff] %v10475_v31  ;;  %v860_v31 = vld [vmem:[%s13485_s30] sm:$0xff] }
 0x41e   : > { %2421 = vbcast.lane.b32.xlu1 %v10297_v51, 376  ;;  %2417 = vbcast.lane.b32.xlu0 %v10297_v51, 368  ;;  %v10494_v51 = vrot.slane %v10481_v22, %v10217_v28 }
 0x420   : > { %v10483_v7 = vpop.permute.xlu1 %2365  ;;  %v10487_v9 = vpop.permute.xlu0 %2361 }
 0x421   : > { %13425 = vst [vmem:[#allocation66_spill] sm:$0xff] %v10483_v7  ;;  %13426 = vst [vmem:[#allocation67_spill] sm:$0xff] %v10487_v9 }
 0x422   : > { %2354 = vbcast.lane.b32.xlu1 %v10307_v54, 376  ;;  %2350 = vbcast.lane.b32.xlu0 %v10307_v54, 368 }
 0x424   : > { %v10496_v3 = vpop.permute.xlu1 %2298  ;;  %v10500_v6 = vpop.permute.xlu0 %2294 }
 0x425   : > { %13427 = vst [vmem:[#allocation68_spill] sm:$0xff] %v10496_v3  ;;  %13428 = vst [vmem:[#allocation69_spill] sm:$0xff] %v10500_v6 }
 0x426   : > { %1356 = vbcast.lane.b32.xlu1 %v10494_v51, 256  ;;  %1423 = vbcast.lane.b32.xlu0 %v1421_v27, 256 }
 0x428   : > { %v10503_v43 = vpop.permute.xlu1 %2239  ;;  %v10505_v21 = vpop.permute.xlu0 %2235 }
 0x429   : > { %13429 = vst [vmem:[#allocation70_spill] sm:$0xff] %v10503_v43  ;;  %13430 = vst [vmem:[#allocation71_spill] sm:$0xff] %v10505_v21 }
 0x42a   : > { %1360 = vbcast.lane.b32.xlu1 %v10494_v51, 264  ;;  %1427 = vbcast.lane.b32.xlu0 %v1421_v27, 264 }
 0x42c   : > { %v10508_v54 = vpop.permute.xlu1 %2172  ;;  %v10510_v47 = vpop.permute.xlu0 %2168 }
 0x42d   : > { %13431 = vst [vmem:[#allocation72_spill] sm:$0xff] %v10508_v54  ;;  %13432 = vst [vmem:[#allocation73_spill] sm:$0xff] %v10510_v47 }
 0x42e   : > { %1435 = vbcast.lane.b32.xlu1 %v1421_v27, 280  ;;  %1431 = vbcast.lane.b32.xlu0 %v1421_v27, 272 }
 0x430   : > { %v10512_v3 = vpop.permute.xlu1 %2373  ;;  %v10514_v9 = vpop.permute.xlu0 %2369 }
 0x431   : > { %13433 = vst [vmem:[#allocation74_spill] sm:$0xff] %v10512_v3  ;;  %13434 = vst [vmem:[#allocation75_spill] sm:$0xff] %v10514_v9 }
 0x432   : > { %1368 = vbcast.lane.b32.xlu1 %v10494_v51, 280  ;;  %1364 = vbcast.lane.b32.xlu0 %v10494_v51, 272 }
 0x434   : > { %v10518_v6 = vpop.permute.xlu1 %2306  ;;  %v10520_v7 = vpop.permute.xlu0 %2302 }
 0x435   : > { %13435 = vst [vmem:[#allocation76_spill] sm:$0xff] %v10518_v6  ;;  %13436 = vst [vmem:[#allocation77_spill] sm:$0xff] %v10520_v7 }
 0x436   : > { %1443 = vbcast.lane.b32.xlu1 %v1421_v27, 296  ;;  %1439 = vbcast.lane.b32.xlu0 %v1421_v27, 288 }
 0x438   : > { %v10522_v21 = vpop.permute.xlu1 %2247  ;;  %v10524_v54 = vpop.permute.xlu0 %2243 }
 0x439   : > { %13437 = vst [vmem:[#allocation78_spill] sm:$0xff] %v10522_v21  ;;  %13438 = vst [vmem:[#allocation79_spill] sm:$0xff] %v10524_v54 }
 0x43a   : > { %1376 = vbcast.lane.b32.xlu1 %v10494_v51, 296  ;;  %1372 = vbcast.lane.b32.xlu0 %v10494_v51, 288 }
 0x43c   : > { %v10528_v3 = vpop.permute.xlu1 %2180  ;;  %v10530_v9 = vpop.permute.xlu0 %2176 }
 0x43d   : > { %13439 = vst [vmem:[#allocation80_spill] sm:$0xff] %v10528_v3  ;;  %13440 = vst [vmem:[#allocation81_spill] sm:$0xff] %v10530_v9 }
 0x43e   : > { %1451 = vbcast.lane.b32.xlu1 %v1421_v27, 312  ;;  %1447 = vbcast.lane.b32.xlu0 %v1421_v27, 304 }
 0x440   : > { %v10532_v47 = vpop.permute.xlu1 %2381  ;;  %v10534_v6 = vpop.permute.xlu0 %2377 }
 0x441   : > { %13441 = vst [vmem:[#allocation82_spill] sm:$0xff] %v10532_v47  ;;  %13442 = vst [vmem:[#allocation83_spill] sm:$0xff] %v10534_v6 }
 0x442   : > { %1384 = vbcast.lane.b32.xlu1 %v10494_v51, 312  ;;  %1380 = vbcast.lane.b32.xlu0 %v10494_v51, 304 }
 0x444   : > { %v10538_v7 = vpop.permute.xlu1 %2314  ;;  %v10540_v54 = vpop.permute.xlu0 %2310 }
 0x445   : > { %13443 = vst [vmem:[#allocation84_spill] sm:$0xff] %v10538_v7  ;;  %13444 = vst [vmem:[#allocation85_spill] sm:$0xff] %v10540_v54 }
 0x446   : > { %1459 = vbcast.lane.b32.xlu1 %v1421_v27, 328  ;;  %1455 = vbcast.lane.b32.xlu0 %v1421_v27, 320 }
 0x448   : > { %v10542_v21 = vpop.permute.xlu1 %2255  ;;  %v10544_v3 = vpop.permute.xlu0 %2251 }
 0x449   : > { %13445 = vst [vmem:[#allocation86_spill] sm:$0xff] %v10542_v21  ;;  %13446 = vst [vmem:[#allocation87_spill] sm:$0xff] %v10544_v3 }
 0x44a   : > { %1392 = vbcast.lane.b32.xlu1 %v10494_v51, 328  ;;  %1388 = vbcast.lane.b32.xlu0 %v10494_v51, 320 }
 0x44c   : > { %v10548_v47 = vpop.permute.xlu1 %2188  ;;  %v10550_v6 = vpop.permute.xlu0 %2184 }
 0x44d   : > { %13447 = vst [vmem:[#allocation88_spill] sm:$0xff] %v10548_v47  ;;  %13448 = vst [vmem:[#allocation89_spill] sm:$0xff] %v10550_v6 }
 0x44e   : > { %1467 = vbcast.lane.b32.xlu1 %v1421_v27, 344  ;;  %1463 = vbcast.lane.b32.xlu0 %v1421_v27, 336 }
 0x450   : > { %v10552_v7 = vpop.permute.xlu1 %2389  ;;  %v10554_v54 = vpop.permute.xlu0 %2385 }
 0x451   : > { %13449 = vst [vmem:[#allocation90_spill] sm:$0xff] %v10552_v7  ;;  %13450 = vst [vmem:[#allocation91_spill] sm:$0xff] %v10554_v54  ;;  %v1125_v7 = vld [vmem:[%s10152_s16 + $0x10] sm:$0xff]  ;;  %v1126_v54 = vld [vmem:[%s10152_s16 + $0x18] sm:$0xff]  ;;  %s9639_s16 = sshll.u32 %s9736_s28, 4  ;;  %s9640_s16 = int_to_ptr.vmem [resolvable:$false] %s9639_s16 }
 0x452   : > { %1400 = vbcast.lane.b32.xlu1 %v10494_v51, 344  ;;  %1396 = vbcast.lane.b32.xlu0 %v10494_v51, 336  ;;  %p9642_p8 = scmp.lt.s32.totalorder %s13157_s14, %s9640_s16 }
 0x453   : > { %8173 = vmatprep.mubr.msk.f32.mxu0 %vm918_vm0, %v1125_v7 }
 0x454   : > { %v10558_v3 = vpop.permute.xlu1 %2322  ;;  %v10560_v21 = vpop.permute.xlu0 %2318  ;;  %8174 = vmatmul.mubr.msk.f32.gmra.mrb[6].mxu0 %vm918_vm0, %v1126_v54 }
 0x455   : > { %13451 = vst [vmem:[#allocation92_spill] sm:$0xff] %v10558_v3  ;;  %13452 = vst [vmem:[#allocation93_spill] sm:$0xff] %v10560_v21  ;;  %v732_v21 = vld [vmem:[#allocation11 + $0x8] sm:$0xff] }
 0x456   : > { %1475 = vbcast.lane.b32.xlu1 %v1421_v27, 360  ;;  %1471 = vbcast.lane.b32.xlu0 %v1421_v27, 352 }
 0x457   : > { %4943 = vmatprep.mubr.f32.mxu0 %v732_v21 }
 0x458   : > { %v10562_v47 = vpop.permute.xlu1 %2263  ;;  %v10564_v6 = vpop.permute.xlu0 %2259 }
 0x459   : > { %13453 = vst [vmem:[#allocation94_spill] sm:$0xff] %v10562_v47  ;;  %13454 = vst [vmem:[#allocation95_spill] sm:$0xff] %v10564_v6 }
 0x45a   : > { %1408 = vbcast.lane.b32.xlu1 %v10494_v51, 360  ;;  %1404 = vbcast.lane.b32.xlu0 %v10494_v51, 352 }
 0x45c   : > { %v10570_v9 = vpop.permute.xlu1 %2196  ;;  %v10573_v43 = vpop.permute.xlu0 %2192 }
 0x45d   : > { %13455 = vst [vmem:[#allocation96_spill] sm:$0xff] %v10570_v9  ;;  %13456 = vst [vmem:[#allocation97_spill] sm:$0xff] %v10573_v43  ;;  %v10584_v9 = vrot.slane %v10481_v22, %v10222_v30 }
 0x45e   : > { %1483 = vbcast.lane.b32.xlu1 %v1421_v27, 376  ;;  %1479 = vbcast.lane.b32.xlu0 %v1421_v27, 368  ;;  %v10594_v27 = vrot.slane %v10481_v22, %v10227_v32 }
 0x460   : > { %v10576_v3 = vpop.permute.xlu1 %2397  ;;  %v10578_v6 = vpop.permute.xlu0 %2393 }
 0x461   : > { %13457 = vst [vmem:[#allocation98_spill] sm:$0xff] %v10576_v3  ;;  %13458 = vst [vmem:[#allocation99_spill] sm:$0xff] %v10578_v6 }
 0x462   : > { %1416 = vbcast.lane.b32.xlu1 %v10494_v51, 376  ;;  %1412 = vbcast.lane.b32.xlu0 %v10494_v51, 368 }
 0x464   : > { %v10586_v7 = vpop.permute.xlu1 %2330  ;;  %v10588_v43 = vpop.permute.xlu0 %2326 }
 0x465   : > { %13459 = vst [vmem:[#allocation100_spill] sm:$0xff] %v10586_v7  ;;  %13460 = vst [vmem:[#allocation101_spill] sm:$0xff] %v10588_v43 }
 0x466   : > { %1561 = vbcast.lane.b32.xlu1 %v10584_v9, 264  ;;  %1557 = vbcast.lane.b32.xlu0 %v10584_v9, 256 }
 0x468   : > { %v10596_v21 = vpop.permute.xlu1 %2271  ;;  %v10598_v54 = vpop.permute.xlu0 %2267 }
 0x469   : > { %13461 = vst [vmem:[#allocation102_spill] sm:$0xff] %v10596_v21  ;;  %13462 = vst [vmem:[#allocation103_spill] sm:$0xff] %v10598_v54 }
 0x46a   : > { %1494 = vbcast.lane.b32.xlu1 %v10594_v27, 264  ;;  %1490 = vbcast.lane.b32.xlu0 %v10594_v27, 256 }
 0x46c   : > { %v10602_v51 = vpop.permute.xlu1 %2204  ;;  %v10604_v7 = vpop.permute.xlu0 %2200 }
 0x46d   : > { %13463 = vst [vmem:[#allocation104_spill] sm:$0xff] %v10602_v51  ;;  %13464 = vst [vmem:[#allocation105_spill] sm:$0xff] %v10604_v7 }
 0x46e   : > { %1569 = vbcast.lane.b32.xlu1 %v10584_v9, 280  ;;  %1565 = vbcast.lane.b32.xlu0 %v10584_v9, 272 }
 0x470   : > { %v10608_v43 = vpop.permute.xlu1 %2405  ;;  %v10610_v6 = vpop.permute.xlu0 %2401 }
 0x471   : > { %13465 = vst [vmem:[#allocation106_spill] sm:$0xff] %v10608_v43  ;;  %13466 = vst [vmem:[#allocation107_spill] sm:$0xff] %v10610_v6 }
 0x472   : > { %1502 = vbcast.lane.b32.xlu1 %v10594_v27, 280  ;;  %1498 = vbcast.lane.b32.xlu0 %v10594_v27, 272 }
 0x474   : > { %v10614_v3 = vpop.permute.xlu1 %2338  ;;  %v10616_v54 = vpop.permute.xlu0 %2334 }
 0x475   : > { %13467 = vst [vmem:[#allocation108_spill] sm:$0xff] %v10614_v3  ;;  %13468 = vst [vmem:[#allocation109_spill] sm:$0xff] %v10616_v54 }
 0x476   : > { %1577 = vbcast.lane.b32.xlu1 %v10584_v9, 296  ;;  %1573 = vbcast.lane.b32.xlu0 %v10584_v9, 288 }
 0x478   : > { %v10620_v7 = vpop.permute.xlu1 %2279  ;;  %v10622_v51 = vpop.permute.xlu0 %2275 }
 0x479   : > { %13469 = vst [vmem:[#allocation110_spill] sm:$0xff] %v10620_v7  ;;  %13470 = vst [vmem:[#allocation111_spill] sm:$0xff] %v10622_v51  ;;  %v9735_v51 = vmov 1966171168  }
 0x47a   : > { %1510 = vbcast.lane.b32.xlu1 %v10594_v27, 296  ;;  %1506 = vbcast.lane.b32.xlu0 %v10594_v27, 288  ;;  %v3501_v7 = vunpack.c.l.s4 %v9735_v51 }
 0x47c   : > { %v10626_v6 = vpop.permute.xlu1 %2212  ;;  %v10628_v43 = vpop.permute.xlu0 %2208 }
 0x47d   : > { %13471 = vst [vmem:[#allocation112_spill] sm:$0xff] %v10626_v6  ;;  %13472 = vst [vmem:[#allocation113_spill] sm:$0xff] %v10628_v43  ;;  %v3502_v43 = vunpack.c.0.s8 %v3501_v7 }
 0x47e   : > { %1585 = vbcast.lane.b32.xlu1 %v10584_v9, 312  ;;  %1581 = vbcast.lane.b32.xlu0 %v10584_v9, 304 }
 0x480   : > { %v10632_v54 = vpop.permute.xlu1 %2413  ;;  %v10634_v3 = vpop.permute.xlu0 %2409 }
 0x481   : > { %13473 = vst [vmem:[#allocation114_spill] sm:$0xff] %v10632_v54  ;;  %13474 = vst [vmem:[#allocation115_spill] sm:$0xff] %v10634_v3  ;;  %v10651_v3 = vsub.s32 %v3502_v43, %v10207_v23 }
 0x482   : > { %1518 = vbcast.lane.b32.xlu1 %v10594_v27, 312  ;;  %1514 = vbcast.lane.b32.xlu0 %v10594_v27, 304 }
 0x483   : > { %v3506_v7 = vrot.slane %v10481_v22, %v10651_v3 }
 0x484   : > { %v10638_v21 = vpop.permute.xlu1 %2346  ;;  %v10640_v47 = vpop.permute.xlu0 %2342 }
 0x485   : > { %13475 = vst [vmem:[#allocation116_spill] sm:$0xff] %v10638_v21  ;;  %13476 = vst [vmem:[#allocation117_spill] sm:$0xff] %v10640_v47  ;;  %v3514_v23 = vcombine.high %v3506_v7, %v3506_v7 }
 0x486   : > { %1593 = vbcast.lane.b32.xlu1 %v10584_v9, 328  ;;  %1589 = vbcast.lane.b32.xlu0 %v10584_v9, 320 }
 0x488   : > { %v10644_v6 = vpop.permute.xlu1 %2287  ;;  %v10646_v54 = vpop.permute.xlu0 %2283 }
 0x489   : > { %13477 = vst [vmem:[#allocation118_spill] sm:$0xff] %v10644_v6  ;;  %13478 = vst [vmem:[#allocation119_spill] sm:$0xff] %v10646_v54 }
 0x48a   : > { %1526 = vbcast.lane.b32.xlu1 %v10594_v27, 328  ;;  %1522 = vbcast.lane.b32.xlu0 %v10594_v27, 320 }
 0x48c   : > { %v10653_v51 = vpop.permute.xlu1 %2220  ;;  %v10655_v21 = vpop.permute.xlu0 %2216 }
 0x48d   : > { %13479 = vst [vmem:[#allocation120_spill] sm:$0xff] %v10653_v51  ;;  %13480 = vst [vmem:[#allocation121_spill] sm:$0xff] %v10655_v21  ;;  %v10673_v21 = vrot.slane %v3506_v7, %v10651_v3 }
 0x48e   : > { %1601 = vbcast.lane.b32.xlu1 %v10584_v9, 344  ;;  %1597 = vbcast.lane.b32.xlu0 %v10584_v9, 336 }
 0x48f   : > { %v10688_v7 = vrot.slane %v10673_v21, %v10217_v28 }
 0x490   : > { %v10661_v47 = vpop.permute.xlu1 %2421  ;;  %v10663_v54 = vpop.permute.xlu0 %2417 }
 0x491   : > { %13481 = vst [vmem:[#allocation122_spill] sm:$0xff] %v10661_v47  ;;  %13482 = vst [vmem:[#allocation123_spill] sm:$0xff] %v10663_v54  ;;  %v10677_v47 = vrot.slane %v3514_v23, %v10651_v3 }
 0x492   : > { %1534 = vbcast.lane.b32.xlu1 %v10594_v27, 344  ;;  %1530 = vbcast.lane.b32.xlu0 %v10594_v27, 336 }
 0x493   : > { %v10693_v23 = vrot.slane %v10677_v47, %v10217_v28 }
 0x494   : > { %v10667_v43 = vpop.permute.xlu1 %2354  ;;  %v10669_v51 = vpop.permute.xlu0 %2350 }
 0x495   : > { %13483 = vst [vmem:[#allocation124_spill] sm:$0xff] %v10667_v43  ;;  %13484 = vst [vmem:[#allocation125_spill] sm:$0xff] %v10669_v51  ;;  %v861_v51 = vld [vmem:[%s13485_s30 + $0x8] sm:$0xff] }
 0x496   : > { %1609 = vbcast.lane.b32.xlu1 %v10584_v9, 360  ;;  %1605 = vbcast.lane.b32.xlu0 %v10584_v9, 352  ;;  %v10695_v20 = vpack.c.bf16 %v861_v51, %v860_v31  ;;  %v10709_v31 = vpop.f32.mrb[6].mxu1  ;;  %v10712_v51 = vpack.c.bf16 %v863_v19, %v862_v34 }
 0x497   : > { %13486 = vst [vmem:[#allocation126_spill] sm:$0xff] %v10709_v31 }
 0x498   : > { %v1357_v54 = vpop.permute.xlu1 %1356  ;;  %v1424_v6 = vpop.permute.xlu0 %1423 }
 0x499   : > { %vm3855_vm1 = vcmp.gt.f32.partialorder %v1357_v54, %v10688_v7  ;;  %vm3871_vm3 = vcmp.gt.f32.partialorder %v1424_v6, %v10693_v23  ;;  %v10738_v6 = vrot.slane %v10481_v22, %v10267_v42 }
 0x49a   : > { %1542 = vbcast.lane.b32.xlu1 %v10594_v27, 360  ;;  %1538 = vbcast.lane.b32.xlu0 %v10594_v27, 352 }
 0x49c   : > { %v1361_v43 = vpop.permute.xlu1 %1360  ;;  %v1428_v33 = vpop.permute.xlu0 %1427 }
 0x49d   : > { %vm3856_vm2 = vcmp.gt.f32.partialorder %v1361_v43, %v10688_v7  ;;  %vm3872_vm4 = vcmp.gt.f32.partialorder %v1428_v33, %v10693_v23  ;;  %v10714_v43 = vpop.f32.mrb[7].mxu1  ;;  %v10723_v33 = vrot.slane %v10481_v22, %v10258_v39 }
 0x49e   : > { %vm8412_vm5 = vmpackc.low %vm3856_vm2, %vm3855_vm1  ;;  %1617 = vbcast.lane.b32.xlu1 %v10584_v9, 376  ;;  %1613 = vbcast.lane.b32.xlu0 %v10584_v9, 368  ;;  %v864_v9 = vld [vmem:[%s13485_s30 + $0x20] sm:$0xff] }
 0x49f   : > { %vm8409_vm6 = vmpackc.low %vm3872_vm4, %vm3871_vm3 }
 0x4a0   : > { %8410 = vmatprep.subr.msk.bf16.mxu0 %vm8409_vm6, %v10695_v20  ;;  %v1436_v54 = vpop.permute.xlu1 %1435  ;;  %v1432_v14 = vpop.permute.xlu0 %1431 }
 0x4a1   : > { %8413 = vmatpush3.bf16.msk.msra.mxu0 %vm8412_vm5, %v10695_v20  ;;  %vm3874_vm7 = vcmp.gt.f32.partialorder %v1436_v54, %v10693_v23  ;;  %vm3873_vm8 = vcmp.gt.f32.partialorder %v1432_v14, %v10693_v23  ;;  %v865_v14 = vld [vmem:[%s13485_s30 + $0x28] sm:$0xff] }
 0x4a2   : > { %1550 = vbcast.lane.b32.xlu1 %v10594_v27, 376  ;;  %vm8415_vm9 = vmpackc.low %vm3874_vm7, %vm3873_vm8  ;;  %1546 = vbcast.lane.b32.xlu0 %v10594_v27, 368  ;;  %v10741_v54 = vpack.c.bf16 %v865_v14, %v864_v9  ;;  %v866_v9 = vld [vmem:[%s13485_s30 + $0x30] sm:$0xff]  ;;  %v867_v14 = vld [vmem:[%s13485_s30 + $0x38] sm:$0xff] }
 0x4a3   : > { %8416 = vmatprep.subr.msk.bf16.mxu0 %vm8415_vm9, %v10712_v51 }
 0x4a4   : > { %v1369_v19 = vpop.permute.xlu1 %1368  ;;  %v1365_v34 = vpop.permute.xlu0 %1364 }
 0x4a5   : > { %vm3858_vm10 = vcmp.gt.f32.partialorder %v1369_v19, %v10688_v7  ;;  %vm3857_vm11 = vcmp.gt.f32.partialorder %v1365_v34, %v10688_v7  ;;  %v10749_v34 = vrot.slane %v10481_v22, %v10280_v46 }
 0x4a6   : > { %1695 = vbcast.lane.b32.xlu1 %v10723_v33, 264  ;;  %vm8418_vm12 = vmpackc.low %vm3858_vm10, %vm3857_vm11  ;;  %1691 = vbcast.lane.b32.xlu0 %v10723_v33, 256 }
 0x4a7   : > { %8419 = vmatpush3.bf16.msk.msra.mxu0 %vm8418_vm12, %v10712_v51 }
 0x4a8   : > { %v1444_v27 = vpop.permute.xlu1 %1443  ;;  %v1440_v19 = vpop.permute.xlu0 %1439 }
 0x4a9   : > { %vm3876_vm13 = vcmp.gt.f32.partialorder %v1444_v27, %v10693_v23  ;;  %vm3875_vm14 = vcmp.gt.f32.partialorder %v1440_v19, %v10693_v23  ;;  %v10764_v27 = vrot.slane %v10481_v22, %v10293_v50  ;;  %v10767_v19 = vpack.c.bf16 %v867_v14, %v866_v9  ;;  %v868_v9 = vld [vmem:[%s13485_s30 + $0x40] sm:$0xff]  ;;  %v869_v14 = vld [vmem:[%s13485_s30 + $0x48] sm:$0xff] }
 0x4aa   : > { %1628 = vbcast.lane.b32.xlu1 %v10738_v6, 264  ;;  %vm8421_vm15 = vmpackc.low %vm3876_vm13, %vm3875_vm14  ;;  %1624 = vbcast.lane.b32.xlu0 %v10738_v6, 256 }
 0x4ab   : > { %8422 = vmatprep.subr.msk.bf16.mxu0 %vm8421_vm15, %v10741_v54 }
 0x4ac   : > { %v1377_v31 = vpop.permute.xlu1 %1376  ;;  %v1373_v42 = vpop.permute.xlu0 %1372 }
 0x4ad   : > { %vm3860_vm1 = vcmp.gt.f32.partialorder %v1377_v31, %v10688_v7  ;;  %vm3859_vm2 = vcmp.gt.f32.partialorder %v1373_v42, %v10688_v7 }
 0x4ae   : > { %1829 = vbcast.lane.b32.xlu1 %v10749_v34, 264  ;;  %vm8424_vm3 = vmpackc.low %vm3860_vm1, %vm3859_vm2  ;;  %1825 = vbcast.lane.b32.xlu0 %v10749_v34, 256 }
 0x4af   : > { %8425 = vmatpush3.bf16.msk.msra.mxu0 %vm8424_vm3, %v10741_v54 }
 0x4b0   : > { %v1452_v31 = vpop.permute.xlu1 %1451  ;;  %v1448_v46 = vpop.permute.xlu0 %1447 }
 0x4b1   : > { %vm3878_vm4 = vcmp.gt.f32.partialorder %v1452_v31, %v10693_v23  ;;  %vm3877_vm5 = vcmp.gt.f32.partialorder %v1448_v46, %v10693_v23  ;;  %v10785_v31 = vpack.c.bf16 %v869_v14, %v868_v9  ;;  %v870_v9 = vld [vmem:[%s13485_s30 + $0x50] sm:$0xff]  ;;  %v871_v14 = vld [vmem:[%s13485_s30 + $0x58] sm:$0xff] }
 0x4b2   : > { %1762 = vbcast.lane.b32.xlu1 %v10764_v27, 264  ;;  %vm8427_vm6 = vmpackc.low %vm3878_vm4, %vm3877_vm5  ;;  %1758 = vbcast.lane.b32.xlu0 %v10764_v27, 256 }
 0x4b3   : > { %8428 = vmatprep.subr.msk.bf16.mxu0 %vm8427_vm6, %v10767_v19 }
 0x4b4   : > { %v1385_v42 = vpop.permute.xlu1 %1384  ;;  %v1381_v50 = vpop.permute.xlu0 %1380 }
 0x4b5   : > { %vm3862_vm7 = vcmp.gt.f32.partialorder %v1385_v42, %v10688_v7  ;;  %vm3861_vm8 = vcmp.gt.f32.partialorder %v1381_v50, %v10688_v7 }
 0x4b6   : > { %1703 = vbcast.lane.b32.xlu1 %v10723_v33, 280  ;;  %vm8430_vm9 = vmpackc.low %vm3862_vm7, %vm3861_vm8  ;;  %1699 = vbcast.lane.b32.xlu0 %v10723_v33, 272 }
 0x4b7   : > { %8431 = vmatpush3.bf16.msk.msra.mxu0 %vm8430_vm9, %v10767_v19 }
 0x4b8   : > { %v1460_v46 = vpop.permute.xlu1 %1459  ;;  %v1456_v42 = vpop.permute.xlu0 %1455 }
 0x4b9   : > { %vm3880_vm10 = vcmp.gt.f32.partialorder %v1460_v46, %v10693_v23  ;;  %vm3879_vm11 = vcmp.gt.f32.partialorder %v1456_v42, %v10693_v23  ;;  %v10803_v42 = vpack.c.bf16 %v871_v14, %v870_v9  ;;  %v872_v9 = vld [vmem:[%s13485_s30 + $0x60] sm:$0xff]  ;;  %v873_v14 = vld [vmem:[%s13485_s30 + $0x68] sm:$0xff] }
 0x4ba   : > { %1636 = vbcast.lane.b32.xlu1 %v10738_v6, 280  ;;  %vm8433_vm12 = vmpackc.low %vm3880_vm10, %vm3879_vm11  ;;  %1632 = vbcast.lane.b32.xlu0 %v10738_v6, 272 }
 0x4bb   : > { %8434 = vmatprep.subr.msk.bf16.mxu0 %vm8433_vm12, %v10785_v31 }
 0x4bc   : > { %v1393_v50 = vpop.permute.xlu1 %1392  ;;  %v1389_v39 = vpop.permute.xlu0 %1388 }
 0x4bd   : > { %vm3864_vm13 = vcmp.gt.f32.partialorder %v1393_v50, %v10688_v7  ;;  %vm3863_vm14 = vcmp.gt.f32.partialorder %v1389_v39, %v10688_v7 }
 0x4be   : > { %1837 = vbcast.lane.b32.xlu1 %v10749_v34, 280  ;;  %vm8436_vm15 = vmpackc.low %vm3864_vm13, %vm3863_vm14  ;;  %1833 = vbcast.lane.b32.xlu0 %v10749_v34, 272 }
 0x4bf   : > { %8437 = vmatpush3.bf16.msk.msra.mxu0 %vm8436_vm15, %v10785_v31 }
 0x4c0   : > { %v1468_v46 = vpop.permute.xlu1 %1467  ;;  %v1464_v50 = vpop.permute.xlu0 %1463 }
 0x4c1   : > { %vm3882_vm1 = vcmp.gt.f32.partialorder %v1468_v46, %v10693_v23  ;;  %vm3881_vm2 = vcmp.gt.f32.partialorder %v1464_v50, %v10693_v23  ;;  %v10821_v50 = vpack.c.bf16 %v873_v14, %v872_v9  ;;  %v874_v9 = vld [vmem:[%s13485_s30 + $0x70] sm:$0xff]  ;;  %v875_v14 = vld [vmem:[%s13485_s30 + $0x78] sm:$0xff] }
 0x4c2   : > { %1770 = vbcast.lane.b32.xlu1 %v10764_v27, 280  ;;  %vm8439_vm3 = vmpackc.low %vm3882_vm1, %vm3881_vm2  ;;  %1766 = vbcast.lane.b32.xlu0 %v10764_v27, 272 }
 0x4c3   : > { %8440 = vmatprep.subr.msk.bf16.mxu0 %vm8439_vm3, %v10803_v42 }
 0x4c4   : > { %v1401_v39 = vpop.permute.xlu1 %1400  ;;  %v1397_v4 = vpop.permute.xlu0 %1396 }
 0x4c5   : > { %vm3866_vm4 = vcmp.gt.f32.partialorder %v1401_v39, %v10688_v7  ;;  %vm3865_vm5 = vcmp.gt.f32.partialorder %v1397_v4, %v10688_v7 }
 0x4c6   : > { %1711 = vbcast.lane.b32.xlu1 %v10723_v33, 296  ;;  %vm8442_vm6 = vmpackc.low %vm3866_vm4, %vm3865_vm5  ;;  %1707 = vbcast.lane.b32.xlu0 %v10723_v33, 288 }
 0x4c7   : > { %8443 = vmatpush3.bf16.msk.msra.mxu0 %vm8442_vm6, %v10803_v42 }
 0x4c8   : > { %v1476_v46 = vpop.permute.xlu1 %1475  ;;  %v1472_v39 = vpop.permute.xlu0 %1471 }
 0x4c9   : > { %vm3884_vm7 = vcmp.gt.f32.partialorder %v1476_v46, %v10693_v23  ;;  %vm3883_vm8 = vcmp.gt.f32.partialorder %v1472_v39, %v10693_v23  ;;  %v10839_v39 = vpack.c.bf16 %v875_v14, %v874_v9  ;;  %v731_v14 = vld [vmem:[#allocation11] sm:$0xff] }
 0x4ca   : > { %1644 = vbcast.lane.b32.xlu1 %v10738_v6, 296  ;;  %vm8445_vm9 = vmpackc.low %vm3884_vm7, %vm3883_vm8  ;;  %1640 = vbcast.lane.b32.xlu0 %v10738_v6, 288 }
 0x4cb   : > { %8446 = vmatprep.subr.msk.bf16.mxu0 %vm8445_vm9, %v10821_v50 }
 0x4cc   : > { %v1409_v4 = vpop.permute.xlu1 %1408  ;;  %v1405_v29 = vpop.permute.xlu0 %1404 }
 0x4cd   : > { %vm3868_vm10 = vcmp.gt.f32.partialorder %v1409_v4, %v10688_v7  ;;  %vm3867_vm11 = vcmp.gt.f32.partialorder %v1405_v29, %v10688_v7  ;;  %v3546_v29 = vcombine.high %v10677_v47, %v10677_v47 }
 0x4ce   : > { %1845 = vbcast.lane.b32.xlu1 %v10749_v34, 296  ;;  %vm8448_vm12 = vmpackc.low %vm3868_vm10, %vm3867_vm11  ;;  %1841 = vbcast.lane.b32.xlu0 %v10749_v34, 288 }
 0x4cf   : > { %8449 = vmatpush3.bf16.msk.msra.mxu0 %vm8448_vm12, %v10821_v50  ;;  %v10854_v9 = vrot.slane %v3546_v29, %v10217_v28  ;;  %v796_v29 = vld [vmem:[#allocation11 + $0x208] sm:$0xff] }
 0x4d0   : > { %v1484_v46 = vpop.permute.xlu1 %1483  ;;  %v1480_v4 = vpop.permute.xlu0 %1479 }
 0x4d1   : > { %vm3886_vm13 = vcmp.gt.f32.partialorder %v1484_v46, %v10693_v23  ;;  %vm3885_vm14 = vcmp.gt.f32.partialorder %v1480_v4, %v10693_v23  ;;  %v3544_v23 = vcombine.high %v10673_v21, %v10673_v21 }
 0x4d2   : > { %1778 = vbcast.lane.b32.xlu1 %v10764_v27, 296  ;;  %vm8451_vm15 = vmpackc.low %vm3886_vm13, %vm3885_vm14  ;;  %1774 = vbcast.lane.b32.xlu0 %v10764_v27, 288 }
 0x4d3   : > { %8452 = vmatprep.subr.msk.bf16.mxu0 %vm8451_vm15, %v10839_v39 }
 0x4d4   : > { %v1417_v25 = vpop.permute.xlu1 %1416  ;;  %v1413_v18 = vpop.permute.xlu0 %1412 }
 0x4d5   : > { %vm3870_vm1 = vcmp.gt.f32.partialorder %v1417_v25, %v10688_v7  ;;  %vm3869_vm2 = vcmp.gt.f32.partialorder %v1413_v18, %v10688_v7  ;;  %v764_v25 = vld [vmem:[#allocation11 + $0x108] sm:$0xff]  ;;  %v10862_v18 = vrot.slane %v3544_v23, %v10217_v28  ;;  %v763_v7 = vld [vmem:[#allocation11 + $0x100] sm:$0xff] }
 0x4d6   : > { %1719 = vbcast.lane.b32.xlu1 %v10723_v33, 312  ;;  %vm8454_vm3 = vmpackc.low %vm3870_vm1, %vm3869_vm2  ;;  %1715 = vbcast.lane.b32.xlu0 %v10723_v33, 304 }
 0x4d7   : > { %8455 = vmatpush3.bf16.msk.msra.mxu0 %vm8454_vm3, %v10839_v39 }
 0x4d8   : > { %v1562_v47 = vpop.permute.xlu1 %1561  ;;  %v1558_v46 = vpop.permute.xlu0 %1557 }
 0x4d9   : > { %vm3904_vm4 = vcmp.gt.f32.partialorder %v1562_v47, %v10854_v9  ;;  %vm3903_vm5 = vcmp.gt.f32.partialorder %v1558_v46, %v10854_v9  ;;  %v795_v47 = vld [vmem:[#allocation11 + $0x200] sm:$0xff]  ;;  %v828_v46 = vld [vmem:[#allocation11 + $0x308] sm:$0xff] }
 0x4da   : > { %1652 = vbcast.lane.b32.xlu1 %v10738_v6, 312  ;;  %vm8457_vm6 = vmpackc.low %vm3904_vm4, %vm3903_vm5  ;;  %1648 = vbcast.lane.b32.xlu0 %v10738_v6, 304 }
 0x4db   : > { %4944 = vmatmul.mubr.f32.vlgmr.msra.gmra.mrb[8].mxu0 %v731_v14  ;;  %8458 = vmatprep.subr.msk.bf16.mxu0 %vm8457_vm6, %v10695_v20 }
 0x4dc   : > { %v1495_v21 = vpop.permute.xlu1 %1494  ;;  %4948 = vmatprep.mubr.f32.mxu0 %v764_v25  ;;  %v1491_v4 = vpop.permute.xlu0 %1490 }
 0x4dd   : > { %vm3888_vm7 = vcmp.gt.f32.partialorder %v1495_v21, %v10862_v18  ;;  %vm3887_vm8 = vcmp.gt.f32.partialorder %v1491_v4, %v10862_v18  ;;  %v827_v21 = vld [vmem:[#allocation11 + $0x300] sm:$0xff]  ;;  %v734_v4 = vld [vmem:[#allocation11 + $0x18] sm:$0xff] }
 0x4de   : > { %1853 = vbcast.lane.b32.xlu1 %v10749_v34, 312  ;;  %vm8460_vm9 = vmpackc.low %vm3888_vm7, %vm3887_vm8  ;;  %1849 = vbcast.lane.b32.xlu0 %v10749_v34, 304 }
 0x4df   : > { %4949 = vmatmul.mubr.f32.gmra.mrb[10].mxu0 %v763_v7 }
 0x4e0   : > { %8461 = vmatpush3.bf16.msk.msra.mxu0 %vm8460_vm9, %v10695_v20  ;;  %v1570_v23 = vpop.permute.xlu1 %1569  ;;  %4953 = vmatprep.mubr.f32.mxu0 %v796_v29  ;;  %v1566_v14 = vpop.permute.xlu0 %1565 }
 0x4e1   : > { %vm3906_vm10 = vcmp.gt.f32.partialorder %v1570_v23, %v10854_v9  ;;  %vm3905_vm11 = vcmp.gt.f32.partialorder %v1566_v14, %v10854_v9 }
 0x4e2   : > { %1786 = vbcast.lane.b32.xlu1 %v10764_v27, 312  ;;  %vm8463_vm12 = vmpackc.low %vm3906_vm10, %vm3905_vm11  ;;  %1782 = vbcast.lane.b32.xlu0 %v10764_v27, 304 }
 0x4e3   : > { %4954 = vmatmul.mubr.f32.gmra.mrb[12].mxu0 %v795_v47  ;;  %8464 = vmatprep.subr.msk.bf16.mxu0 %vm8463_vm12, %v10712_v51 }
 0x4e4   : > { %v1503_v25 = vpop.permute.xlu1 %1502  ;;  %4958 = vmatprep.mubr.f32.mxu0 %v828_v46  ;;  %v1499_v7 = vpop.permute.xlu0 %1498 }
 0x4e5   : > { %vm3890_vm13 = vcmp.gt.f32.partialorder %v1503_v25, %v10862_v18  ;;  %vm3889_vm14 = vcmp.gt.f32.partialorder %v1499_v7, %v10862_v18 }
 0x4e6   : > { %1727 = vbcast.lane.b32.xlu1 %v10723_v33, 328  ;;  %vm8466_vm15 = vmpackc.low %vm3890_vm13, %vm3889_vm14  ;;  %1723 = vbcast.lane.b32.xlu0 %v10723_v33, 320 }
 0x4e7   : > { %4959 = vmatmul.mubr.f32.gmra.mrb[14].mxu0 %v827_v21 }
 0x4e8   : > { %8467 = vmatpush3.bf16.msk.msra.mxu0 %vm8466_vm15, %v10712_v51  ;;  %v1578_v29 = vpop.permute.xlu1 %1577  ;;  %5028 = vmatprep.mubr.f32.mxu0 %v734_v4  ;;  %v1574_v23 = vpop.permute.xlu0 %1573 }
 0x4e9   : > { %vm3908_vm1 = vcmp.gt.f32.partialorder %v1578_v29, %v10854_v9  ;;  %vm3907_vm2 = vcmp.gt.f32.partialorder %v1574_v23, %v10854_v9 }
 0x4ea   : > { %1660 = vbcast.lane.b32.xlu1 %v10738_v6, 328  ;;  %vm8469_vm3 = vmpackc.low %vm3908_vm1, %vm3907_vm2  ;;  %1656 = vbcast.lane.b32.xlu0 %v10738_v6, 320 }
 0x4eb   : > { %8470 = vmatprep.subr.msk.bf16.mxu0 %vm8469_vm3, %v10741_v54 }
 0x4ec   : > { %v1511_v47 = vpop.permute.xlu1 %1510  ;;  %v1507_v14 = vpop.permute.xlu0 %1506 }
 0x4ed   : > { %vm3892_vm4 = vcmp.gt.f32.partialorder %v1511_v47, %v10862_v18  ;;  %vm3891_vm5 = vcmp.gt.f32.partialorder %v1507_v14, %v10862_v18 }
 0x4ee   : > { %1861 = vbcast.lane.b32.xlu1 %v10749_v34, 328  ;;  %vm8472_vm6 = vmpackc.low %vm3892_vm4, %vm3891_vm5  ;;  %1857 = vbcast.lane.b32.xlu0 %v10749_v34, 320 }
 0x4ef   : > { %8473 = vmatpush3.bf16.msk.msra.mxu0 %vm8472_vm6, %v10741_v54 }
 0x4f0   : > { %v1586_v46 = vpop.permute.xlu1 %1585  ;;  %v1582_v25 = vpop.permute.xlu0 %1581 }
 0x4f1   : > { %vm3910_vm7 = vcmp.gt.f32.partialorder %v1586_v46, %v10854_v9  ;;  %vm3909_vm8 = vcmp.gt.f32.partialorder %v1582_v25, %v10854_v9 }
 0x4f2   : > { %1794 = vbcast.lane.b32.xlu1 %v10764_v27, 328  ;;  %vm8475_vm9 = vmpackc.low %vm3910_vm7, %vm3909_vm8  ;;  %1790 = vbcast.lane.b32.xlu0 %v10764_v27, 320 }
 0x4f3   : > { %8476 = vmatprep.subr.msk.bf16.mxu0 %vm8475_vm9, %v10767_v19 }
 0x4f4   : > { %v1519_v21 = vpop.permute.xlu1 %1518  ;;  %v1515_v7 = vpop.permute.xlu0 %1514 }
 0x4f5   : > { %vm3894_vm10 = vcmp.gt.f32.partialorder %v1519_v21, %v10862_v18  ;;  %vm3893_vm11 = vcmp.gt.f32.partialorder %v1515_v7, %v10862_v18  ;;  %v3499_v7 = vcombine.high %v10481_v22, %v10481_v22 }
 0x4f6   : > { %1735 = vbcast.lane.b32.xlu1 %v10723_v33, 344  ;;  %vm8478_vm12 = vmpackc.low %vm3894_vm10, %vm3893_vm11  ;;  %1731 = vbcast.lane.b32.xlu0 %v10723_v33, 336 }
 0x4f7   : > { %8479 = vmatpush3.bf16.msk.msra.mxu0 %vm8478_vm12, %v10767_v19 }
 0x4f8   : > { %v1594_v4 = vpop.permute.xlu1 %1593  ;;  %v1590_v29 = vpop.permute.xlu0 %1589 }
 0x4f9   : > { %vm3912_vm13 = vcmp.gt.f32.partialorder %v1594_v4, %v10854_v9  ;;  %vm3911_vm14 = vcmp.gt.f32.partialorder %v1590_v29, %v10854_v9 }
 0x4fa   : > { %1668 = vbcast.lane.b32.xlu1 %v10738_v6, 344  ;;  %vm8481_vm15 = vmpackc.low %vm3912_vm13, %vm3911_vm14  ;;  %1664 = vbcast.lane.b32.xlu0 %v10738_v6, 336 }
 0x4fb   : > { %8482 = vmatprep.subr.msk.bf16.mxu0 %vm8481_vm15, %v10785_v31 }
 0x4fc   : > { %v1527_v23 = vpop.permute.xlu1 %1526  ;;  %v1523_v47 = vpop.permute.xlu0 %1522 }
 0x4fd   : > { %vm3896_vm1 = vcmp.gt.f32.partialorder %v1527_v23, %v10862_v18  ;;  %vm3895_vm2 = vcmp.gt.f32.partialorder %v1523_v47, %v10862_v18  ;;  %v3513_v23 = vrot.slane %v3499_v7, %v10651_v3 }
 0x4fe   : > { %1869 = vbcast.lane.b32.xlu1 %v10749_v34, 344  ;;  %vm8484_vm3 = vmpackc.low %vm3896_vm1, %vm3895_vm2  ;;  %1865 = vbcast.lane.b32.xlu0 %v10749_v34, 336 }
 0x4ff   : > { %8485 = vmatpush3.bf16.msk.msra.mxu0 %vm8484_vm3, %v10785_v31 }
 0x500   : > { %v1602_v14 = vpop.permute.xlu1 %1601  ;;  %v1598_v46 = vpop.permute.xlu0 %1597 }
 0x501   : > { %vm3914_vm4 = vcmp.gt.f32.partialorder %v1602_v14, %v10854_v9  ;;  %vm3913_vm5 = vcmp.gt.f32.partialorder %v1598_v46, %v10854_v9  ;;  %v3515_v46 = vcombine.high %v3513_v23, %v3513_v23 }
 0x502   : > { %1802 = vbcast.lane.b32.xlu1 %v10764_v27, 344  ;;  %vm8487_vm6 = vmpackc.low %vm3914_vm4, %vm3913_vm5  ;;  %1798 = vbcast.lane.b32.xlu0 %v10764_v27, 336 }
 0x503   : > { %8488 = vmatprep.subr.msk.bf16.mxu0 %vm8487_vm6, %v10803_v42  ;;  %v3543_v7 = vrot.slane %v3515_v46, %v10651_v3 }
 0x504   : > { %v1535_v25 = vpop.permute.xlu1 %1534  ;;  %v1531_v21 = vpop.permute.xlu0 %1530 }
 0x505   : > { %vm3898_vm7 = vcmp.gt.f32.partialorder %v1535_v25, %v10862_v18  ;;  %vm3897_vm8 = vcmp.gt.f32.partialorder %v1531_v21, %v10862_v18 }
 0x506   : > { %1743 = vbcast.lane.b32.xlu1 %v10723_v33, 360  ;;  %vm8490_vm9 = vmpackc.low %vm3898_vm7, %vm3897_vm8  ;;  %1739 = vbcast.lane.b32.xlu0 %v10723_v33, 352 }
 0x507   : > { %8491 = vmatpush3.bf16.msk.msra.mxu0 %vm8490_vm9, %v10803_v42 }
 0x508   : > { %v1610_v4 = vpop.permute.xlu1 %1609  ;;  %v1606_v29 = vpop.permute.xlu0 %1605 }
 0x509   : > { %vm3916_vm10 = vcmp.gt.f32.partialorder %v1610_v4, %v10854_v9  ;;  %vm3915_vm11 = vcmp.gt.f32.partialorder %v1606_v29, %v10854_v9  ;;  %v736_v4 = vld [vmem:[#allocation11 + $0x28] sm:$0xff] }
 0x50a   : > { %1676 = vbcast.lane.b32.xlu1 %v10738_v6, 360  ;;  %vm8493_vm12 = vmpackc.low %vm3916_vm10, %vm3915_vm11  ;;  %1672 = vbcast.lane.b32.xlu0 %v10738_v6, 352 }
 0x50b   : > { %8494 = vmatprep.subr.msk.bf16.mxu0 %vm8493_vm12, %v10821_v50  ;;  %5113 = vmatprep.mubr.f32.mxu1 %v736_v4  ;;  %v766_v4 = vld [vmem:[#allocation11 + $0x118] sm:$0xff] }
 0x50c   : > { %v1543_v47 = vpop.permute.xlu1 %1542  ;;  %v1539_v14 = vpop.permute.xlu0 %1538 }
 0x50d   : > { %vm3900_vm13 = vcmp.gt.f32.partialorder %v1543_v47, %v10862_v18  ;;  %vm3899_vm14 = vcmp.gt.f32.partialorder %v1539_v14, %v10862_v18  ;;  %v10945_v14 = vrot.slane %v3543_v7, %v10217_v28 }
 0x50e   : > { %1877 = vbcast.lane.b32.xlu1 %v10749_v34, 360  ;;  %vm8496_vm15 = vmpackc.low %vm3900_vm13, %vm3899_vm14  ;;  %1873 = vbcast.lane.b32.xlu0 %v10749_v34, 352 }
 0x50f   : > { %8497 = vmatpush3.bf16.msk.msra.mxu0 %vm8496_vm15, %v10821_v50 }
 0x510   : > { %v1618_v25 = vpop.permute.xlu1 %1617  ;;  %v1614_v21 = vpop.permute.xlu0 %1613 }
 0x511   : > { %vm3918_vm1 = vcmp.gt.f32.partialorder %v1618_v25, %v10854_v9  ;;  %vm3917_vm2 = vcmp.gt.f32.partialorder %v1614_v21, %v10854_v9  ;;  %v3529_v9 = vrot.slane %v3513_v23, %v10651_v3  ;;  %v733_v25 = vld [vmem:[#allocation11 + $0x10] sm:$0xff] }
 0x512   : > { %1810 = vbcast.lane.b32.xlu1 %v10764_v27, 360  ;;  %vm8499_vm3 = vmpackc.low %vm3918_vm1, %vm3917_vm2  ;;  %1806 = vbcast.lane.b32.xlu0 %v10764_v27, 352 }
 0x513   : > { %8500 = vmatprep.subr.msk.bf16.mxu0 %vm8499_vm3, %v10839_v39  ;;  %v10953_v23 = vrot.slane %v3529_v9, %v10217_v28 }
 0x514   : > { %v1551_v29 = vpop.permute.xlu1 %1550  ;;  %v1547_v47 = vpop.permute.xlu0 %1546 }
 0x515   : > { %vm3902_vm4 = vcmp.gt.f32.partialorder %v1551_v29, %v10862_v18  ;;  %vm3901_vm5 = vcmp.gt.f32.partialorder %v1547_v47, %v10862_v18  ;;  %v3547_v18 = vcombine.high %v3543_v7, %v3543_v7  ;;  %v765_v29 = vld [vmem:[#allocation11 + $0x110] sm:$0xff]  ;;  %v3545_v7 = vcombine.high %v3529_v9, %v3529_v9 }
 0x516   : > { %1751 = vbcast.lane.b32.xlu1 %v10723_v33, 376  ;;  %vm8502_vm6 = vmpackc.low %vm3902_vm4, %vm3901_vm5  ;;  %1747 = vbcast.lane.b32.xlu0 %v10723_v33, 368 }
 0x517   : > { %8503 = vmatpush3.bf16.msk.msra.mxu0 %vm8502_vm6, %v10839_v39  ;;  %v10972_v9 = vrot.slane %v3545_v7, %v10217_v28 }
 0x518   : > { %v1696_v46 = vpop.permute.xlu1 %1695  ;;  %v1692_v21 = vpop.permute.xlu0 %1691 }
 0x519   : > { %vm3936_vm7 = vcmp.gt.f32.partialorder %v1696_v46, %v10945_v14  ;;  %vm3935_vm8 = vcmp.gt.f32.partialorder %v1692_v21, %v10945_v14  ;;  %v798_v46 = vld [vmem:[#allocation11 + $0x218] sm:$0xff]  ;;  %v10961_v21 = vrot.slane %v3547_v18, %v10217_v28  ;;  %v829_v18 = vld [vmem:[#allocation11 + $0x310] sm:$0xff] }
 0x51a   : > { %1684 = vbcast.lane.b32.xlu1 %v10738_v6, 376  ;;  %vm8505_vm9 = vmpackc.low %vm3936_vm7, %vm3935_vm8  ;;  %1680 = vbcast.lane.b32.xlu0 %v10738_v6, 368  ;;  %v10965_v6 = vmul.f32 0.17677669, %v10714_v43 }
 0x51b   : > { %5029 = vmatmul.mubr.f32.vlgmr.msra.gmra.mrb[16].mxu0 %v733_v25  ;;  %8506 = vmatprep.subr.msk.bf16.mxu1 %vm8505_vm9, %v10695_v20 }
 0x51c   : > { %v1629_v33 = vpop.permute.xlu1 %1628  ;;  %5033 = vmatprep.mubr.f32.mxu0 %v766_v4  ;;  %v1625_v47 = vpop.permute.xlu0 %1624  ;;  %v797_v4 = vld [vmem:[#allocation11 + $0x210] sm:$0xff]  ;;  %v10977_v43 = vrot.slane %v10965_v6, %v10210_v24 }
 0x51d   : > { %vm3920_vm10 = vcmp.gt.f32.partialorder %v1629_v33, %v10953_v23  ;;  %vm3919_vm11 = vcmp.gt.f32.partialorder %v1625_v47, %v10953_v23  ;;  %v830_v47 = vld [vmem:[#allocation11 + $0x318] sm:$0xff] }
 0x51e   : > { %1885 = vbcast.lane.b32.xlu1 %v10749_v34, 376  ;;  %vm8508_vm12 = vmpackc.low %vm3920_vm10, %vm3919_vm11  ;;  %1881 = vbcast.lane.b32.xlu0 %v10749_v34, 368 }
 0x51f   : > { %5034 = vmatmul.mubr.f32.gmra.mrb[18].mxu0 %v765_v29  ;;  %8509 = vmatpush3.bf16.msk.msra.mxu1 %vm8508_vm12, %v10695_v20 }
 0x520   : > { %v1830_v25 = vpop.permute.xlu1 %1829  ;;  %5038 = vmatprep.mubr.f32.mxu0 %v798_v46  ;;  %v1826_v33 = vpop.permute.xlu0 %1825  ;;  %v738_v46 = vld [vmem:[#allocation11 + $0x38] sm:$0xff] }
 0x521   : > { %vm3968_vm13 = vcmp.gt.f32.partialorder %v1830_v25, %v10961_v21  ;;  %vm3967_vm14 = vcmp.gt.f32.partialorder %v1826_v33, %v10961_v21 }
 0x522   : > { %1818 = vbcast.lane.b32.xlu1 %v10764_v27, 376  ;;  %vm8553_vm15 = vmpackc.low %vm3968_vm13, %vm3967_vm14  ;;  %1814 = vbcast.lane.b32.xlu0 %v10764_v27, 368  ;;  %v10986_v27 = vrot.slane %v10965_v6, %v10217_v28 }
 0x523   : > { %5039 = vmatmul.mubr.f32.gmra.mrb[20].mxu0 %v797_v4  ;;  %8554 = vmatprep.subr.msk.bf16.mxu0 %vm8553_vm15, %v10695_v20  ;;  %v10995_v4 = vrot.slane %v10965_v6, %v10222_v30 }
 0x524   : > { %v1763_v34 = vpop.permute.xlu1 %1762  ;;  %5043 = vmatprep.mubr.f32.mxu0 %v830_v47  ;;  %v1759_v29 = vpop.permute.xlu0 %1758 }
 0x525   : > { %vm3952_vm1 = vcmp.gt.f32.partialorder %v1763_v34, %v10972_v9  ;;  %vm3951_vm2 = vcmp.gt.f32.partialorder %v1759_v29, %v10972_v9  ;;  %v11004_v34 = vrot.slane %v10965_v6, %v10227_v32 }
 0x526   : > { %2499 = vbcast.lane.b32.xlu1 %v10977_v43, 264  ;;  %vm8556_vm3 = vmpackc.low %vm3952_vm1, %vm3951_vm2  ;;  %2495 = vbcast.lane.b32.xlu0 %v10977_v43, 256 }
 0x527   : > { %5044 = vmatmul.mubr.f32.gmra.mrb[22].mxu0 %v829_v18 }
 0x528   : > { %8557 = vmatpush3.bf16.msk.msra.mxu0 %vm8556_vm3, %v10695_v20  ;;  %v1704_v7 = vpop.permute.xlu1 %1703  ;;  %5198 = vmatprep.mubr.f32.mxu0 %v738_v46  ;;  %v1700_v25 = vpop.permute.xlu0 %1699 }
 0x529   : > { %vm3938_vm4 = vcmp.gt.f32.partialorder %v1704_v7, %v10945_v14  ;;  %vm3937_vm5 = vcmp.gt.f32.partialorder %v1700_v25, %v10945_v14 }
 0x52a   : > { %2432 = vbcast.lane.b32.xlu1 %v10986_v27, 264  ;;  %vm8511_vm6 = vmpackc.low %vm3938_vm4, %vm3937_vm5  ;;  %2428 = vbcast.lane.b32.xlu0 %v10986_v27, 256 }
 0x52b   : > { %8512 = vmatprep.subr.msk.bf16.mxu1 %vm8511_vm6, %v10712_v51 }
 0x52c   : > { %v1637_v33 = vpop.permute.xlu1 %1636  ;;  %v1633_v47 = vpop.permute.xlu0 %1632 }
 0x52d   : > { %vm3922_vm7 = vcmp.gt.f32.partialorder %v1637_v33, %v10953_v23  ;;  %vm3921_vm8 = vcmp.gt.f32.partialorder %v1633_v47, %v10953_v23 }
 0x52e   : > { %2633 = vbcast.lane.b32.xlu1 %v10995_v4, 264  ;;  %vm8514_vm9 = vmpackc.low %vm3922_vm7, %vm3921_vm8  ;;  %2629 = vbcast.lane.b32.xlu0 %v10995_v4, 256 }
 0x52f   : > { %8515 = vmatpush3.bf16.msk.msra.mxu1 %vm8514_vm9, %v10712_v51 }
 0x530   : > { %v1838_v18 = vpop.permute.xlu1 %1837  ;;  %v1834_v29 = vpop.permute.xlu0 %1833 }
 0x531   : > { %vm3970_vm10 = vcmp.gt.f32.partialorder %v1838_v18, %v10961_v21  ;;  %vm3969_vm11 = vcmp.gt.f32.partialorder %v1834_v29, %v10961_v21 }
 0x532   : > { %2566 = vbcast.lane.b32.xlu1 %v11004_v34, 264  ;;  %vm8559_vm12 = vmpackc.low %vm3970_vm10, %vm3969_vm11  ;;  %2562 = vbcast.lane.b32.xlu0 %v11004_v34, 256 }
 0x533   : > { %8560 = vmatprep.subr.msk.bf16.mxu0 %vm8559_vm12, %v10712_v51 }
 0x534   : > { %v1771_v46 = vpop.permute.xlu1 %1770  ;;  %v1767_v7 = vpop.permute.xlu0 %1766 }
 0x535   : > { %vm3954_vm13 = vcmp.gt.f32.partialorder %v1771_v46, %v10972_v9  ;;  %vm3953_vm14 = vcmp.gt.f32.partialorder %v1767_v7, %v10972_v9 }
 0x536   : > { %2507 = vbcast.lane.b32.xlu1 %v10977_v43, 280  ;;  %vm8562_vm15 = vmpackc.low %vm3954_vm13, %vm3953_vm14  ;;  %2503 = vbcast.lane.b32.xlu0 %v10977_v43, 272 }
 0x537   : > { %8563 = vmatpush3.bf16.msk.msra.mxu0 %vm8562_vm15, %v10712_v51 }
 0x538   : > { %v1712_v25 = vpop.permute.xlu1 %1711  ;;  %v1708_v33 = vpop.permute.xlu0 %1707 }
 0x539   : > { %vm3940_vm1 = vcmp.gt.f32.partialorder %v1712_v25, %v10945_v14  ;;  %vm3939_vm2 = vcmp.gt.f32.partialorder %v1708_v33, %v10945_v14 }
 0x53a   : > { %2440 = vbcast.lane.b32.xlu1 %v10986_v27, 280  ;;  %vm8517_vm3 = vmpackc.low %vm3940_vm1, %vm3939_vm2  ;;  %2436 = vbcast.lane.b32.xlu0 %v10986_v27, 272 }
 0x53b   : > { %8518 = vmatprep.subr.msk.bf16.mxu1 %vm8517_vm3, %v10741_v54 }
 0x53c   : > { %v1645_v47 = vpop.permute.xlu1 %1644  ;;  %v1641_v18 = vpop.permute.xlu0 %1640 }
 0x53d   : > { %vm3924_vm4 = vcmp.gt.f32.partialorder %v1645_v47, %v10953_v23  ;;  %vm3923_vm5 = vcmp.gt.f32.partialorder %v1641_v18, %v10953_v23 }
 0x53e   : > { %2641 = vbcast.lane.b32.xlu1 %v10995_v4, 280  ;;  %vm8520_vm6 = vmpackc.low %vm3924_vm4, %vm3923_vm5  ;;  %2637 = vbcast.lane.b32.xlu0 %v10995_v4, 272 }
 0x53f   : > { %8521 = vmatpush3.bf16.msk.msra.mxu1 %vm8520_vm6, %v10741_v54 }
 0x540   : > { %v1846_v29 = vpop.permute.xlu1 %1845  ;;  %v1842_v46 = vpop.permute.xlu0 %1841 }
 0x541   : > { %vm3972_vm7 = vcmp.gt.f32.partialorder %v1846_v29, %v10961_v21  ;;  %vm3971_vm8 = vcmp.gt.f32.partialorder %v1842_v46, %v10961_v21 }
 0x542   : > { %2574 = vbcast.lane.b32.xlu1 %v11004_v34, 280  ;;  %vm8565_vm9 = vmpackc.low %vm3972_vm7, %vm3971_vm8  ;;  %2570 = vbcast.lane.b32.xlu0 %v11004_v34, 272 }
 0x543   : > { %8566 = vmatprep.subr.msk.bf16.mxu0 %vm8565_vm9, %v10741_v54 }
 0x544   : > { %v1779_v7 = vpop.permute.xlu1 %1778  ;;  %v1775_v25 = vpop.permute.xlu0 %1774 }
 0x545   : > { %vm3956_vm10 = vcmp.gt.f32.partialorder %v1779_v7, %v10972_v9  ;;  %vm3955_vm11 = vcmp.gt.f32.partialorder %v1775_v25, %v10972_v9 }
 0x546   : > { %2515 = vbcast.lane.b32.xlu1 %v10977_v43, 296  ;;  %vm8568_vm12 = vmpackc.low %vm3956_vm10, %vm3955_vm11  ;;  %2511 = vbcast.lane.b32.xlu0 %v10977_v43, 288 }
 0x547   : > { %8569 = vmatpush3.bf16.msk.msra.mxu0 %vm8568_vm12, %v10741_v54 }
 0x548   : > { %v1720_v33 = vpop.permute.xlu1 %1719  ;;  %v1716_v47 = vpop.permute.xlu0 %1715 }
 0x549   : > { %vm3942_vm13 = vcmp.gt.f32.partialorder %v1720_v33, %v10945_v14  ;;  %vm3941_vm14 = vcmp.gt.f32.partialorder %v1716_v47, %v10945_v14 }
 0x54a   : > { %2448 = vbcast.lane.b32.xlu1 %v10986_v27, 296  ;;  %vm8523_vm15 = vmpackc.low %vm3942_vm13, %vm3941_vm14  ;;  %2444 = vbcast.lane.b32.xlu0 %v10986_v27, 288 }
 0x54b   : > { %8524 = vmatprep.subr.msk.bf16.mxu1 %vm8523_vm15, %v10767_v19 }
 0x54c   : > { %v1653_v18 = vpop.permute.xlu1 %1652  ;;  %v1649_v29 = vpop.permute.xlu0 %1648 }
 0x54d   : > { %vm3926_vm1 = vcmp.gt.f32.partialorder %v1653_v18, %v10953_v23  ;;  %vm3925_vm2 = vcmp.gt.f32.partialorder %v1649_v29, %v10953_v23 }
 0x54e   : > { %2649 = vbcast.lane.b32.xlu1 %v10995_v4, 296  ;;  %vm8526_vm3 = vmpackc.low %vm3926_vm1, %vm3925_vm2  ;;  %2645 = vbcast.lane.b32.xlu0 %v10995_v4, 288 }
 0x54f   : > { %8527 = vmatpush3.bf16.msk.msra.mxu1 %vm8526_vm3, %v10767_v19 }
 0x550   : > { %v1854_v46 = vpop.permute.xlu1 %1853  ;;  %v1850_v7 = vpop.permute.xlu0 %1849 }
 0x551   : > { %vm3974_vm4 = vcmp.gt.f32.partialorder %v1854_v46, %v10961_v21  ;;  %vm3973_vm5 = vcmp.gt.f32.partialorder %v1850_v7, %v10961_v21 }
 0x552   : > { %2582 = vbcast.lane.b32.xlu1 %v11004_v34, 296  ;;  %vm8571_vm6 = vmpackc.low %vm3974_vm4, %vm3973_vm5  ;;  %2578 = vbcast.lane.b32.xlu0 %v11004_v34, 288 }
 0x553   : > { %8572 = vmatprep.subr.msk.bf16.mxu0 %vm8571_vm6, %v10767_v19 }
 0x554   : > { %v1787_v25 = vpop.permute.xlu1 %1786  ;;  %v1783_v33 = vpop.permute.xlu0 %1782 }
 0x555   : > { %vm3958_vm7 = vcmp.gt.f32.partialorder %v1787_v25, %v10972_v9  ;;  %vm3957_vm8 = vcmp.gt.f32.partialorder %v1783_v33, %v10972_v9 }
 0x556   : > { %2523 = vbcast.lane.b32.xlu1 %v10977_v43, 312  ;;  %vm8574_vm9 = vmpackc.low %vm3958_vm7, %vm3957_vm8  ;;  %2519 = vbcast.lane.b32.xlu0 %v10977_v43, 304 }
 0x557   : > { %8575 = vmatpush3.bf16.msk.msra.mxu0 %vm8574_vm9, %v10767_v19 }
 0x558   : > { %v1728_v47 = vpop.permute.xlu1 %1727  ;;  %v1724_v18 = vpop.permute.xlu0 %1723 }
 0x559   : > { %vm3944_vm10 = vcmp.gt.f32.partialorder %v1728_v47, %v10945_v14  ;;  %vm3943_vm11 = vcmp.gt.f32.partialorder %v1724_v18, %v10945_v14 }
 0x55a   : > { %2456 = vbcast.lane.b32.xlu1 %v10986_v27, 312  ;;  %vm8529_vm12 = vmpackc.low %vm3944_vm10, %vm3943_vm11  ;;  %2452 = vbcast.lane.b32.xlu0 %v10986_v27, 304 }
 0x55b   : > { %8530 = vmatprep.subr.msk.bf16.mxu1 %vm8529_vm12, %v10785_v31 }
 0x55c   : > { %v1661_v29 = vpop.permute.xlu1 %1660  ;;  %v1657_v46 = vpop.permute.xlu0 %1656 }
 0x55d   : > { %vm3928_vm13 = vcmp.gt.f32.partialorder %v1661_v29, %v10953_v23  ;;  %vm3927_vm14 = vcmp.gt.f32.partialorder %v1657_v46, %v10953_v23 }
 0x55e   : > { %2657 = vbcast.lane.b32.xlu1 %v10995_v4, 312  ;;  %vm8532_vm15 = vmpackc.low %vm3928_vm13, %vm3927_vm14  ;;  %2653 = vbcast.lane.b32.xlu0 %v10995_v4, 304 }
 0x55f   : > { %8533 = vmatpush3.bf16.msk.msra.mxu1 %vm8532_vm15, %v10785_v31 }
 0x560   : > { %v1862_v7 = vpop.permute.xlu1 %1861  ;;  %v1858_v25 = vpop.permute.xlu0 %1857 }
 0x561   : > { %vm3976_vm1 = vcmp.gt.f32.partialorder %v1862_v7, %v10961_v21  ;;  %vm3975_vm2 = vcmp.gt.f32.partialorder %v1858_v25, %v10961_v21 }
 0x562   : > { %2590 = vbcast.lane.b32.xlu1 %v11004_v34, 312  ;;  %vm8577_vm3 = vmpackc.low %vm3976_vm1, %vm3975_vm2  ;;  %2586 = vbcast.lane.b32.xlu0 %v11004_v34, 304 }
 0x563   : > { %8578 = vmatprep.subr.msk.bf16.mxu0 %vm8577_vm3, %v10785_v31 }
 0x564   : > { %v1795_v33 = vpop.permute.xlu1 %1794  ;;  %v1791_v47 = vpop.permute.xlu0 %1790 }
 0x565   : > { %vm3960_vm4 = vcmp.gt.f32.partialorder %v1795_v33, %v10972_v9  ;;  %vm3959_vm5 = vcmp.gt.f32.partialorder %v1791_v47, %v10972_v9 }
 0x566   : > { %2531 = vbcast.lane.b32.xlu1 %v10977_v43, 328  ;;  %vm8580_vm6 = vmpackc.low %vm3960_vm4, %vm3959_vm5  ;;  %2527 = vbcast.lane.b32.xlu0 %v10977_v43, 320 }
 0x567   : > { %8581 = vmatpush3.bf16.msk.msra.mxu0 %vm8580_vm6, %v10785_v31 }
 0x568   : > { %v1736_v18 = vpop.permute.xlu1 %1735  ;;  %v1732_v29 = vpop.permute.xlu0 %1731 }
 0x569   : > { %vm3946_vm7 = vcmp.gt.f32.partialorder %v1736_v18, %v10945_v14  ;;  %vm3945_vm8 = vcmp.gt.f32.partialorder %v1732_v29, %v10945_v14 }
 0x56a   : > { %2464 = vbcast.lane.b32.xlu1 %v10986_v27, 328  ;;  %vm8535_vm9 = vmpackc.low %vm3946_vm7, %vm3945_vm8  ;;  %2460 = vbcast.lane.b32.xlu0 %v10986_v27, 320 }
 0x56b   : > { %8536 = vmatprep.subr.msk.bf16.mxu1 %vm8535_vm9, %v10803_v42 }
 0x56c   : > { %v1669_v46 = vpop.permute.xlu1 %1668  ;;  %v1665_v7 = vpop.permute.xlu0 %1664 }
 0x56d   : > { %vm3930_vm10 = vcmp.gt.f32.partialorder %v1669_v46, %v10953_v23  ;;  %vm3929_vm11 = vcmp.gt.f32.partialorder %v1665_v7, %v10953_v23 }
 0x56e   : > { %2665 = vbcast.lane.b32.xlu1 %v10995_v4, 328  ;;  %vm8538_vm12 = vmpackc.low %vm3930_vm10, %vm3929_vm11  ;;  %2661 = vbcast.lane.b32.xlu0 %v10995_v4, 320 }
 0x56f   : > { %8539 = vmatpush3.bf16.msk.msra.mxu1 %vm8538_vm12, %v10803_v42 }
 0x570   : > { %v1870_v25 = vpop.permute.xlu1 %1869  ;;  %v1866_v33 = vpop.permute.xlu0 %1865 }
 0x571   : > { %vm3978_vm13 = vcmp.gt.f32.partialorder %v1870_v25, %v10961_v21  ;;  %vm3977_vm14 = vcmp.gt.f32.partialorder %v1866_v33, %v10961_v21  ;;  %v3555_v33 = vrot.slane %v10212_v26, %v10651_v3 }
 0x572   : > { %2598 = vbcast.lane.b32.xlu1 %v11004_v34, 328  ;;  %vm8583_vm15 = vmpackc.low %vm3978_vm13, %vm3977_vm14  ;;  %2594 = vbcast.lane.b32.xlu0 %v11004_v34, 320 }
 0x573   : > { %8584 = vmatprep.subr.msk.bf16.mxu0 %vm8583_vm15, %v10803_v42 }
 0x574   : > { %v1803_v47 = vpop.permute.xlu1 %1802  ;;  %v1799_v18 = vpop.permute.xlu0 %1798 }
 0x575   : > { %vm3962_vm1 = vcmp.gt.f32.partialorder %v1803_v47, %v10972_v9  ;;  %vm3961_vm2 = vcmp.gt.f32.partialorder %v1799_v18, %v10972_v9 }
 0x576   : > { %2539 = vbcast.lane.b32.xlu1 %v10977_v43, 344  ;;  %vm8586_vm3 = vmpackc.low %vm3962_vm1, %vm3961_vm2  ;;  %2535 = vbcast.lane.b32.xlu0 %v10977_v43, 336 }
 0x577   : > { %8587 = vmatpush3.bf16.msk.msra.mxu0 %vm8586_vm3, %v10803_v42 }
 0x578   : > { %v1744_v29 = vpop.permute.xlu1 %1743  ;;  %v1740_v46 = vpop.permute.xlu0 %1739 }
 0x579   : > { %vm3948_vm4 = vcmp.gt.f32.partialorder %v1744_v29, %v10945_v14  ;;  %vm3947_vm5 = vcmp.gt.f32.partialorder %v1740_v46, %v10945_v14  ;;  %v3563_v29 = vcombine.high %v3555_v33, %v3555_v33 }
 0x57a   : > { %2472 = vbcast.lane.b32.xlu1 %v10986_v27, 344  ;;  %vm8541_vm6 = vmpackc.low %vm3948_vm4, %vm3947_vm5  ;;  %2468 = vbcast.lane.b32.xlu0 %v10986_v27, 336 }
 0x57b   : > { %8542 = vmatprep.subr.msk.bf16.mxu1 %vm8541_vm6, %v10821_v50 }
 0x57c   : > { %v1677_v7 = vpop.permute.xlu1 %1676  ;;  %v1673_v25 = vpop.permute.xlu0 %1672 }
 0x57d   : > { %vm3932_vm7 = vcmp.gt.f32.partialorder %v1677_v7, %v10953_v23  ;;  %vm3931_vm8 = vcmp.gt.f32.partialorder %v1673_v25, %v10953_v23  ;;  %v3585_v25 = vrot.slane %v3563_v29, %v10651_v3 }
 0x57e   : > { %2673 = vbcast.lane.b32.xlu1 %v10995_v4, 344  ;;  %vm8544_vm9 = vmpackc.low %vm3932_vm7, %vm3931_vm8  ;;  %2669 = vbcast.lane.b32.xlu0 %v10995_v4, 336 }
 0x57f   : > { %8545 = vmatpush3.bf16.msk.msra.mxu1 %vm8544_vm9, %v10821_v50  ;;  %v3595_v29 = vcombine.high %v3585_v25, %v3585_v25 }
 0x580   : > { %v1878_v47 = vpop.permute.xlu1 %1877  ;;  %v1874_v18 = vpop.permute.xlu0 %1873 }
 0x581   : > { %vm3980_vm10 = vcmp.gt.f32.partialorder %v1878_v47, %v10961_v21  ;;  %vm3979_vm11 = vcmp.gt.f32.partialorder %v1874_v18, %v10961_v21  ;;  %v3571_v18 = vrot.slane %v3555_v33, %v10651_v3 }
 0x582   : > { %2606 = vbcast.lane.b32.xlu1 %v11004_v34, 344  ;;  %vm8589_vm12 = vmpackc.low %vm3980_vm10, %vm3979_vm11  ;;  %2602 = vbcast.lane.b32.xlu0 %v11004_v34, 336 }
 0x583   : > { %8590 = vmatprep.subr.msk.bf16.mxu0 %vm8589_vm12, %v10821_v50  ;;  %v11130_v32 = vrot.slane %v3571_v18, %v10217_v28 }
 0x584   : > { %v1811_v46 = vpop.permute.xlu1 %1810  ;;  %v1807_v7 = vpop.permute.xlu0 %1806 }
 0x585   : > { %vm3964_vm13 = vcmp.gt.f32.partialorder %v1811_v46, %v10972_v9  ;;  %vm3963_vm14 = vcmp.gt.f32.partialorder %v1807_v7, %v10972_v9  ;;  %v11125_v46 = vrot.slane %v3585_v25, %v10217_v28  ;;  %vm3984_vm8 = vcmp.gt.f32.partialorder %v10253_v37, %v11130_v32  ;;  %v767_v25 = vld [vmem:[#allocation11 + $0x120] sm:$0xff] }
 0x586   : > { %2547 = vbcast.lane.b32.xlu1 %v10977_v43, 360  ;;  %vm8592_vm15 = vmpackc.low %vm3964_vm13, %vm3963_vm14  ;;  %2543 = vbcast.lane.b32.xlu0 %v10977_v43, 352  ;;  %vm3983_vm9 = vcmp.gt.f32.partialorder %v10255_v38, %v11130_v32  ;;  %v768_v38 = vld [vmem:[#allocation11 + $0x128] sm:$0xff] }
 0x587   : > { %8593 = vmatpush3.bf16.msk.msra.mxu0 %vm8592_vm15, %v10821_v50  ;;  %vm4000_vm4 = vcmp.gt.f32.partialorder %v10249_v35, %v11125_v46  ;;  %vm3999_vm5 = vcmp.gt.f32.partialorder %v10251_v36, %v11125_v46  ;;  %v3593_v35 = vcombine.high %v3571_v18, %v3571_v18  ;;  %vm4002_vm12 = vcmp.gt.f32.partialorder %v10286_v48, %v11125_v46  ;;  %vm8604_vm15 = vmpackc.low %vm3984_vm8, %vm3983_vm9 }
 0x588   : > { %v1752_v47 = vpop.permute.xlu1 %1751  ;;  %v1748_v22 = vpop.permute.xlu0 %1747  ;;  %vm8601_vm11 = vmpackc.low %vm4000_vm4, %vm3999_vm5  ;;  %vm4001_vm13 = vcmp.gt.f32.partialorder %v10288_v49, %v11125_v46  ;;  %vm3986_vm4 = vcmp.gt.f32.partialorder %v10299_v52, %v11130_v32  ;;  %vm3985_vm5 = vcmp.gt.f32.partialorder %v10301_v53, %v11130_v32  ;;  %vm4004_vm9 = vcmp.gt.f32.partialorder %v10321_v59, %v11125_v46  ;;  %v737_v49 = vld [vmem:[#allocation11 + $0x30] sm:$0xff]  ;;  %v832_v59 = vld [vmem:[#allocation11 + $0x328] sm:$0xff] }
 0x589   : > { %vm3950_vm1 = vcmp.gt.f32.partialorder %v1752_v47, %v10945_v14  ;;  %vm3949_vm2 = vcmp.gt.f32.partialorder %v1748_v22, %v10945_v14  ;;  %v11145_v14 = vrot.slane %v3595_v29, %v10217_v28  ;;  %v11169_v37 = vrot.slane %v3593_v35, %v10217_v28  ;;  %v802_v29 = vld [vmem:[#allocation11 + $0x238] sm:$0xff]  ;;  %v13514_v35 = vld [vmem:[#allocation46_spill] sm:$0xff] }
 0x58a   : > { %2480 = vbcast.lane.b32.xlu1 %v10986_v27, 360  ;;  %vm8547_vm3 = vmpackc.low %vm3950_vm1, %vm3949_vm2  ;;  %2476 = vbcast.lane.b32.xlu0 %v10986_v27, 352  ;;  %v3548_v53 = vcombine.high %v10212_v26, %v10212_v26  ;;  %v13520_v47 = vld [vmem:[#allocation42_spill] sm:$0xff]  ;;  %v13523_v52 = vld [vmem:[#allocation27_spill] sm:$0xff] }
 0x58b   : > { %8548 = vmatprep.subr.msk.bf16.mxu1 %vm8547_vm3, %v10839_v39  ;;  %vm4032_vm1 = vcmp.gt.f32.partialorder %v10260_v40, %v11145_v14  ;;  %vm4031_vm2 = vcmp.gt.f32.partialorder %v10262_v41, %v11145_v14  ;;  %v800_v40 = vld [vmem:[#allocation11 + $0x228] sm:$0xff] }
 0x58c   : > { %v1685_v7 = vpop.permute.xlu1 %1684  ;;  %v1681_v22 = vpop.permute.xlu0 %1680  ;;  %vm11185_vm8 = vmpackc.low %vm4032_vm1, %vm4031_vm2  ;;  %vm4034_vm1 = vcmp.gt.f32.partialorder %v10309_v55, %v11145_v14  ;;  %vm4033_vm2 = vcmp.gt.f32.partialorder %v10311_v56, %v11145_v14  ;;  %v799_v55 = vld [vmem:[#allocation11 + $0x220] sm:$0xff]  ;;  %v13617_v26 = vld [vmem:[#allocation101_spill] sm:$0xff] }
 0x58d   : > { %vm3934_vm6 = vcmp.gt.f32.partialorder %v1685_v7, %v10953_v23  ;;  %vm3933_vm7 = vcmp.gt.f32.partialorder %v1681_v22, %v10953_v23  ;;  %v735_v23 = vld [vmem:[#allocation11 + $0x20] sm:$0xff]  ;;  %v13513_v22 = vld [vmem:[#allocation45_spill] sm:$0xff]  ;;  %v13540_v7 = vld [vmem:[#allocation62_spill] sm:$0xff] }
 0x58e   : > { %2681 = vbcast.lane.b32.xlu1 %v10995_v4, 360  ;;  %vm8550_vm10 = vmpackc.low %vm3934_vm6, %vm3933_vm7  ;;  %2677 = vbcast.lane.b32.xlu0 %v10995_v4, 352 }
 0x58f   : > { %8551 = vmatpush3.bf16.msk.msra.mxu1 %vm8550_vm10, %v10839_v39  ;;  %vm8607_vm7 = vmpackc.low %vm4002_vm12, %vm4001_vm13  ;;  %vm4003_vm10 = vcmp.gt.f32.partialorder %v10323_v60, %v11125_v46  ;;  %vm4016_vm12 = vcmp.gt.f32.partialorder %v10273_v44, %v11169_v37  ;;  %vm4015_vm13 = vcmp.gt.f32.partialorder %v10275_v45, %v11169_v37  ;;  %v11484_v44 = vrot.slane %v10965_v6, %v13523_v52  ;;  %v13526_v60 = vld [vmem:[#allocation53_spill] sm:$0xff]  ;;  %v837_v52 = vld [vmem:[#allocation11 + $0x350] sm:$0xff] }
 0x590   : > { %v1886_v36 = vpop.permute.xlu1 %1885  ;;  %v1882_v33 = vpop.permute.xlu0 %1881  ;;  %8602 = vmatprep.subr.msk.bf16.mxu1 %vm8601_vm11, %v10695_v20 }
 0x591   : > { %vm3982_vm14 = vcmp.gt.f32.partialorder %v1886_v36, %v10961_v21  ;;  %vm3981_vm3 = vcmp.gt.f32.partialorder %v1882_v33, %v10961_v21  ;;  %v13517_v33 = vld [vmem:[#allocation35_spill] sm:$0xff] }
 0x592   : > { %2614 = vbcast.lane.b32.xlu1 %v11004_v34, 360  ;;  %vm8595_vm6 = vmpackc.low %vm3982_vm14, %vm3981_vm3  ;;  %2610 = vbcast.lane.b32.xlu0 %v11004_v34, 352 }
 0x593   : > { %5114 = vmatmul.mubr.f32.vlgmr.msra.gmra.mrb[8].mxu1 %v735_v23  ;;  %8596 = vmatprep.subr.msk.bf16.mxu0 %vm8595_vm6, %v10839_v39  ;;  %vm8610_vm14 = vmpackc.low %vm3986_vm4, %vm3985_vm5  ;;  %vm3988_vm5 = vcmp.gt.f32.partialorder %v10327_v61, %v11130_v32  ;;  %vm3987_vm6 = vcmp.gt.f32.partialorder %v10329_v62, %v11130_v32  ;;  %v11326_v61 = vrot.slane %v3548_v53, %v10651_v3  ;;  %v770_v62 = vld [vmem:[#allocation11 + $0x138] sm:$0xff]  ;;  %v803_v23 = vld [vmem:[#allocation11 + $0x240] sm:$0xff] }
 0x594   : > { %8605 = vmatpush3.bf16.msk.msra.mxu1 %vm8604_vm15, %v10695_v20  ;;  %v1819_v21 = vpop.permute.xlu1 %1818  ;;  %v1815_v48 = vpop.permute.xlu0 %1814  ;;  %5118 = vmatprep.mubr.f32.mxu1 %v768_v38  ;;  %vm8613_vm4 = vmpackc.low %vm4004_vm9, %vm4003_vm10  ;;  %vm4006_vm9 = vcmp.gt.f32.partialorder %v10345_v5, %v11125_v46  ;;  %vm4005_vm10 = vcmp.gt.f32.partialorder %v10348_v8, %v11125_v46  ;;  %v831_v5 = vld [vmem:[#allocation11 + $0x320] sm:$0xff]  ;;  %v13530_v8 = vld [vmem:[#allocation43_spill] sm:$0xff] }
 0x595   : > { %8608 = vmatprep.subr.msk.bf16.mxu1 %vm8607_vm7, %v10712_v51  ;;  %vm3966_vm11 = vcmp.gt.f32.partialorder %v1819_v21, %v10972_v9  ;;  %vm3965_vm15 = vcmp.gt.f32.partialorder %v1815_v48, %v10972_v9  ;;  %vm11232_vm7 = vmpackc.low %vm4016_vm12, %vm4015_vm13  ;;  %vm4018_vm12 = vcmp.gt.f32.partialorder %v10315_v57, %v11169_v37  ;;  %vm4017_vm13 = vcmp.gt.f32.partialorder %v10317_v58, %v11169_v37  ;;  %v13518_v38 = vld [vmem:[#allocation36_spill] sm:$0xff]  ;;  %v740_v48 = vld [vmem:[#allocation11 + $0x48] sm:$0xff] }
 0x596   : > { %2555 = vbcast.lane.b32.xlu1 %v10977_v43, 376  ;;  %vm8598_vm3 = vmpackc.low %vm3966_vm11, %vm3965_vm15  ;;  %2551 = vbcast.lane.b32.xlu0 %v10977_v43, 368  ;;  %vm4035_vm15 = vcmp.gt.f32.partialorder %v10335_v0, %v11145_v14  ;;  %v3564_v9 = vcombine.high %v11326_v61, %v11326_v61  ;;  %v769_v43 = vld [vmem:[#allocation11 + $0x130] sm:$0xff] }
 0x597   : > { %5119 = vmatmul.mubr.f32.gmra.mrb[10].mxu1 %v767_v25  ;;  %8599 = vmatpush3.bf16.msk.msra.mxu0 %vm8598_vm3, %v10839_v39  ;;  %vm11252_vm11 = vmpackc.low %vm4034_vm1, %vm4033_vm2  ;;  %vm3990_vm2 = vcmp.gt.f32.partialorder %v10353_v10, %v11130_v32  ;;  %vm3989_vm3 = vcmp.gt.f32.partialorder %v10355_v11, %v11130_v32  ;;  %v13500_v10 = vld [vmem:[#allocation37_spill] sm:$0xff]  ;;  %v13501_v11 = vld [vmem:[#allocation38_spill] sm:$0xff] }
 0x598   : > { %8611 = vmatpush3.bf16.msk.msra.mxu1 %vm8610_vm14, %v10712_v51  ;;  %v11224_v41 = vpop.permute.xlu1 %2499  ;;  %8650 = vmatprep.subr.msk.bf16.mxu0 %vm11185_vm8, %v10695_v20  ;;  %v11244_v45 = vpop.permute.xlu0 %2495  ;;  %vm8616_vm8 = vmpackc.low %vm3988_vm5, %vm3987_vm6  ;;  %vm4036_vm14 = vcmp.gt.f32.partialorder %v10333_v63, %v11145_v14  ;;  %vm4008_vm5 = vcmp.gt.f32.partialorder %v10371_v15, %v11125_v46  ;;  %vm4007_vm6 = vcmp.gt.f32.partialorder %v10373_v16, %v11125_v46  ;;  %v13497_v63 = vld [vmem:[#allocation32_spill] sm:$0xff]  ;;  %v13504_v15 = vld [vmem:[#allocation30_spill] sm:$0xff] }
 0x599   : > { %8614 = vmatprep.subr.msk.bf16.mxu1 %vm8613_vm4, %v10741_v54  ;;  %5123 = vmatprep.mubr.f32.mxu1 %v800_v40  ;;  %vm8619_vm1 = vmpackc.low %vm4006_vm9, %vm4005_vm10  ;;  %vm4020_vm9 = vcmp.gt.f32.partialorder %v10339_v1, %v11169_v37  ;;  %vm4019_vm10 = vcmp.gt.f32.partialorder %v10341_v2, %v11169_v37  ;;  %v13505_v16 = vld [vmem:[#allocation31_spill] sm:$0xff]  ;;  %v11459_v21 = vrot.slane %v3564_v9, %v10651_v3  ;;  %v13519_v25 = vld [vmem:[#allocation41_spill] sm:$0xff] }
 0x59a   : > { %2488 = vbcast.lane.b32.xlu1 %v10986_v27, 376  ;;  %2484 = vbcast.lane.b32.xlu0 %v10986_v27, 368  ;;  %vm11296_vm4 = vmpackc.low %vm4018_vm12, %vm4017_vm13  ;;  %vm4038_vm12 = vcmp.gt.f32.partialorder %v10359_v12, %v11145_v14  ;;  %vm4037_vm13 = vcmp.gt.f32.partialorder %v10361_v13, %v11145_v14  ;;  %v13506_v12 = vld [vmem:[#allocation33_spill] sm:$0xff]  ;;  %v13507_v13 = vld [vmem:[#allocation34_spill] sm:$0xff] }
 0x59b   : > { %5199 = vmatmul.mubr.f32.vlgmr.msra.gmra.mrb[24].mxu0 %v737_v49  ;;  %5124 = vmatmul.mubr.f32.gmra.mrb[12].mxu1 %v799_v55  ;;  %v13509_v27 = vld [vmem:[#allocation40_spill] sm:$0xff]  ;;  %v13521_v40 = vld [vmem:[#allocation47_spill] sm:$0xff]  ;;  %v801_v55 = vld [vmem:[#allocation11 + $0x230] sm:$0xff] }
 0x59c   : > { %8617 = vmatpush3.bf16.msk.msra.mxu1 %vm8616_vm8, %v10741_v54  ;;  %8653 = vmatpush3.bf16.msk.msra.mxu0 %vm11232_vm7, %v10695_v20  ;;  %v11288_v56 = vpop.permute.xlu1 %2432  ;;  %v11308_v58 = vpop.permute.xlu0 %2428  ;;  %vm11316_vm7 = vmpackc.low %vm4036_vm14, %vm4035_vm15  ;;  %vm3992_vm14 = vcmp.gt.f32.partialorder %v10377_v17, %v11130_v32  ;;  %vm3991_vm15 = vcmp.gt.f32.partialorder %v13497_v63, %v11130_v32  ;;  %v13508_v17 = vld [vmem:[#allocation39_spill] sm:$0xff]  ;;  %v13522_v49 = vld [vmem:[#allocation48_spill] sm:$0xff]  ;;  %v11514_v63 = vrot.slane %v11326_v61, %v10651_v3 }
 0x59d   : > { %8620 = vmatprep.subr.msk.bf16.mxu1 %vm8619_vm1, %v10767_v19  ;;  %8656 = vmatprep.subr.msk.bf16.mxu0 %vm11252_vm11, %v10712_v51  ;;  %vm8622_vm11 = vmpackc.low %vm3990_vm2, %vm3989_vm3  ;;  %vm4010_vm2 = vcmp.gt.f32.partialorder %v13500_v10, %v11125_v46  ;;  %vm4009_vm3 = vcmp.gt.f32.partialorder %v13501_v11, %v11125_v46  ;;  %v13527_v57 = vld [vmem:[#allocation54_spill] sm:$0xff]  ;;  %v13531_v10 = vld [vmem:[#allocation44_spill] sm:$0xff]  ;;  %v11533_v61 = vrot.slane %v11459_v21, %v10217_v28 }
 0x59e   : > { %2689 = vbcast.lane.b32.xlu1 %v10995_v4, 376  ;;  %2685 = vbcast.lane.b32.xlu0 %v10995_v4, 368  ;;  %vm8625_vm8 = vmpackc.low %vm4008_vm5, %vm4007_vm6  ;;  %vm4022_vm5 = vcmp.gt.f32.partialorder %v13504_v15, %v11169_v37  ;;  %vm4021_vm6 = vcmp.gt.f32.partialorder %v13505_v16, %v11169_v37  ;;  %v13510_v4 = vld [vmem:[#allocation26_spill] sm:$0xff]  ;;  %v13532_v11 = vld [vmem:[#allocation49_spill] sm:$0xff] }
 0x59f   : > { %5128 = vmatprep.mubr.f32.mxu1 %v832_v59  ;;  %vm11361_vm1 = vmpackc.low %vm4020_vm9, %vm4019_vm10  ;;  %5203 = vmatprep.mubr.f32.mxu0 %v770_v62  ;;  %vm4040_vm9 = vcmp.gt.f32.partialorder %v13506_v12, %v11145_v14  ;;  %vm4039_vm10 = vcmp.gt.f32.partialorder %v13507_v13, %v11145_v14  ;;  %v11415_v18 = vrot.slane %v10965_v6, %v13510_v4  ;;  %v13533_v1 = vld [vmem:[#allocation50_spill] sm:$0xff]  ;;  %v834_v15 = vld [vmem:[#allocation11 + $0x338] sm:$0xff] }
 0x5a0   : > { %8623 = vmatpush3.bf16.msk.msra.mxu1 %vm8622_vm11, %v10767_v19  ;;  %8659 = vmatpush3.bf16.msk.msra.mxu0 %vm11296_vm4, %v10712_v51  ;;  %v11353_v0 = vpop.permute.xlu1 %2633  ;;  %v11373_v2 = vpop.permute.xlu0 %2629  ;;  %vm11381_vm4 = vmpackc.low %vm4038_vm12, %vm4037_vm13  ;;  %vm3994_vm12 = vcmp.gt.f32.partialorder %v13508_v17, %v11130_v32  ;;  %vm3993_vm13 = vcmp.gt.f32.partialorder %v13509_v27, %v11130_v32  ;;  %v13534_v16 = vld [vmem:[#allocation55_spill] sm:$0xff]  ;;  %v13535_v9 = vld [vmem:[#allocation56_spill] sm:$0xff]  ;;  %v3596_v17 = vcombine.high %v11459_v21, %v11459_v21 }
 0x5a1   : > { %8626 = vmatprep.subr.msk.bf16.mxu1 %vm8625_vm8, %v10785_v31  ;;  %8662 = vmatprep.subr.msk.bf16.mxu0 %vm11316_vm7, %v10741_v54  ;;  %vm8628_vm7 = vmpackc.low %vm3992_vm14, %vm3991_vm15  ;;  %vm4012_vm14 = vcmp.gt.f32.partialorder %v13513_v22, %v11125_v46  ;;  %vm4011_vm15 = vcmp.gt.f32.partialorder %v13514_v35, %v11125_v46  ;;  %v13536_v12 = vld [vmem:[#allocation28_spill] sm:$0xff]  ;;  %v11590_v35 = vrot.slane %v11514_v63, %v10217_v28  ;;  %v13561_v27 = vld [vmem:[#allocation73_spill] sm:$0xff] }
 0x5a2   : > { %2622 = vbcast.lane.b32.xlu1 %v11004_v34, 376  ;;  %2618 = vbcast.lane.b32.xlu0 %v11004_v34, 368  ;;  %vm8631_vm11 = vmpackc.low %vm4010_vm2, %vm4009_vm3  ;;  %vm4024_vm2 = vcmp.gt.f32.partialorder %v13517_v33, %v11169_v37  ;;  %vm4023_vm3 = vcmp.gt.f32.partialorder %v13518_v38, %v11169_v37  ;;  %v11558_v13 = vrot.slane %v10965_v6, %v13536_v12  ;;  %v13543_v33 = vld [vmem:[#allocation51_spill] sm:$0xff]  ;;  %v13544_v38 = vld [vmem:[#allocation52_spill] sm:$0xff] }
 0x5a3   : > { %5129 = vmatmul.mubr.f32.gmra.mrb[14].mxu1 %v831_v5  ;;  %vm11429_vm8 = vmpackc.low %vm4022_vm5, %vm4021_vm6  ;;  %5204 = vmatmul.mubr.f32.gmra.mrb[26].mxu0 %v769_v43  ;;  %vm4042_vm5 = vcmp.gt.f32.partialorder %v13519_v25, %v11145_v14  ;;  %vm4041_vm6 = vcmp.gt.f32.partialorder %v13520_v47, %v11145_v14  ;;  %v3594_v21 = vcombine.high %v11514_v63, %v11514_v63  ;;  %v13545_v25 = vld [vmem:[#allocation57_spill] sm:$0xff]  ;;  %v13546_v47 = vld [vmem:[#allocation58_spill] sm:$0xff] }
 0x5a4   : > { %8629 = vmatpush3.bf16.msk.msra.mxu1 %vm8628_vm7, %v10785_v31  ;;  %8665 = vmatpush3.bf16.msk.msra.mxu0 %vm11361_vm1, %v10741_v54  ;;  %v11421_v34 = vpop.permute.xlu1 %2566  ;;  %v11441_v36 = vpop.permute.xlu0 %2562  ;;  %vm11449_vm1 = vmpackc.low %vm4040_vm9, %vm4039_vm10  ;;  %vm3996_vm9 = vcmp.gt.f32.partialorder %v13521_v40, %v11130_v32  ;;  %vm3995_vm10 = vcmp.gt.f32.partialorder %v13522_v49, %v11130_v32  ;;  %v13548_v40 = vld [vmem:[#allocation64_spill] sm:$0xff]  ;;  %v13549_v49 = vld [vmem:[#allocation29_spill] sm:$0xff] }
 0x5a5   : > { %8632 = vmatprep.subr.msk.bf16.mxu1 %vm8631_vm11, %v10803_v42  ;;  %8668 = vmatprep.subr.msk.bf16.mxu0 %vm11381_vm4, %v10767_v19  ;;  %vm8634_vm4 = vmpackc.low %vm3994_vm12, %vm3993_vm13  ;;  %vm4014_vm12 = vcmp.gt.f32.partialorder %v13526_v60, %v11125_v46  ;;  %vm4013_vm13 = vcmp.gt.f32.partialorder %v13527_v57, %v11125_v46  ;;  %v833_v46 = vld [vmem:[#allocation11 + $0x330] sm:$0xff]  ;;  %v739_v60 = vld [vmem:[#allocation11 + $0x40] sm:$0xff]  ;;  %v11641_v57 = vrot.slane %v3596_v17, %v10217_v28 }
 0x5a6   : > { %2767 = vbcast.lane.b32.xlu1 %v11415_v18, 264  ;;  %2763 = vbcast.lane.b32.xlu0 %v11415_v18, 256  ;;  %vm8637_vm7 = vmpackc.low %vm4012_vm14, %vm4011_vm15  ;;  %vm4026_vm14 = vcmp.gt.f32.partialorder %v13530_v8, %v11169_v37  ;;  %vm4025_vm15 = vcmp.gt.f32.partialorder %v13531_v10, %v11169_v37  ;;  %v13552_v5 = vld [vmem:[#allocation70_spill] sm:$0xff]  ;;  %v13553_v8 = vld [vmem:[#allocation71_spill] sm:$0xff] }
 0x5a7   : > { %5208 = vmatprep.mubr.f32.mxu0 %v802_v29  ;;  %vm11498_vm11 = vmpackc.low %vm4024_vm2, %vm4023_vm3  ;;  %5283 = vmatprep.mubr.f32.mxu1 %v740_v48  ;;  %vm4044_vm2 = vcmp.gt.f32.partialorder %v13532_v11, %v11145_v14  ;;  %vm4043_vm3 = vcmp.gt.f32.partialorder %v13533_v1, %v11145_v14  ;;  %v13539_v29 = vld [vmem:[#allocation61_spill] sm:$0xff]  ;;  %v742_v48 = vld [vmem:[#allocation11 + $0x58] sm:$0xff] }
 0x5a8   : > { %8635 = vmatpush3.bf16.msk.msra.mxu1 %vm8634_vm4, %v10803_v42  ;;  %8671 = vmatpush3.bf16.msk.msra.mxu0 %vm11429_vm8, %v10767_v19  ;;  %v11490_v53 = vpop.permute.xlu1 %2507  ;;  %v11510_v62 = vpop.permute.xlu0 %2503  ;;  %vm11522_vm8 = vmpackc.low %vm4042_vm5, %vm4041_vm6  ;;  %vm3998_vm5 = vcmp.gt.f32.partialorder %v13534_v16, %v11130_v32  ;;  %vm3997_vm6 = vcmp.gt.f32.partialorder %v13535_v9, %v11130_v32  ;;  %v13547_v32 = vld [vmem:[#allocation63_spill] sm:$0xff]  ;;  %v772_v9 = vld [vmem:[#allocation11 + $0x148] sm:$0xff] }
 0x5a9   : > { %8638 = vmatprep.subr.msk.bf16.mxu1 %vm8637_vm7, %v10821_v50  ;;  %8674 = vmatprep.subr.msk.bf16.mxu0 %vm11449_vm1, %v10785_v31  ;;  %vm8640_vm1 = vmpackc.low %vm3996_vm9, %vm3995_vm10  ;;  %vm4064_vm9 = vcmp.gt.f32.partialorder %v13539_v29, %v11533_v61  ;;  %vm4063_vm10 = vcmp.gt.f32.partialorder %v13540_v7, %v11533_v61  ;;  %v13556_v1 = vld [vmem:[#allocation59_spill] sm:$0xff]  ;;  %v13560_v17 = vld [vmem:[#allocation72_spill] sm:$0xff] }
 0x5aa   : > { %2700 = vbcast.lane.b32.xlu1 %v11484_v44, 264  ;;  %2696 = vbcast.lane.b32.xlu0 %v11484_v44, 256  ;;  %vm8643_vm4 = vmpackc.low %vm4014_vm12, %vm4013_vm13  ;;  %vm4028_vm12 = vcmp.gt.f32.partialorder %v13543_v33, %v11169_v37  ;;  %vm4027_vm13 = vcmp.gt.f32.partialorder %v13544_v38, %v11169_v37  ;;  %v13559_v16 = vld [vmem:[#allocation67_spill] sm:$0xff]  ;;  %v771_v7 = vld [vmem:[#allocation11 + $0x140] sm:$0xff] }
 0x5ab   : > { %5209 = vmatmul.mubr.f32.gmra.mrb[28].mxu0 %v801_v55  ;;  %vm11574_vm7 = vmpackc.low %vm4026_vm14, %vm4025_vm15  ;;  %vm4046_vm14 = vcmp.gt.f32.partialorder %v13545_v25, %v11145_v14  ;;  %vm4045_vm15 = vcmp.gt.f32.partialorder %v13546_v47, %v11145_v14  ;;  %v11632_v55 = vrot.slane %v10965_v6, %v13549_v49  ;;  %v13558_v14 = vld [vmem:[#allocation66_spill] sm:$0xff]  ;;  %v13565_v38 = vld [vmem:[#allocation79_spill] sm:$0xff] }
 0x5ac   : > { %8641 = vmatpush3.bf16.msk.msra.mxu1 %vm8640_vm1, %v10821_v50  ;;  %8677 = vmatpush3.bf16.msk.msra.mxu0 %vm11498_vm11, %v10785_v31  ;;  %v11564_v43 = vpop.permute.xlu1 %2440  ;;  %v11586_v22 = vpop.permute.xlu0 %2436  ;;  %vm11598_vm11 = vmpackc.low %vm4044_vm2, %vm4043_vm3  ;;  %vm4048_vm2 = vcmp.gt.f32.partialorder %v13547_v32, %v11590_v35  ;;  %vm4047_vm3 = vcmp.gt.f32.partialorder %v13548_v40, %v11590_v35  ;;  %v13564_v33 = vld [vmem:[#allocation78_spill] sm:$0xff]  ;;  %v13568_v25 = vld [vmem:[#allocation68_spill] sm:$0xff] }
 0x5ad   : > { %8644 = vmatprep.subr.msk.bf16.mxu1 %vm8643_vm4, %v10839_v39  ;;  %8680 = vmatprep.subr.msk.bf16.mxu0 %vm11522_vm8, %v10803_v42  ;;  %vm8646_vm8 = vmpackc.low %vm3998_vm5, %vm3997_vm6  ;;  %vm4066_vm5 = vcmp.gt.f32.partialorder %v13552_v5, %v11533_v61  ;;  %vm4065_vm6 = vcmp.gt.f32.partialorder %v13553_v8, %v11533_v61  ;;  %v13569_v47 = vld [vmem:[#allocation69_spill] sm:$0xff]  ;;  %v13571_v32 = vld [vmem:[#allocation75_spill] sm:$0xff] }
 0x5ae   : > { %2901 = vbcast.lane.b32.xlu1 %v11558_v13, 264  ;;  %5213 = vmatprep.mubr.f32.mxu0 %v834_v15  ;;  %vm8697_vm1 = vmpackc.low %vm4064_vm9, %vm4063_vm10  ;;  %vm4030_vm9 = vcmp.gt.f32.partialorder %v13556_v1, %v11169_v37  ;;  %v13557_v15 = vld [vmem:[#allocation60_spill] sm:$0xff]  ;;  %v804_v40 = vld [vmem:[#allocation11 + $0x248] sm:$0xff] }
 0x5af   : > { %2897 = vbcast.lane.b32.xlu0 %v11558_v13, 256  ;;  %5214 = vmatmul.mubr.f32.gmra.mrb[30].mxu0 %v833_v46  ;;  %vm11649_vm4 = vmpackc.low %vm4028_vm12, %vm4027_vm13  ;;  %vm4029_vm10 = vcmp.gt.f32.partialorder %v13557_v15, %v11169_v37  ;;  %vm4096_vm12 = vcmp.gt.f32.partialorder %v13558_v14, %v11641_v57  ;;  %vm4095_vm13 = vcmp.gt.f32.partialorder %v13559_v16, %v11641_v57  ;;  %v13573_v63 = vld [vmem:[#allocation81_spill] sm:$0xff]  ;;  %v741_v8 = vld [vmem:[#allocation11 + $0x50] sm:$0xff] }
 0x5b0   : > { %8647 = vmatpush3.bf16.msk.msra.mxu1 %vm8646_vm8, %v10839_v39  ;;  %8683 = vmatpush3.bf16.msk.msra.mxu0 %vm11574_vm7, %v10803_v42  ;;  %v11638_v59 = vpop.permute.xlu1 %2641  ;;  %v11661_v10 = vpop.permute.xlu0 %2637  ;;  %vm11669_vm7 = vmpackc.low %vm4046_vm14, %vm4045_vm15  ;;  %v11690_v46 = vrot.slane %v3594_v21, %v10217_v28  ;;  %vm4050_vm14 = vcmp.gt.f32.partialorder %v13560_v17, %v11590_v35  ;;  %vm4049_vm15 = vcmp.gt.f32.partialorder %v13561_v27, %v11590_v35  ;;  %v13576_v1 = vld [vmem:[#allocation86_spill] sm:$0xff]  ;;  %v13577_v15 = vld [vmem:[#allocation87_spill] sm:$0xff] }
 0x5b1   : > { %8686 = vmatprep.subr.msk.bf16.mxu0 %vm11598_vm11, %v10821_v50  ;;  %8698 = vmatprep.subr.msk.bf16.mxu1 %vm8697_vm1, %v10695_v20  ;;  %vm8700_vm11 = vmpackc.low %vm4048_vm2, %vm4047_vm3  ;;  %vm4068_vm2 = vcmp.gt.f32.partialorder %v13564_v33, %v11533_v61  ;;  %vm4067_vm3 = vcmp.gt.f32.partialorder %v13565_v38, %v11533_v61  ;;  %v13581_v17 = vld [vmem:[#allocation77_spill] sm:$0xff]  ;;  %v13582_v27 = vld [vmem:[#allocation82_spill] sm:$0xff] }
 0x5b2   : > { %2834 = vbcast.lane.b32.xlu1 %v11632_v55, 264  ;;  %5368 = vmatprep.mubr.f32.mxu0 %v742_v48  ;;  %vm8703_vm8 = vmpackc.low %vm4066_vm5, %vm4065_vm6  ;;  %vm4080_vm5 = vcmp.gt.f32.partialorder %v13568_v25, %v11690_v46  ;;  %vm4079_vm6 = vcmp.gt.f32.partialorder %v13569_v47, %v11690_v46  ;;  %v13570_v48 = vld [vmem:[#allocation74_spill] sm:$0xff]  ;;  %v13584_v33 = vld [vmem:[#allocation88_spill] sm:$0xff] }
 0x5b3   : > { %2830 = vbcast.lane.b32.xlu0 %v11632_v55, 256  ;;  %5284 = vmatmul.mubr.f32.vlgmr.msra.gmra.mrb[16].mxu1 %v739_v60  ;;  %vm11714_vm1 = vmpackc.low %vm4030_vm9, %vm4029_vm10  ;;  %vm4098_vm9 = vcmp.gt.f32.partialorder %v13570_v48, %v11641_v57  ;;  %vm4097_vm10 = vcmp.gt.f32.partialorder %v13571_v32, %v11641_v57  ;;  %v13572_v60 = vld [vmem:[#allocation80_spill] sm:$0xff]  ;;  %v13585_v38 = vld [vmem:[#allocation89_spill] sm:$0xff] }
 0x5b4   : > { %8689 = vmatpush3.bf16.msk.msra.mxu0 %vm11649_vm4, %v10821_v50  ;;  %8701 = vmatpush3.bf16.msk.msra.mxu1 %vm8700_vm11, %v10695_v20  ;;  %v11706_v29 = vpop.permute.xlu1 %2574  ;;  %v11726_v21 = vpop.permute.xlu0 %2570  ;;  %vm11734_vm4 = vmpackc.low %vm4096_vm12, %vm4095_vm13  ;;  %vm4052_vm12 = vcmp.gt.f32.partialorder %v13572_v60, %v11590_v35  ;;  %vm4051_vm13 = vcmp.gt.f32.partialorder %v13573_v63, %v11590_v35  ;;  %v836_v25 = vld [vmem:[#allocation11 + $0x348] sm:$0xff]  ;;  %v13588_v48 = vld [vmem:[#allocation94_spill] sm:$0xff] }
 0x5b5   : > { %8692 = vmatprep.subr.msk.bf16.mxu0 %vm11669_vm7, %v10839_v39  ;;  %8704 = vmatprep.subr.msk.bf16.mxu1 %vm8703_vm8, %v10712_v51  ;;  %vm8706_vm7 = vmpackc.low %vm4050_vm14, %vm4049_vm15  ;;  %vm4070_vm14 = vcmp.gt.f32.partialorder %v13576_v1, %v11533_v61  ;;  %vm4069_vm15 = vcmp.gt.f32.partialorder %v13577_v15, %v11533_v61  ;;  %v13589_v32 = vld [vmem:[#allocation95_spill] sm:$0xff]  ;;  %v13592_v63 = vld [vmem:[#allocation84_spill] sm:$0xff]  ;;  %v11879_v15 = vrot.slane %v10965_v6, %v10651_v3 }
 0x5b6   : > { %2775 = vbcast.lane.b32.xlu1 %v11415_v18, 280  ;;  %5288 = vmatprep.mubr.f32.mxu1 %v772_v9  ;;  %vm8709_vm11 = vmpackc.low %vm4068_vm2, %vm4067_vm3  ;;  %v13580_v9 = vld [vmem:[#allocation76_spill] sm:$0xff]  ;;  %vm4081_vm3 = vcmp.gt.f32.partialorder %v13581_v17, %v11690_v46  ;;  %v13594_v11 = vld [vmem:[#allocation90_spill] sm:$0xff] }
 0x5b7   : > { %2771 = vbcast.lane.b32.xlu0 %v11415_v18, 272  ;;  %5289 = vmatmul.mubr.f32.gmra.mrb[18].mxu1 %v771_v7  ;;  %vm11776_vm8 = vmpackc.low %vm4080_vm5, %vm4079_vm6  ;;  %vm4082_vm2 = vcmp.gt.f32.partialorder %v13580_v9, %v11690_v46  ;;  %vm4100_vm5 = vcmp.gt.f32.partialorder %v13582_v27, %v11641_v57  ;;  %v13583_v7 = vld [vmem:[#allocation83_spill] sm:$0xff]  ;;  %v13596_v9 = vld [vmem:[#allocation96_spill] sm:$0xff] }
 0x5b8   : > { %8695 = vmatpush3.bf16.msk.msra.mxu0 %vm11714_vm1, %v10839_v39  ;;  %8707 = vmatpush3.bf16.msk.msra.mxu1 %vm8706_vm7, %v10712_v51  ;;  %v11768_v5 = vpop.permute.xlu1 %2515  ;;  %v11788_v14 = vpop.permute.xlu0 %2511  ;;  %vm11796_vm1 = vmpackc.low %vm4098_vm9, %vm4097_vm10  ;;  %vm4099_vm6 = vcmp.gt.f32.partialorder %v13583_v7, %v11641_v57  ;;  %vm4054_vm9 = vcmp.gt.f32.partialorder %v13584_v33, %v11590_v35  ;;  %vm4053_vm10 = vcmp.gt.f32.partialorder %v13585_v38, %v11590_v35  ;;  %v13595_v1 = vld [vmem:[#allocation91_spill] sm:$0xff]  ;;  %v13597_v17 = vld [vmem:[#allocation97_spill] sm:$0xff] }
 0x5b9   : > { %8710 = vmatprep.subr.msk.bf16.mxu1 %vm8709_vm11, %v10741_v54  ;;  %8746 = vmatprep.subr.msk.bf16.mxu0 %vm11734_vm4, %v10695_v20  ;;  %vm8712_vm4 = vmpackc.low %vm4052_vm12, %vm4051_vm13  ;;  %vm4072_vm12 = vcmp.gt.f32.partialorder %v13588_v48, %v11533_v61  ;;  %vm4071_vm13 = vcmp.gt.f32.partialorder %v13589_v32, %v11533_v61  ;;  %v774_v16 = vld [vmem:[#allocation11 + $0x158] sm:$0xff]  ;;  %v835_v7 = vld [vmem:[#allocation11 + $0x340] sm:$0xff] }
 0x5ba   : > { %2708 = vbcast.lane.b32.xlu1 %v11484_v44, 280  ;;  %5293 = vmatprep.mubr.f32.mxu1 %v804_v40  ;;  %vm8715_vm7 = vmpackc.low %vm4070_vm14, %vm4069_vm15  ;;  %vm4084_vm14 = vcmp.gt.f32.partialorder %v13592_v63, %v11690_v46  ;;  %v13600_v33 = vld [vmem:[#allocation102_spill] sm:$0xff]  ;;  %v13601_v38 = vld [vmem:[#allocation103_spill] sm:$0xff] }
 0x5bb   : > { %2704 = vbcast.lane.b32.xlu0 %v11484_v44, 272  ;;  %5369 = vmatmul.mubr.f32.vlgmr.msra.gmra.mrb[32].mxu0 %v741_v8  ;;  %vm11838_vm11 = vmpackc.low %vm4082_vm2, %vm4081_vm3  ;;  %v13593_v8 = vld [vmem:[#allocation85_spill] sm:$0xff]  ;;  %vm4102_vm2 = vcmp.gt.f32.partialorder %v13594_v11, %v11641_v57  ;;  %vm4101_vm3 = vcmp.gt.f32.partialorder %v13595_v1, %v11641_v57  ;;  %v13604_v48 = vld [vmem:[#allocation92_spill] sm:$0xff] }
 0x5bc   : > { %8713 = vmatpush3.bf16.msk.msra.mxu1 %vm8712_vm4, %v10741_v54  ;;  %8749 = vmatpush3.bf16.msk.msra.mxu0 %vm11776_vm8, %v10695_v20  ;;  %v11830_v37 = vpop.permute.xlu1 %2448  ;;  %v11850_v40 = vpop.permute.xlu0 %2444  ;;  %vm11858_vm8 = vmpackc.low %vm4100_vm5, %vm4099_vm6  ;;  %vm4083_vm15 = vcmp.gt.f32.partialorder %v13593_v8, %v11690_v46  ;;  %vm4056_vm5 = vcmp.gt.f32.partialorder %v13596_v9, %v11590_v35  ;;  %vm4055_vm6 = vcmp.gt.f32.partialorder %v13597_v17, %v11590_v35  ;;  %v13605_v32 = vld [vmem:[#allocation93_spill] sm:$0xff]  ;;  %v13606_v60 = vld [vmem:[#allocation98_spill] sm:$0xff] }
 0x5bd   : > { %8716 = vmatprep.subr.msk.bf16.mxu1 %vm8715_vm7, %v10767_v19  ;;  %8752 = vmatprep.subr.msk.bf16.mxu0 %vm11796_vm1, %v10712_v51  ;;  %vm8718_vm1 = vmpackc.low %vm4054_vm9, %vm4053_vm10  ;;  %vm4074_vm9 = vcmp.gt.f32.partialorder %v13600_v33, %v11533_v61  ;;  %vm4073_vm10 = vcmp.gt.f32.partialorder %v13601_v38, %v11533_v61  ;;  %v13607_v63 = vld [vmem:[#allocation99_spill] sm:$0xff]  ;;  %v3612_v8 = vcombine.high %v11879_v15, %v11879_v15  ;;  %v773_v11 = vld [vmem:[#allocation11 + $0x150] sm:$0xff] }
 0x5be   : > { %2909 = vbcast.lane.b32.xlu1 %v11558_v13, 280  ;;  %5294 = vmatmul.mubr.f32.gmra.mrb[20].mxu1 %v803_v23  ;;  %vm8721_vm4 = vmpackc.low %vm4072_vm12, %vm4071_vm13  ;;  %vm4086_vm12 = vcmp.gt.f32.partialorder %v13604_v48, %v11690_v46  ;;  %vm4085_vm13 = vcmp.gt.f32.partialorder %v13605_v32, %v11690_v46  ;;  %v13608_v1 = vld [vmem:[#allocation104_spill] sm:$0xff]  ;;  %v806_v17 = vld [vmem:[#allocation11 + $0x258] sm:$0xff]  ;;  %v12063_v48 = vrot.slane %v11879_v15, %v10651_v3 }
 0x5bf   : > { %2905 = vbcast.lane.b32.xlu0 %v11558_v13, 272  ;;  %5298 = vmatprep.mubr.f32.mxu1 %v836_v25  ;;  %vm11904_vm7 = vmpackc.low %vm4084_vm14, %vm4083_vm15  ;;  %vm4104_vm14 = vcmp.gt.f32.partialorder %v13606_v60, %v11641_v57  ;;  %vm4103_vm15 = vcmp.gt.f32.partialorder %v13607_v63, %v11641_v57  ;;  %v13612_v33 = vld [vmem:[#allocation110_spill] sm:$0xff]  ;;  %v13613_v38 = vld [vmem:[#allocation111_spill] sm:$0xff]  ;;  %v12008_v63 = vrot.slane %v3612_v8, %v10651_v3 }
 0x5c0   : > { %8719 = vmatpush3.bf16.msk.msra.mxu1 %vm8718_vm1, %v10767_v19  ;;  %8755 = vmatpush3.bf16.msk.msra.mxu0 %vm11838_vm11, %v10712_v51  ;;  %v11896_v27 = vpop.permute.xlu1 %2649  ;;  %v11916_v25 = vpop.permute.xlu0 %2645  ;;  %vm11924_vm11 = vmpackc.low %vm4102_vm2, %vm4101_vm3  ;;  %vm4058_vm2 = vcmp.gt.f32.partialorder %v13608_v1, %v11590_v35  ;;  %v13616_v32 = vld [vmem:[#allocation100_spill] sm:$0xff]  ;;  %v13618_v47 = vld [vmem:[#allocation106_spill] sm:$0xff] }
 0x5c1   : > { %8722 = vmatprep.subr.msk.bf16.mxu1 %vm8721_vm4, %v10785_v31  ;;  %8758 = vmatprep.subr.msk.bf16.mxu0 %vm11858_vm8, %v10741_v54  ;;  %vm8724_vm8 = vmpackc.low %vm4056_vm5, %vm4055_vm6  ;;  %vm4076_vm5 = vcmp.gt.f32.partialorder %v13612_v33, %v11533_v61  ;;  %vm4075_vm6 = vcmp.gt.f32.partialorder %v13613_v38, %v11533_v61  ;;  %v13619_v60 = vld [vmem:[#allocation107_spill] sm:$0xff]  ;;  %v13620_v1 = vld [vmem:[#allocation112_spill] sm:$0xff]  ;;  %v12078_v15 = vrot.slane %v12008_v63, %v10217_v28 }
 0x5c2   : > { %2842 = vbcast.lane.b32.xlu1 %v11632_v55, 280  ;;  %5373 = vmatprep.mubr.f32.mxu0 %v774_v16  ;;  %vm8727_vm1 = vmpackc.low %vm4074_vm9, %vm4073_vm10  ;;  %v13609_v16 = vld [vmem:[#allocation105_spill] sm:$0xff]  ;;  %vm4088_vm9 = vcmp.gt.f32.partialorder %v13616_v32, %v11690_v46  ;;  %vm4087_vm10 = vcmp.gt.f32.partialorder %v13617_v26, %v11690_v46  ;;  %v13624_v38 = vld [vmem:[#allocation118_spill] sm:$0xff] }
 0x5c3   : > { %2838 = vbcast.lane.b32.xlu0 %v11632_v55, 272  ;;  %5299 = vmatmul.mubr.f32.gmra.mrb[22].mxu1 %v835_v7  ;;  %vm4057_vm3 = vcmp.gt.f32.partialorder %v13609_v16, %v11590_v35  ;;  %vm11968_vm4 = vmpackc.low %vm4086_vm12, %vm4085_vm13  ;;  %vm4106_vm12 = vcmp.gt.f32.partialorder %v13618_v47, %v11641_v57  ;;  %vm4105_vm13 = vcmp.gt.f32.partialorder %v13619_v60, %v11641_v57  ;;  %v13621_v16 = vld [vmem:[#allocation113_spill] sm:$0xff]  ;;  %v13625_v49 = vld [vmem:[#allocation119_spill] sm:$0xff] }
 0x5c4   : > { %8725 = vmatpush3.bf16.msk.msra.mxu1 %vm8724_vm8, %v10785_v31  ;;  %8761 = vmatpush3.bf16.msk.msra.mxu0 %vm11904_vm7, %v10741_v54  ;;  %v11960_v9 = vpop.permute.xlu1 %2582  ;;  %v11980_v23 = vpop.permute.xlu0 %2578  ;;  %vm11988_vm7 = vmpackc.low %vm4104_vm14, %vm4103_vm15  ;;  %vm4060_vm14 = vcmp.gt.f32.partialorder %v13620_v1, %v11590_v35  ;;  %vm4059_vm15 = vcmp.gt.f32.partialorder %v13621_v16, %v11590_v35  ;;  %v13628_v32 = vld [vmem:[#allocation108_spill] sm:$0xff]  ;;  %v13629_v12 = vld [vmem:[#allocation109_spill] sm:$0xff]  ;;  %v12135_v7 = vrot.slane %v12063_v48, %v10217_v28 }
 0x5c5   : > { %8728 = vmatprep.subr.msk.bf16.mxu1 %vm8727_vm1, %v10803_v42  ;;  %8764 = vmatprep.subr.msk.bf16.mxu0 %vm11924_vm11, %v10767_v19  ;;  %vm8730_vm11 = vmpackc.low %vm4058_vm2, %vm4057_vm3  ;;  %vm4078_vm2 = vcmp.gt.f32.partialorder %v13624_v38, %v11533_v61  ;;  %vm4077_vm3 = vcmp.gt.f32.partialorder %v13625_v49, %v11533_v61  ;;  %v13630_v47 = vld [vmem:[#allocation114_spill] sm:$0xff]  ;;  %v13631_v60 = vld [vmem:[#allocation115_spill] sm:$0xff]  ;;  %v3644_v49 = vcombine.high %v12008_v63, %v12008_v63 }
 0x5c6   : > { %2783 = vbcast.lane.b32.xlu1 %v11415_v18, 296  ;;  %5374 = vmatmul.mubr.f32.gmra.mrb[34].mxu0 %v773_v11  ;;  %v744_v11 = vld [vmem:[#allocation11 + $0x68] sm:$0xff]  ;;  %vm8733_vm8 = vmpackc.low %vm4076_vm5, %vm4075_vm6  ;;  %vm4090_vm5 = vcmp.gt.f32.partialorder %v13628_v32, %v11690_v46  ;;  %vm4089_vm6 = vcmp.gt.f32.partialorder %v13629_v12, %v11690_v46  ;;  %v13632_v1 = vld [vmem:[#allocation120_spill] sm:$0xff] }
 0x5c7   : > { %2779 = vbcast.lane.b32.xlu0 %v11415_v18, 288  ;;  %5378 = vmatprep.mubr.f32.mxu0 %v806_v17  ;;  %v805_v17 = vld [vmem:[#allocation11 + $0x250] sm:$0xff]  ;;  %vm12033_vm1 = vmpackc.low %vm4088_vm9, %vm4087_vm10  ;;  %vm4108_vm9 = vcmp.gt.f32.partialorder %v13630_v47, %v11641_v57  ;;  %vm4107_vm10 = vcmp.gt.f32.partialorder %v13631_v60, %v11641_v57  ;;  %v13633_v16 = vld [vmem:[#allocation121_spill] sm:$0xff] }
 0x5c8   : > { %8731 = vmatpush3.bf16.msk.msra.mxu1 %vm8730_vm11, %v10803_v42  ;;  %8767 = vmatpush3.bf16.msk.msra.mxu0 %vm11968_vm4, %v10767_v19  ;;  %v12025_v8 = vpop.permute.xlu1 %2523  ;;  %v12045_v26 = vpop.permute.xlu0 %2519  ;;  %vm12053_vm4 = vmpackc.low %vm4106_vm12, %vm4105_vm13  ;;  %vm4062_vm12 = vcmp.gt.f32.partialorder %v13632_v1, %v11590_v35  ;;  %vm4061_vm13 = vcmp.gt.f32.partialorder %v13633_v16, %v11590_v35  ;;  %v13638_v33 = vld [vmem:[#allocation116_spill] sm:$0xff]  ;;  %v13639_v38 = vld [vmem:[#allocation117_spill] sm:$0xff] }
 0x5c9   : > { %8734 = vmatprep.subr.msk.bf16.mxu1 %vm8733_vm8, %v10821_v50  ;;  %8770 = vmatprep.subr.msk.bf16.mxu0 %vm11988_vm7, %v10785_v31  ;;  %vm8736_vm7 = vmpackc.low %vm4060_vm14, %vm4059_vm15  ;;  %vm4128_vm14 = vcmp.gt.f32.partialorder %v11224_v41, %v12078_v15  ;;  %vm4127_vm15 = vcmp.gt.f32.partialorder %v11244_v45, %v12078_v15  ;;  %v13640_v32 = vld [vmem:[#allocation122_spill] sm:$0xff]  ;;  %v13641_v47 = vld [vmem:[#allocation123_spill] sm:$0xff]  ;;  %v12178_v45 = vrot.slane %v3644_v49, %v10217_v28 }
 0x5ca   : > { %2716 = vbcast.lane.b32.xlu1 %v11484_v44, 296  ;;  %5453 = vmatprep.mubr.f32.mxu1 %v744_v11  ;;  %v838_v11 = vld [vmem:[#allocation11 + $0x358] sm:$0xff]  ;;  %vm8739_vm11 = vmpackc.low %vm4078_vm2, %vm4077_vm3  ;;  %vm4092_vm2 = vcmp.gt.f32.partialorder %v13638_v33, %v11690_v46  ;;  %vm4091_vm3 = vcmp.gt.f32.partialorder %v13639_v38, %v11690_v46  ;;  %v743_v35 = vld [vmem:[#allocation11 + $0x60] sm:$0xff] }
 0x5cb   : > { %2712 = vbcast.lane.b32.xlu0 %v11484_v44, 288  ;;  %5379 = vmatmul.mubr.f32.gmra.mrb[36].mxu0 %v805_v17  ;;  %vm12103_vm8 = vmpackc.low %vm4090_vm5, %vm4089_vm6  ;;  %vm4110_vm5 = vcmp.gt.f32.partialorder %v13640_v32, %v11641_v57  ;;  %vm4109_vm6 = vcmp.gt.f32.partialorder %v13641_v47, %v11641_v57  ;;  %v746_v60 = vld [vmem:[#allocation11 + $0x78] sm:$0xff]  ;;  %v13646_v16 = vld [vmem:[#allocation124_spill] sm:$0xff] }
 0x5cc   : > { %8737 = vmatpush3.bf16.msk.msra.mxu1 %vm8736_vm7, %v10821_v50  ;;  %8773 = vmatpush3.bf16.msk.msra.mxu0 %vm12033_vm1, %v10785_v31  ;;  %v12095_v17 = vpop.permute.xlu1 %2456  ;;  %v12117_v12 = vpop.permute.xlu0 %2452  ;;  %vm12125_vm1 = vmpackc.low %vm4108_vm9, %vm4107_vm10  ;;  %vm4112_vm9 = vcmp.gt.f32.partialorder %v11288_v56, %v12135_v7  ;;  %vm4111_vm10 = vcmp.gt.f32.partialorder %v11308_v58, %v12135_v7  ;;  %v13647_v61 = vld [vmem:[#allocation125_spill] sm:$0xff]  ;;  %v775_v58 = vld [vmem:[#allocation11 + $0x160] sm:$0xff] }
 0x5cd   : > { %8740 = vmatprep.subr.msk.bf16.mxu1 %vm8739_vm11, %v10839_v39  ;;  %8776 = vmatprep.subr.msk.bf16.mxu0 %vm12053_vm4, %v10803_v42  ;;  %vm8742_vm4 = vmpackc.low %vm4062_vm12, %vm4061_vm13  ;;  %vm4130_vm12 = vcmp.gt.f32.partialorder %v11490_v53, %v12078_v15  ;;  %vm4129_vm13 = vcmp.gt.f32.partialorder %v11510_v62, %v12078_v15  ;;  %v776_v57 = vld [vmem:[#allocation11 + $0x168] sm:$0xff]  ;;  %v842_v63 = vld [vmem:[#allocation11 + $0x378] sm:$0xff] }
 0x5ce   : > { %2917 = vbcast.lane.b32.xlu1 %v11558_v13, 296  ;;  %5383 = vmatprep.mubr.f32.mxu0 %v838_v11  ;;  %v3642_v11 = vcombine.high %v12063_v48, %v12063_v48  ;;  %vm8793_vm7 = vmpackc.low %vm4128_vm14, %vm4127_vm15  ;;  %vm4094_vm14 = vcmp.gt.f32.partialorder %v13646_v16, %v11690_v46  ;;  %vm4093_vm15 = vcmp.gt.f32.partialorder %v13647_v61, %v11690_v46  ;;  %v841_v32 = vld [vmem:[#allocation11 + $0x370] sm:$0xff]  ;;  %v750_v47 = vld [vmem:[#allocation11 + $0x98] sm:$0xff] }
 0x5cf   : > { %2913 = vbcast.lane.b32.xlu0 %v11558_v13, 288  ;;  %5384 = vmatmul.mubr.f32.gmra.mrb[38].mxu0 %v837_v52  ;;  %vm12173_vm11 = vmpackc.low %vm4092_vm2, %vm4091_vm3  ;;  %vm4160_vm2 = vcmp.gt.f32.partialorder %v11353_v0, %v12178_v45  ;;  %vm4159_vm3 = vcmp.gt.f32.partialorder %v11373_v2, %v12178_v45  ;;  %v808_v0 = vld [vmem:[#allocation11 + $0x268] sm:$0xff]  ;;  %v3597_v46 = vcombine.high %v10965_v6, %v10965_v6 }
 0x5d0   : > { %8743 = vmatpush3.bf16.msk.msra.mxu1 %vm8742_vm4, %v10839_v39  ;;  %8779 = vmatpush3.bf16.msk.msra.mxu0 %vm12103_vm8, %v10803_v42  ;;  %v12165_v52 = vpop.permute.xlu1 %2657  ;;  %v12188_v48 = vpop.permute.xlu0 %2653  ;;  %vm12196_vm8 = vmpackc.low %vm4110_vm5, %vm4109_vm6  ;;  %v12217_v49 = vrot.slane %v3642_v11, %v10217_v28  ;;  %vm4114_vm5 = vcmp.gt.f32.partialorder %v11564_v43, %v12135_v7  ;;  %vm4113_vm6 = vcmp.gt.f32.partialorder %v11586_v22, %v12135_v7  ;;  %v745_v43 = vld [vmem:[#allocation11 + $0x70] sm:$0xff] }
 0x5d1   : > { %8782 = vmatprep.subr.msk.bf16.mxu0 %vm12125_vm1, %v10821_v50  ;;  %8794 = vmatprep.subr.msk.bf16.mxu1 %vm8793_vm7, %v10695_v20  ;;  %vm8796_vm1 = vmpackc.low %vm4112_vm9, %vm4111_vm10  ;;  %vm4132_vm9 = vcmp.gt.f32.partialorder %v11768_v5, %v12078_v15  ;;  %vm4131_vm10 = vcmp.gt.f32.partialorder %v11788_v14, %v12078_v15  ;;  %v840_v5 = vld [vmem:[#allocation11 + $0x368] sm:$0xff] }
 0x5d2   : > { %2850 = vbcast.lane.b32.xlu1 %v11632_v55, 296  ;;  %5538 = vmatprep.mubr.f32.mxu0 %v746_v60  ;;  %vm8799_vm4 = vmpackc.low %vm4130_vm12, %vm4129_vm13  ;;  %vm4144_vm12 = vcmp.gt.f32.partialorder %v11421_v34, %v12217_v49  ;;  %vm4143_vm13 = vcmp.gt.f32.partialorder %v11441_v36, %v12217_v49 }
 0x5d3   : > { %2846 = vbcast.lane.b32.xlu0 %v11632_v55, 288  ;;  %5454 = vmatmul.mubr.f32.vlgmr.msra.gmra.mrb[24].mxu1 %v743_v35  ;;  %vm12241_vm7 = vmpackc.low %vm4094_vm14, %vm4093_vm15  ;;  %vm4162_vm14 = vcmp.gt.f32.partialorder %v11638_v59, %v12178_v45  ;;  %vm4161_vm15 = vcmp.gt.f32.partialorder %v11661_v10, %v12178_v45  ;;  %v807_v59 = vld [vmem:[#allocation11 + $0x260] sm:$0xff] }
 0x5d4   : > { %8785 = vmatpush3.bf16.msk.msra.mxu0 %vm12173_vm11, %v10821_v50  ;;  %8797 = vmatpush3.bf16.msk.msra.mxu1 %vm8796_vm1, %v10695_v20  ;;  %v12233_v56 = vpop.permute.xlu1 %2590  ;;  %v12253_v62 = vpop.permute.xlu0 %2586  ;;  %vm12261_vm11 = vmpackc.low %vm4160_vm2, %vm4159_vm3  ;;  %vm4116_vm2 = vcmp.gt.f32.partialorder %v11830_v37, %v12135_v7  ;;  %vm4115_vm3 = vcmp.gt.f32.partialorder %v11850_v40, %v12135_v7 }
 0x5d5   : > { %8788 = vmatprep.subr.msk.bf16.mxu0 %vm12196_vm8, %v10839_v39  ;;  %8800 = vmatprep.subr.msk.bf16.mxu1 %vm8799_vm4, %v10712_v51  ;;  %vm8802_vm8 = vmpackc.low %vm4114_vm5, %vm4113_vm6  ;;  %vm4134_vm5 = vcmp.gt.f32.partialorder %v12025_v8, %v12078_v15  ;;  %vm4133_vm6 = vcmp.gt.f32.partialorder %v12045_v26, %v12078_v15  ;;  %v777_v8 = vld [vmem:[#allocation11 + $0x170] sm:$0xff]  ;;  %v810_v26 = vld [vmem:[#allocation11 + $0x278] sm:$0xff] }
 0x5d6   : > { %2791 = vbcast.lane.b32.xlu1 %v11415_v18, 312  ;;  %5458 = vmatprep.mubr.f32.mxu1 %v776_v57  ;;  %vm8805_vm1 = vmpackc.low %vm4132_vm9, %vm4131_vm10  ;;  %vm4146_vm9 = vcmp.gt.f32.partialorder %v11706_v29, %v12217_v49  ;;  %vm4145_vm10 = vcmp.gt.f32.partialorder %v11726_v21, %v12217_v49  ;;  %v778_v21 = vld [vmem:[#allocation11 + $0x178] sm:$0xff] }
 0x5d7   : > { %2787 = vbcast.lane.b32.xlu0 %v11415_v18, 304  ;;  %5459 = vmatmul.mubr.f32.gmra.mrb[26].mxu1 %v775_v58  ;;  %vm12301_vm4 = vmpackc.low %vm4144_vm12, %vm4143_vm13  ;;  %vm4164_vm12 = vcmp.gt.f32.partialorder %v11896_v27, %v12178_v45  ;;  %vm4163_vm13 = vcmp.gt.f32.partialorder %v11916_v25, %v12178_v45  ;;  %v839_v27 = vld [vmem:[#allocation11 + $0x360] sm:$0xff] }
 0x5d8   : > { %8791 = vmatpush3.bf16.msk.msra.mxu0 %vm12241_vm7, %v10839_v39  ;;  %8803 = vmatpush3.bf16.msk.msra.mxu1 %vm8802_vm8, %v10712_v51  ;;  %v2532_v2 = vpop.permute.xlu1 %2531  ;;  %v2528_v36 = vpop.permute.xlu0 %2527  ;;  %vm12319_vm7 = vmpackc.low %vm4162_vm14, %vm4161_vm15  ;;  %vm4118_vm14 = vcmp.gt.f32.partialorder %v12095_v17, %v12135_v7  ;;  %vm4117_vm15 = vcmp.gt.f32.partialorder %v12117_v12, %v12135_v7  ;;  %v809_v12 = vld [vmem:[#allocation11 + $0x270] sm:$0xff] }
 0x5d9   : > { %8806 = vmatprep.subr.msk.bf16.mxu1 %vm8805_vm1, %v10741_v54  ;;  %8842 = vmatprep.subr.msk.bf16.mxu0 %vm12261_vm11, %v10695_v20  ;;  %vm8808_vm11 = vmpackc.low %vm4116_vm2, %vm4115_vm3  ;;  %vm4136_vm2 = vcmp.gt.f32.partialorder %v2532_v2, %v12078_v15  ;;  %vm4135_vm3 = vcmp.gt.f32.partialorder %v2528_v36, %v12078_v15 }
 0x5da   : > { %2724 = vbcast.lane.b32.xlu1 %v11484_v44, 312  ;;  %5463 = vmatprep.mubr.f32.mxu1 %v808_v0  ;;  %vm8811_vm8 = vmpackc.low %vm4134_vm5, %vm4133_vm6  ;;  %vm4148_vm5 = vcmp.gt.f32.partialorder %v11960_v9, %v12217_v49  ;;  %vm4147_vm6 = vcmp.gt.f32.partialorder %v11980_v23, %v12217_v49  ;;  %v748_v23 = vld [vmem:[#allocation11 + $0x88] sm:$0xff] }
 0x5db   : > { %2720 = vbcast.lane.b32.xlu0 %v11484_v44, 304  ;;  %5539 = vmatmul.mubr.f32.vlgmr.msra.gmra.mrb[40].mxu0 %v745_v43  ;;  %vm12359_vm1 = vmpackc.low %vm4146_vm9, %vm4145_vm10  ;;  %v3611_v43 = vrot.slane %v3597_v46, %v10651_v3 }
 0x5dc   : > { %8809 = vmatpush3.bf16.msk.msra.mxu1 %vm8808_vm11, %v10741_v54  ;;  %8845 = vmatpush3.bf16.msk.msra.mxu0 %vm12301_vm4, %v10695_v20  ;;  %v2465_v10 = vpop.permute.xlu1 %2464  ;;  %v2461_v37 = vpop.permute.xlu0 %2460  ;;  %vm12375_vm4 = vmpackc.low %vm4164_vm12, %vm4163_vm13  ;;  %vm4166_vm12 = vcmp.gt.f32.partialorder %v12165_v52, %v12178_v45  ;;  %vm4165_vm13 = vcmp.gt.f32.partialorder %v12188_v48, %v12178_v45 }
 0x5dd   : > { %8812 = vmatprep.subr.msk.bf16.mxu1 %vm8811_vm8, %v10767_v19  ;;  %8848 = vmatprep.subr.msk.bf16.mxu0 %vm12319_vm7, %v10712_v51  ;;  %vm8814_vm7 = vmpackc.low %vm4118_vm14, %vm4117_vm15  ;;  %vm4120_vm10 = vcmp.gt.f32.partialorder %v2465_v10, %v12135_v7  ;;  %vm4119_vm11 = vcmp.gt.f32.partialorder %v2461_v37, %v12135_v7  ;;  %v3613_v34 = vcombine.high %v3611_v43, %v3611_v43  ;;  %v779_v37 = vld [vmem:[#allocation11 + $0x180] sm:$0xff] }
 0x5de   : > { %2925 = vbcast.lane.b32.xlu1 %v11558_v13, 312  ;;  %5464 = vmatmul.mubr.f32.gmra.mrb[28].mxu1 %v807_v59  ;;  %vm8817_vm9 = vmpackc.low %vm4136_vm2, %vm4135_vm3  ;;  %vm4149_vm2 = vcmp.gt.f32.partialorder %v12253_v62, %v12217_v49  ;;  %v747_v59 = vld [vmem:[#allocation11 + $0x80] sm:$0xff] }
 0x5df   : > { %2921 = vbcast.lane.b32.xlu0 %v11558_v13, 304  ;;  %5468 = vmatprep.mubr.f32.mxu1 %v840_v5  ;;  %vm8856_vm8 = vmpackc.low %vm4148_vm5, %vm4147_vm6  ;;  %v3641_v5 = vrot.slane %v3613_v34, %v10651_v3 }
 0x5e0   : > { %8815 = vmatpush3.bf16.msk.msra.mxu1 %vm8814_vm7, %v10767_v19  ;;  %8851 = vmatpush3.bf16.msk.msra.mxu0 %vm12359_vm1, %v10712_v51  ;;  %v2666_v40 = vpop.permute.xlu1 %2665  ;;  %v2662_v25 = vpop.permute.xlu0 %2661  ;;  %vm8820_vm14 = vmpackc.low %vm4120_vm10, %vm4119_vm11  ;;  %vm4150_vm1 = vcmp.gt.f32.partialorder %v12233_v56, %v12217_v49 }
 0x5e1   : > { %8818 = vmatprep.subr.msk.bf16.mxu1 %vm8817_vm9, %v10785_v31  ;;  %8854 = vmatprep.subr.msk.bf16.mxu0 %vm12375_vm4, %v10741_v54  ;;  %vm8859_vm15 = vmpackc.low %vm4166_vm12, %vm4165_vm13  ;;  %vm4168_vm3 = vcmp.gt.f32.partialorder %v2666_v40, %v12178_v45  ;;  %vm4167_vm4 = vcmp.gt.f32.partialorder %v2662_v25, %v12178_v45  ;;  %v812_v40 = vld [vmem:[#allocation11 + $0x288] sm:$0xff]  ;;  %v749_v25 = vld [vmem:[#allocation11 + $0x90] sm:$0xff] }
 0x5e2   : > { %2858 = vbcast.lane.b32.xlu1 %v11632_v55, 312  ;;  %5543 = vmatprep.mubr.f32.mxu0 %v778_v21  ;;  %vm8862_vm5 = vmpackc.low %vm4150_vm1, %vm4149_vm2  ;;  %v12495_v21 = vrot.slane %v3641_v5, %v10217_v28 }
 0x5e3   : > { %2854 = vbcast.lane.b32.xlu0 %v11632_v55, 304  ;;  %5469 = vmatmul.mubr.f32.gmra.mrb[30].mxu1 %v839_v27  ;;  %vm8865_vm9 = vmpackc.low %vm4168_vm3, %vm4167_vm4 }
 0x5e4   : > { %8821 = vmatpush3.bf16.msk.msra.mxu1 %vm8820_vm14, %v10785_v31  ;;  %8857 = vmatpush3.bf16.msk.msra.mxu0 %vm8856_vm8, %v10741_v54  ;;  %v2599_v9 = vpop.permute.xlu1 %2598  ;;  %v2595_v17 = vpop.permute.xlu0 %2594 }
 0x5e5   : > { %8860 = vmatprep.subr.msk.bf16.mxu0 %vm8859_vm15, %v10767_v19  ;;  %5544 = vmatmul.mubr.f32.gmra.mrb[42].mxu0 %v777_v8  ;;  %vm4152_vm6 = vcmp.gt.f32.partialorder %v2599_v9, %v12217_v49  ;;  %vm4151_vm7 = vcmp.gt.f32.partialorder %v2595_v17, %v12217_v49  ;;  %v811_v8 = vld [vmem:[#allocation11 + $0x280] sm:$0xff] }
 0x5e6   : > { %2799 = vbcast.lane.b32.xlu1 %v11415_v18, 328  ;;  %5548 = vmatprep.mubr.f32.mxu0 %v810_v26  ;;  %vm8868_vm11 = vmpackc.low %vm4152_vm6, %vm4151_vm7  ;;  %v3645_v26 = vcombine.high %v3641_v5, %v3641_v5 }
 0x5e7   : > { %2795 = vbcast.lane.b32.xlu0 %v11415_v18, 320  ;;  %5623 = vmatprep.mubr.f32.mxu1 %v748_v23  ;;  %v782_v23 = vld [vmem:[#allocation11 + $0x198] sm:$0xff] }
 0x5e8   : > { %8863 = vmatpush3.bf16.msk.msra.mxu0 %vm8862_vm5, %v10767_v19  ;;  %v2540_v33 = vpop.permute.xlu1 %2539  ;;  %v2536_v38 = vpop.permute.xlu0 %2535 }
 0x5e9   : > { %vm4138_vm10 = vcmp.gt.f32.partialorder %v2540_v33, %v12078_v15  ;;  %8866 = vmatprep.subr.msk.bf16.mxu0 %vm8865_vm9, %v10785_v31  ;;  %5549 = vmatmul.mubr.f32.gmra.mrb[44].mxu0 %v809_v12  ;;  %vm4137_vm12 = vcmp.gt.f32.partialorder %v2536_v38, %v12078_v15  ;;  %v781_v12 = vld [vmem:[#allocation11 + $0x190] sm:$0xff]  ;;  %v843_v33 = vld [vmem:[#allocation11 + $0x380] sm:$0xff] }
 0x5ea   : > { %2732 = vbcast.lane.b32.xlu1 %v11484_v44, 328  ;;  %5553 = vmatprep.mubr.f32.mxu0 %v842_v63  ;;  %vm8823_vm13 = vmpackc.low %vm4138_vm10, %vm4137_vm12 }
 0x5eb   : > { %2728 = vbcast.lane.b32.xlu0 %v11484_v44, 320  ;;  %8824 = vmatprep.subr.msk.bf16.mxu1 %vm8823_vm13, %v10803_v42 }
 0x5ec   : > { %8869 = vmatpush3.bf16.msk.msra.mxu0 %vm8868_vm11, %v10785_v31  ;;  %v2473_v60 = vpop.permute.xlu1 %2472  ;;  %v2469_v11 = vpop.permute.xlu0 %2468 }
 0x5ed   : > { %vm4122_vm8 = vcmp.gt.f32.partialorder %v2473_v60, %v12135_v7  ;;  %5554 = vmatmul.mubr.f32.gmra.mrb[46].mxu0 %v841_v32  ;;  %vm4121_vm14 = vcmp.gt.f32.partialorder %v2469_v11, %v12135_v7  ;;  %v814_v32 = vld [vmem:[#allocation11 + $0x298] sm:$0xff]  ;;  %v13660_v60 = vld [vmem:[#allocation126_spill] sm:$0xff] }
 0x5ee   : > { %2933 = vbcast.lane.b32.xlu1 %v11558_v13, 328  ;;  %5708 = vmatprep.mubr.f32.mxu0 %v750_v47  ;;  %vm8826_vm15 = vmpackc.low %vm4122_vm8, %vm4121_vm14  ;;  %v752_v47 = vld [vmem:[#allocation11 + $0xa8] sm:$0xff]  ;;  %v12515_v11 = vmul.f32 0.17677669, %v13660_v60 }
 0x5ef   : > { %2929 = vbcast.lane.b32.xlu0 %v11558_v13, 320  ;;  %8827 = vmatpush3.bf16.msk.msra.mxu1 %vm8826_vm15, %v10803_v42 }
 0x5f0   : > { %v2674_v52 = vpop.permute.xlu1 %2673  ;;  %v2670_v35 = vpop.permute.xlu0 %2669 }
 0x5f1   : > { %vm4170_vm1 = vcmp.gt.f32.partialorder %v2674_v52, %v12178_v45  ;;  %vm4169_vm2 = vcmp.gt.f32.partialorder %v2670_v35, %v12178_v45  ;;  %v813_v35 = vld [vmem:[#allocation11 + $0x290] sm:$0xff] }
 0x5f2   : > { %2866 = vbcast.lane.b32.xlu1 %v11632_v55, 328  ;;  %vm8871_vm3 = vmpackc.low %vm4170_vm1, %vm4169_vm2 }
 0x5f3   : > { %2862 = vbcast.lane.b32.xlu0 %v11632_v55, 320  ;;  %8872 = vmatprep.subr.msk.bf16.mxu0 %vm8871_vm3, %v10803_v42 }
 0x5f4   : > { %v2607_v41 = vpop.permute.xlu1 %2606  ;;  %v2603_v48 = vpop.permute.xlu0 %2602 }
 0x5f5   : > { %vm4154_vm4 = vcmp.gt.f32.partialorder %v2607_v41, %v12217_v49  ;;  %vm4153_vm5 = vcmp.gt.f32.partialorder %v2603_v48, %v12217_v49  ;;  %v846_v48 = vld [vmem:[#allocation11 + $0x398] sm:$0xff] }
 0x5f6   : > { %2807 = vbcast.lane.b32.xlu1 %v11415_v18, 344  ;;  %vm8874_vm6 = vmpackc.low %vm4154_vm4, %vm4153_vm5 }
 0x5f7   : > { %2803 = vbcast.lane.b32.xlu0 %v11415_v18, 336  ;;  %8875 = vmatpush3.bf16.msk.msra.mxu0 %vm8874_vm6, %v10803_v42 }
 0x5f8   : > { %v2548_v1 = vpop.permute.xlu1 %2547  ;;  %v2544_v16 = vpop.permute.xlu0 %2543 }
 0x5f9   : > { %vm4140_vm7 = vcmp.gt.f32.partialorder %v2548_v1, %v12078_v15  ;;  %vm4139_vm9 = vcmp.gt.f32.partialorder %v2544_v16, %v12078_v15  ;;  %v12527_v1 = vrot.slane %v12515_v11, %v10210_v24  ;;  %v12536_v24 = vrot.slane %v12515_v11, %v10217_v28 }
 0x5fa   : > { %2740 = vbcast.lane.b32.xlu1 %v11484_v44, 344  ;;  %vm8829_vm10 = vmpackc.low %vm4140_vm7, %vm4139_vm9 }
 0x5fb   : > { %2736 = vbcast.lane.b32.xlu0 %v11484_v44, 336  ;;  %8830 = vmatprep.subr.msk.bf16.mxu1 %vm8829_vm10, %v10821_v50 }
 0x5fc   : > { %v2481_v61 = vpop.permute.xlu1 %2480  ;;  %v2477_v57 = vpop.permute.xlu0 %2476 }
 0x5fd   : > { %vm4124_vm11 = vcmp.gt.f32.partialorder %v2481_v61, %v12135_v7  ;;  %vm4123_vm12 = vcmp.gt.f32.partialorder %v2477_v57, %v12135_v7  ;;  %v845_v61 = vld [vmem:[#allocation11 + $0x390] sm:$0xff] }
 0x5fe   : > { %2941 = vbcast.lane.b32.xlu1 %v11558_v13, 344  ;;  %vm8832_vm13 = vmpackc.low %vm4124_vm11, %vm4123_vm12 }
 0x5ff   : > { %2937 = vbcast.lane.b32.xlu0 %v11558_v13, 336  ;;  %8833 = vmatpush3.bf16.msk.msra.mxu1 %vm8832_vm13, %v10821_v50 }
 0x600   : > { %v2682_v56 = vpop.permute.xlu1 %2681  ;;  %v2678_v58 = vpop.permute.xlu0 %2677 }
 0x601   : > { %vm4172_vm8 = vcmp.gt.f32.partialorder %v2682_v56, %v12178_v45  ;;  %vm4171_vm14 = vcmp.gt.f32.partialorder %v2678_v58, %v12178_v45 }
 0x602   : > { %2874 = vbcast.lane.b32.xlu1 %v11632_v55, 344  ;;  %vm8877_vm15 = vmpackc.low %vm4172_vm8, %vm4171_vm14 }
 0x603   : > { %2870 = vbcast.lane.b32.xlu0 %v11632_v55, 336  ;;  %8878 = vmatprep.subr.msk.bf16.mxu0 %vm8877_vm15, %v10821_v50 }
 0x604   : > { %v2615_v53 = vpop.permute.xlu1 %2614  ;;  %v2611_v62 = vpop.permute.xlu0 %2610 }
 0x605   : > { %vm4156_vm1 = vcmp.gt.f32.partialorder %v2615_v53, %v12217_v49  ;;  %vm4155_vm2 = vcmp.gt.f32.partialorder %v2611_v62, %v12217_v49  ;;  %v12545_v53 = vrot.slane %v12515_v11, %v10222_v30 }
 0x606   : > { %2815 = vbcast.lane.b32.xlu1 %v11415_v18, 360  ;;  %vm8880_vm3 = vmpackc.low %vm4156_vm1, %vm4155_vm2 }
 0x607   : > { %2811 = vbcast.lane.b32.xlu0 %v11415_v18, 352  ;;  %8881 = vmatpush3.bf16.msk.msra.mxu0 %vm8880_vm3, %v10821_v50 }
 0x608   : > { %v2556_v0 = vpop.permute.xlu1 %2555  ;;  %v2552_v2 = vpop.permute.xlu0 %2551 }
 0x609   : > { %vm4142_vm4 = vcmp.gt.f32.partialorder %v2556_v0, %v12078_v15  ;;  %vm4141_vm5 = vcmp.gt.f32.partialorder %v2552_v2, %v12078_v15  ;;  %v13661_v0 = vld [vmem:[#allocation25_spill] sm:$0xff] }
 0x60a   : > { %2748 = vbcast.lane.b32.xlu1 %v11484_v44, 360  ;;  %vm8835_vm6 = vmpackc.low %vm4142_vm4, %vm4141_vm5  ;;  %v12554_v2 = vrot.slane %v12515_v11, %v13661_v0 }
 0x60b   : > { %2744 = vbcast.lane.b32.xlu0 %v11484_v44, 352  ;;  %8836 = vmatprep.subr.msk.bf16.mxu1 %vm8835_vm6, %v10839_v39 }
 0x60c   : > { %v2489_v22 = vpop.permute.xlu1 %2488  ;;  %v2485_v36 = vpop.permute.xlu0 %2484 }
 0x60d   : > { %vm4126_vm7 = vcmp.gt.f32.partialorder %v2489_v22, %v12135_v7  ;;  %vm4125_vm9 = vcmp.gt.f32.partialorder %v2485_v36, %v12135_v7  ;;  %v780_v7 = vld [vmem:[#allocation11 + $0x188] sm:$0xff] }
 0x60e   : > { %2949 = vbcast.lane.b32.xlu1 %v11558_v13, 360  ;;  %vm8838_vm10 = vmpackc.low %vm4126_vm7, %vm4125_vm9 }
 0x60f   : > { %2945 = vbcast.lane.b32.xlu0 %v11558_v13, 352  ;;  %8839 = vmatpush3.bf16.msk.msra.mxu1 %vm8838_vm10, %v10839_v39 }
 0x610   : > { %v2690_v15 = vpop.permute.xlu1 %2689  ;;  %v2686_v10 = vpop.permute.xlu0 %2685 }
 0x611   : > { %vm4174_vm11 = vcmp.gt.f32.partialorder %v2690_v15, %v12178_v45  ;;  %vm4173_vm12 = vcmp.gt.f32.partialorder %v2686_v10, %v12178_v45  ;;  %v3627_v45 = vrot.slane %v3611_v43, %v10651_v3 }
 0x612   : > { %2882 = vbcast.lane.b32.xlu1 %v11632_v55, 360  ;;  %vm8883_vm13 = vmpackc.low %vm4174_vm11, %vm4173_vm12  ;;  %5624 = vmatmul.mubr.f32.vlgmr.msra.gmra.mrb[32].mxu1 %v747_v59 }
 0x613   : > { %2878 = vbcast.lane.b32.xlu0 %v11632_v55, 352  ;;  %8884 = vmatprep.subr.msk.bf16.mxu0 %vm8883_vm13, %v10839_v39  ;;  %v12503_v9 = vrot.slane %v3627_v45, %v10217_v28  ;;  %v3643_v38 = vcombine.high %v3627_v45, %v3627_v45 }
 0x614   : > { %v2623_v14 = vpop.permute.xlu1 %2622  ;;  %5628 = vmatprep.mubr.f32.mxu1 %v780_v7  ;;  %v2619_v29 = vpop.permute.xlu0 %2618 }
 0x615   : > { %vm4158_vm8 = vcmp.gt.f32.partialorder %v2623_v14, %v12217_v49  ;;  %vm4157_vm14 = vcmp.gt.f32.partialorder %v2619_v29, %v12217_v49 }
 0x616   : > { %2823 = vbcast.lane.b32.xlu1 %v11415_v18, 376  ;;  %vm8886_vm15 = vmpackc.low %vm4158_vm8, %vm4157_vm14  ;;  %5629 = vmatmul.mubr.f32.gmra.mrb[34].mxu1 %v779_v37 }
 0x617   : > { %2819 = vbcast.lane.b32.xlu0 %v11415_v18, 368  ;;  %8887 = vmatpush3.bf16.msk.msra.mxu0 %vm8886_vm15, %v10839_v39  ;;  %v844_v18 = vld [vmem:[#allocation11 + $0x388] sm:$0xff] }
 0x618   : > { %v2768_v27 = vpop.permute.xlu1 %2767  ;;  %5633 = vmatprep.mubr.f32.mxu1 %v812_v40  ;;  %v2764_v49 = vpop.permute.xlu0 %2763 }
 0x619   : > { %vm4192_vm1 = vcmp.gt.f32.partialorder %v2768_v27, %v12495_v21  ;;  %vm4191_vm2 = vcmp.gt.f32.partialorder %v2764_v49, %v12495_v21 }
 0x61a   : > { %2756 = vbcast.lane.b32.xlu1 %v11484_v44, 376  ;;  %vm8889_vm3 = vmpackc.low %vm4192_vm1, %vm4191_vm2  ;;  %5709 = vmatmul.mubr.f32.vlgmr.msra.gmra.mrb[48].mxu0 %v749_v25 }
 0x61b   : > { %2752 = vbcast.lane.b32.xlu0 %v11484_v44, 368  ;;  %8890 = vmatprep.subr.msk.bf16.mxu1 %vm8889_vm3, %v10695_v20  ;;  %v12511_v44 = vrot.slane %v3645_v26, %v10217_v28 }
 0x61c   : > { %v2701_v17 = vpop.permute.xlu1 %2700  ;;  %5634 = vmatmul.mubr.f32.gmra.mrb[36].mxu1 %v811_v8  ;;  %v2697_v63 = vpop.permute.xlu0 %2696  ;;  %5713 = vmatprep.mubr.f32.mxu0 %v782_v23 }
 0x61d   : > { %vm4176_vm4 = vcmp.gt.f32.partialorder %v2701_v17, %v12503_v9  ;;  %5638 = vmatprep.mubr.f32.mxu1 %v844_v18  ;;  %vm4175_vm5 = vcmp.gt.f32.partialorder %v2697_v63, %v12503_v9 }
 0x61e   : > { %2957 = vbcast.lane.b32.xlu1 %v11558_v13, 376  ;;  %vm8892_vm6 = vmpackc.low %vm4176_vm4, %vm4175_vm5  ;;  %5714 = vmatmul.mubr.f32.gmra.mrb[50].mxu0 %v781_v12 }
 0x61f   : > { %2953 = vbcast.lane.b32.xlu0 %v11558_v13, 368  ;;  %8893 = vmatpush3.bf16.msk.msra.mxu1 %vm8892_vm6, %v10695_v20  ;;  %v12522_v13 = vrot.slane %v3643_v38, %v10217_v28 }
 0x620   : > { %v2902_v52 = vpop.permute.xlu1 %2901  ;;  %5718 = vmatprep.mubr.f32.mxu0 %v814_v32  ;;  %5639 = vmatmul.mubr.f32.gmra.mrb[38].mxu1 %v843_v33 }
 0x621   : > { %vm4224_vm7 = vcmp.gt.f32.partialorder %v2902_v52, %v12511_v44  ;;  %v2898_v41 = vpop.permute.xlu0 %2897  ;;  %5793 = vmatprep.mubr.f32.mxu1 %v752_v47 }
 0x622   : > { %vm4223_vm9 = vcmp.gt.f32.partialorder %v2898_v41, %v12511_v44  ;;  %2890 = vbcast.lane.b32.xlu1 %v11632_v55, 376  ;;  %5719 = vmatmul.mubr.f32.gmra.mrb[52].mxu0 %v813_v35 }
 0x623   : > { %vm8937_vm10 = vmpackc.low %vm4224_vm7, %vm4223_vm9  ;;  %2886 = vbcast.lane.b32.xlu0 %v11632_v55, 368  ;;  %5723 = vmatprep.mubr.f32.mxu0 %v846_v48  ;;  %v754_v55 = vld [vmem:[#allocation11 + $0xb8] sm:$0xff] }
 0x624   : > { %8938 = vmatprep.subr.msk.bf16.mxu0 %vm8937_vm10, %v10695_v20  ;;  %v2835_v16 = vpop.permute.xlu1 %2834 }
 0x625   : > { %vm4208_vm11 = vcmp.gt.f32.partialorder %v2835_v16, %v12522_v13  ;;  %v2831_v57 = vpop.permute.xlu0 %2830 }
 0x626   : > { %vm4207_vm12 = vcmp.gt.f32.partialorder %v2831_v57, %v12522_v13  ;;  %3035 = vbcast.lane.b32.xlu1 %v12527_v1, 264  ;;  %5724 = vmatmul.mubr.f32.gmra.mrb[54].mxu0 %v845_v61 }
 0x627   : > { %vm8940_vm13 = vmpackc.low %vm4208_vm11, %vm4207_vm12  ;;  %3031 = vbcast.lane.b32.xlu0 %v12527_v1, 256  ;;  %5878 = vmatprep.mubr.f32.mxu0 %v754_v55 }
 0x628   : > { %8941 = vmatpush3.bf16.msk.msra.mxu0 %vm8940_vm13, %v10695_v20  ;;  %v2776_v56 = vpop.permute.xlu1 %2775 }
 0x629   : > { %vm4194_vm8 = vcmp.gt.f32.partialorder %v2776_v56, %v12495_v21  ;;  %v2772_v58 = vpop.permute.xlu0 %2771 }
 0x62a   : > { %vm4193_vm14 = vcmp.gt.f32.partialorder %v2772_v58, %v12495_v21  ;;  %2968 = vbcast.lane.b32.xlu1 %v12536_v24, 264 }
 0x62b   : > { %vm8895_vm15 = vmpackc.low %vm4194_vm8, %vm4193_vm14  ;;  %2964 = vbcast.lane.b32.xlu0 %v12536_v24, 256 }
 0x62c   : > { %8896 = vmatprep.subr.msk.bf16.mxu1 %vm8895_vm15, %v10712_v51  ;;  %v2709_v62 = vpop.permute.xlu1 %2708 }
 0x62d   : > { %vm4178_vm1 = vcmp.gt.f32.partialorder %v2709_v62, %v12503_v9  ;;  %v2705_v46 = vpop.permute.xlu0 %2704 }
 0x62e   : > { %vm4177_vm2 = vcmp.gt.f32.partialorder %v2705_v46, %v12503_v9  ;;  %3169 = vbcast.lane.b32.xlu1 %v12545_v53, 264 }
 0x62f   : > { %vm8898_vm3 = vmpackc.low %vm4178_vm1, %vm4177_vm2  ;;  %3165 = vbcast.lane.b32.xlu0 %v12545_v53, 256 }
 0x630   : > { %8899 = vmatpush3.bf16.msk.msra.mxu1 %vm8898_vm3, %v10712_v51  ;;  %v2910_v30 = vpop.permute.xlu1 %2909 }
 0x631   : > { %vm4226_vm4 = vcmp.gt.f32.partialorder %v2910_v30, %v12511_v44  ;;  %v2906_v43 = vpop.permute.xlu0 %2905 }
 0x632   : > { %vm4225_vm5 = vcmp.gt.f32.partialorder %v2906_v43, %v12511_v44  ;;  %3102 = vbcast.lane.b32.xlu1 %v12554_v2, 264 }
 0x633   : > { %vm8943_vm6 = vmpackc.low %vm4226_vm4, %vm4225_vm5  ;;  %3098 = vbcast.lane.b32.xlu0 %v12554_v2, 256 }
 0x634   : > { %8944 = vmatprep.subr.msk.bf16.mxu0 %vm8943_vm6, %v10712_v51  ;;  %v2843_v22 = vpop.permute.xlu1 %2842 }
 0x635   : > { %vm4210_vm7 = vcmp.gt.f32.partialorder %v2843_v22, %v12522_v13  ;;  %v2839_v36 = vpop.permute.xlu0 %2838 }
 0x636   : > { %vm4209_vm9 = vcmp.gt.f32.partialorder %v2839_v36, %v12522_v13  ;;  %3043 = vbcast.lane.b32.xlu1 %v12527_v1, 280  ;;  %v3653_v36 = vrot.slane %v12515_v11, %v10651_v3 }
 0x637   : > { %vm8946_vm10 = vmpackc.low %vm4210_vm7, %vm4209_vm9  ;;  %3039 = vbcast.lane.b32.xlu0 %v12527_v1, 272 }
 0x638   : > { %8947 = vmatpush3.bf16.msk.msra.mxu0 %vm8946_vm10, %v10712_v51  ;;  %v2784_v34 = vpop.permute.xlu1 %2783 }
 0x639   : > { %vm4196_vm11 = vcmp.gt.f32.partialorder %v2784_v34, %v12495_v21  ;;  %v2780_v15 = vpop.permute.xlu0 %2779 }
 0x63a   : > { %vm4195_vm12 = vcmp.gt.f32.partialorder %v2780_v15, %v12495_v21  ;;  %2976 = vbcast.lane.b32.xlu1 %v12536_v24, 280 }
 0x63b   : > { %vm8901_vm13 = vmpackc.low %vm4196_vm11, %vm4195_vm12  ;;  %2972 = vbcast.lane.b32.xlu0 %v12536_v24, 272 }
 0x63c   : > { %8902 = vmatprep.subr.msk.bf16.mxu1 %vm8901_vm13, %v10741_v54  ;;  %v2717_v59 = vpop.permute.xlu1 %2716 }
 0x63d   : > { %vm4180_vm8 = vcmp.gt.f32.partialorder %v2717_v59, %v12503_v9  ;;  %v2713_v10 = vpop.permute.xlu0 %2712  ;;  %v3661_v59 = vcombine.high %v3653_v36, %v3653_v36 }
 0x63e   : > { %vm4179_vm14 = vcmp.gt.f32.partialorder %v2713_v10, %v12503_v9  ;;  %3177 = vbcast.lane.b32.xlu1 %v12545_v53, 280  ;;  %v751_v10 = vld [vmem:[#allocation11 + $0xa0] sm:$0xff] }
 0x63f   : > { %vm8904_vm15 = vmpackc.low %vm4180_vm8, %vm4179_vm14  ;;  %3173 = vbcast.lane.b32.xlu0 %v12545_v53, 272 }
 0x640   : > { %8905 = vmatpush3.bf16.msk.msra.mxu1 %vm8904_vm15, %v10741_v54  ;;  %v2918_v5 = vpop.permute.xlu1 %2917 }
 0x641   : > { %vm4228_vm1 = vcmp.gt.f32.partialorder %v2918_v5, %v12511_v44  ;;  %v2914_v7 = vpop.permute.xlu0 %2913 }
 0x642   : > { %vm4227_vm2 = vcmp.gt.f32.partialorder %v2914_v7, %v12511_v44  ;;  %3110 = vbcast.lane.b32.xlu1 %v12554_v2, 280  ;;  %v784_v7 = vld [vmem:[#allocation11 + $0x1a8] sm:$0xff] }
 0x643   : > { %vm8949_vm3 = vmpackc.low %vm4228_vm1, %vm4227_vm2  ;;  %3106 = vbcast.lane.b32.xlu0 %v12554_v2, 272 }
 0x644   : > { %8950 = vmatprep.subr.msk.bf16.mxu0 %vm8949_vm3, %v10741_v54  ;;  %v2851_v14 = vpop.permute.xlu1 %2850 }
 0x645   : > { %vm4212_vm4 = vcmp.gt.f32.partialorder %v2851_v14, %v12522_v13  ;;  %v2847_v37 = vpop.permute.xlu0 %2846 }
 0x646   : > { %vm4211_vm5 = vcmp.gt.f32.partialorder %v2847_v37, %v12522_v13  ;;  %3051 = vbcast.lane.b32.xlu1 %v12527_v1, 296  ;;  %v783_v37 = vld [vmem:[#allocation11 + $0x1a0] sm:$0xff] }
 0x647   : > { %vm8952_vm6 = vmpackc.low %vm4212_vm4, %vm4211_vm5  ;;  %3047 = vbcast.lane.b32.xlu0 %v12527_v1, 288 }
 0x648   : > { %8953 = vmatpush3.bf16.msk.msra.mxu0 %vm8952_vm6, %v10741_v54  ;;  %v2792_v29 = vpop.permute.xlu1 %2791 }
 0x649   : > { %vm4198_vm7 = vcmp.gt.f32.partialorder %v2792_v29, %v12495_v21  ;;  %v2788_v45 = vpop.permute.xlu0 %2787 }
 0x64a   : > { %vm4197_vm9 = vcmp.gt.f32.partialorder %v2788_v45, %v12495_v21  ;;  %2984 = vbcast.lane.b32.xlu1 %v12536_v24, 296  ;;  %v816_v45 = vld [vmem:[#allocation11 + $0x2a8] sm:$0xff] }
 0x64b   : > { %vm8907_vm10 = vmpackc.low %vm4198_vm7, %vm4197_vm9  ;;  %2980 = vbcast.lane.b32.xlu0 %v12536_v24, 288 }
 0x64c   : > { %8908 = vmatprep.subr.msk.bf16.mxu1 %vm8907_vm10, %v10767_v19  ;;  %v2725_v40 = vpop.permute.xlu1 %2724 }
 0x64d   : > { %vm4182_vm11 = vcmp.gt.f32.partialorder %v2725_v40, %v12503_v9  ;;  %v2721_v27 = vpop.permute.xlu0 %2720 }
 0x64e   : > { %vm4181_vm12 = vcmp.gt.f32.partialorder %v2721_v27, %v12503_v9  ;;  %3185 = vbcast.lane.b32.xlu1 %v12545_v53, 296 }
 0x64f   : > { %vm8910_vm13 = vmpackc.low %vm4182_vm11, %vm4181_vm12  ;;  %3181 = vbcast.lane.b32.xlu0 %v12545_v53, 288 }
 0x650   : > { %8911 = vmatpush3.bf16.msk.msra.mxu1 %vm8910_vm13, %v10767_v19  ;;  %v2926_v25 = vpop.permute.xlu1 %2925 }
 0x651   : > { %vm4230_vm8 = vcmp.gt.f32.partialorder %v2926_v25, %v12511_v44  ;;  %v2922_v49 = vpop.permute.xlu0 %2921  ;;  %v753_v25 = vld [vmem:[#allocation11 + $0xb0] sm:$0xff] }
 0x652   : > { %vm4229_vm14 = vcmp.gt.f32.partialorder %v2922_v49, %v12511_v44  ;;  %3118 = vbcast.lane.b32.xlu1 %v12554_v2, 296 }
 0x653   : > { %vm8955_vm15 = vmpackc.low %vm4230_vm8, %vm4229_vm14  ;;  %3114 = vbcast.lane.b32.xlu0 %v12554_v2, 288 }
 0x654   : > { %8956 = vmatprep.subr.msk.bf16.mxu0 %vm8955_vm15, %v10767_v19  ;;  %v2859_v8 = vpop.permute.xlu1 %2858 }
 0x655   : > { %vm4214_vm1 = vcmp.gt.f32.partialorder %v2859_v8, %v12522_v13  ;;  %v2855_v26 = vpop.permute.xlu0 %2854  ;;  %v815_v8 = vld [vmem:[#allocation11 + $0x2a0] sm:$0xff] }
 0x656   : > { %vm4213_vm2 = vcmp.gt.f32.partialorder %v2855_v26, %v12522_v13  ;;  %3059 = vbcast.lane.b32.xlu1 %v12527_v1, 312 }
 0x657   : > { %vm8958_vm3 = vmpackc.low %vm4214_vm1, %vm4213_vm2  ;;  %3055 = vbcast.lane.b32.xlu0 %v12527_v1, 304 }
 0x658   : > { %8959 = vmatpush3.bf16.msk.msra.mxu0 %vm8958_vm3, %v10767_v19  ;;  %v2800_v18 = vpop.permute.xlu1 %2799 }
 0x659   : > { %vm4200_vm4 = vcmp.gt.f32.partialorder %v2800_v18, %v12495_v21  ;;  %v2796_v23 = vpop.permute.xlu0 %2795 }
 0x65a   : > { %vm4199_vm5 = vcmp.gt.f32.partialorder %v2796_v23, %v12495_v21  ;;  %2992 = vbcast.lane.b32.xlu1 %v12536_v24, 312 }
 0x65b   : > { %vm8913_vm6 = vmpackc.low %vm4200_vm4, %vm4199_vm5  ;;  %2988 = vbcast.lane.b32.xlu0 %v12536_v24, 304 }
 0x65c   : > { %8914 = vmatprep.subr.msk.bf16.mxu1 %vm8913_vm6, %v10785_v31  ;;  %v2733_v17 = vpop.permute.xlu1 %2732 }
 0x65d   : > { %vm4184_vm7 = vcmp.gt.f32.partialorder %v2733_v17, %v12503_v9  ;;  %v2729_v12 = vpop.permute.xlu0 %2728  ;;  %v785_v17 = vld [vmem:[#allocation11 + $0x1b0] sm:$0xff] }
 0x65e   : > { %vm4183_vm9 = vcmp.gt.f32.partialorder %v2729_v12, %v12503_v9  ;;  %3193 = vbcast.lane.b32.xlu1 %v12545_v53, 312 }
 0x65f   : > { %vm8916_vm10 = vmpackc.low %vm4184_vm7, %vm4183_vm9  ;;  %3189 = vbcast.lane.b32.xlu0 %v12545_v53, 304 }
 0x660   : > { %8917 = vmatpush3.bf16.msk.msra.mxu1 %vm8916_vm10, %v10785_v31  ;;  %v2934_v63 = vpop.permute.xlu1 %2933 }
 0x661   : > { %vm4232_vm11 = vcmp.gt.f32.partialorder %v2934_v63, %v12511_v44  ;;  %v2930_v33 = vpop.permute.xlu0 %2929  ;;  %v818_v63 = vld [vmem:[#allocation11 + $0x2b8] sm:$0xff] }
 0x662   : > { %vm4231_vm12 = vcmp.gt.f32.partialorder %v2930_v33, %v12511_v44  ;;  %3126 = vbcast.lane.b32.xlu1 %v12554_v2, 312  ;;  %v847_v33 = vld [vmem:[#allocation11 + $0x3a0] sm:$0xff] }
 0x663   : > { %vm8961_vm13 = vmpackc.low %vm4232_vm11, %vm4231_vm12  ;;  %3122 = vbcast.lane.b32.xlu0 %v12554_v2, 304 }
 0x664   : > { %8962 = vmatprep.subr.msk.bf16.mxu0 %vm8961_vm13, %v10785_v31  ;;  %v2867_v38 = vpop.permute.xlu1 %2866 }
 0x665   : > { %vm4216_vm8 = vcmp.gt.f32.partialorder %v2867_v38, %v12522_v13  ;;  %v2863_v32 = vpop.permute.xlu0 %2862 }
 0x666   : > { %vm4215_vm14 = vcmp.gt.f32.partialorder %v2863_v32, %v12522_v13  ;;  %3067 = vbcast.lane.b32.xlu1 %v12527_v1, 328  ;;  %v756_v32 = vld [vmem:[#allocation11 + $0xc8] sm:$0xff] }
 0x667   : > { %vm8964_vm15 = vmpackc.low %vm4216_vm8, %vm4215_vm14  ;;  %3063 = vbcast.lane.b32.xlu0 %v12527_v1, 320 }
 0x668   : > { %8965 = vmatpush3.bf16.msk.msra.mxu0 %vm8964_vm15, %v10785_v31  ;;  %v2808_v47 = vpop.permute.xlu1 %2807 }
 0x669   : > { %vm4202_vm1 = vcmp.gt.f32.partialorder %v2808_v47, %v12495_v21  ;;  %v2804_v60 = vpop.permute.xlu0 %2803 }
 0x66a   : > { %vm4201_vm2 = vcmp.gt.f32.partialorder %v2804_v60, %v12495_v21  ;;  %3000 = vbcast.lane.b32.xlu1 %v12536_v24, 328  ;;  %v817_v60 = vld [vmem:[#allocation11 + $0x2b0] sm:$0xff] }
 0x66b   : > { %vm8919_vm3 = vmpackc.low %vm4202_vm1, %vm4201_vm2  ;;  %2996 = vbcast.lane.b32.xlu0 %v12536_v24, 320 }
 0x66c   : > { %8920 = vmatprep.subr.msk.bf16.mxu1 %vm8919_vm3, %v10803_v42  ;;  %v2741_v52 = vpop.permute.xlu1 %2740 }
 0x66d   : > { %vm4186_vm4 = vcmp.gt.f32.partialorder %v2741_v52, %v12503_v9  ;;  %v2737_v35 = vpop.permute.xlu0 %2736 }
 0x66e   : > { %vm4185_vm5 = vcmp.gt.f32.partialorder %v2737_v35, %v12503_v9  ;;  %3201 = vbcast.lane.b32.xlu1 %v12545_v53, 328  ;;  %v850_v35 = vld [vmem:[#allocation11 + $0x3b8] sm:$0xff] }
 0x66f   : > { %vm8922_vm6 = vmpackc.low %vm4186_vm4, %vm4185_vm5  ;;  %3197 = vbcast.lane.b32.xlu0 %v12545_v53, 320 }
 0x670   : > { %8923 = vmatpush3.bf16.msk.msra.mxu1 %vm8922_vm6, %v10803_v42  ;;  %v2942_v41 = vpop.permute.xlu1 %2941 }
 0x671   : > { %vm4234_vm7 = vcmp.gt.f32.partialorder %v2942_v41, %v12511_v44  ;;  %v2938_v48 = vpop.permute.xlu0 %2937 }
 0x672   : > { %vm4233_vm9 = vcmp.gt.f32.partialorder %v2938_v48, %v12511_v44  ;;  %3134 = vbcast.lane.b32.xlu1 %v12554_v2, 328 }
 0x673   : > { %vm8967_vm10 = vmpackc.low %vm4234_vm7, %vm4233_vm9  ;;  %3130 = vbcast.lane.b32.xlu0 %v12554_v2, 320 }
 0x674   : > { %8968 = vmatprep.subr.msk.bf16.mxu0 %vm8967_vm10, %v10803_v42  ;;  %v2875_v16 = vpop.permute.xlu1 %2874 }
 0x675   : > { %vm4218_vm11 = vcmp.gt.f32.partialorder %v2875_v16, %v12522_v13  ;;  %v2871_v61 = vpop.permute.xlu0 %2870  ;;  %v849_v16 = vld [vmem:[#allocation11 + $0x3b0] sm:$0xff] }
 0x676   : > { %vm4217_vm12 = vcmp.gt.f32.partialorder %v2871_v61, %v12522_v13  ;;  %3075 = vbcast.lane.b32.xlu1 %v12527_v1, 344 }
 0x677   : > { %vm8970_vm13 = vmpackc.low %vm4218_vm11, %vm4217_vm12  ;;  %3071 = vbcast.lane.b32.xlu0 %v12527_v1, 336 }
 0x678   : > { %8971 = vmatpush3.bf16.msk.msra.mxu0 %vm8970_vm13, %v10803_v42  ;;  %v2816_v57 = vpop.permute.xlu1 %2815 }
 0x679   : > { %vm4204_vm8 = vcmp.gt.f32.partialorder %v2816_v57, %v12495_v21  ;;  %v2812_v55 = vpop.permute.xlu0 %2811  ;;  %v758_v57 = vld [vmem:[#allocation11 + $0xd8] sm:$0xff] }
 0x67a   : > { %vm4203_vm14 = vcmp.gt.f32.partialorder %v2812_v55, %v12495_v21  ;;  %3008 = vbcast.lane.b32.xlu1 %v12536_v24, 344 }
 0x67b   : > { %vm8925_vm15 = vmpackc.low %vm4204_vm8, %vm4203_vm14  ;;  %3004 = vbcast.lane.b32.xlu0 %v12536_v24, 336 }
 0x67c   : > { %8926 = vmatprep.subr.msk.bf16.mxu1 %vm8925_vm15, %v10821_v50  ;;  %v2749_v56 = vpop.permute.xlu1 %2748 }
 0x67d   : > { %vm4188_vm1 = vcmp.gt.f32.partialorder %v2749_v56, %v12503_v9  ;;  %v2745_v58 = vpop.permute.xlu0 %2744 }
 0x67e   : > { %vm4187_vm2 = vcmp.gt.f32.partialorder %v2745_v58, %v12503_v9  ;;  %3209 = vbcast.lane.b32.xlu1 %v12545_v53, 344  ;;  %v13663_v58 = vld [vmem:[#allocation28_spill] sm:$0xff] }
 0x67f   : > { %vm8928_vm3 = vmpackc.low %vm4188_vm1, %vm4187_vm2  ;;  %3205 = vbcast.lane.b32.xlu0 %v12545_v53, 336 }
 0x680   : > { %8929 = vmatpush3.bf16.msk.msra.mxu1 %vm8928_vm3, %v10821_v50  ;;  %v2950_v62 = vpop.permute.xlu1 %2949 }
 0x681   : > { %vm4236_vm4 = vcmp.gt.f32.partialorder %v2950_v62, %v12511_v44  ;;  %v2946_v46 = vpop.permute.xlu0 %2945  ;;  %v12737_v62 = vrot.slane %v12515_v11, %v13663_v58  ;;  %v896_v58 = vld [vmem:[#allocation14 + $0x20] sm:$0xff] }
 0x682   : > { %vm4235_vm5 = vcmp.gt.f32.partialorder %v2946_v46, %v12511_v44  ;;  %3142 = vbcast.lane.b32.xlu1 %v12554_v2, 344 }
 0x683   : > { %vm8973_vm6 = vmpackc.low %vm4236_vm4, %vm4235_vm5  ;;  %3138 = vbcast.lane.b32.xlu0 %v12554_v2, 336 }
 0x684   : > { %8974 = vmatprep.subr.msk.bf16.mxu0 %vm8973_vm6, %v10821_v50  ;;  %v2883_v0 = vpop.permute.xlu1 %2882 }
 0x685   : > { %vm4220_vm7 = vcmp.gt.f32.partialorder %v2883_v0, %v12522_v13  ;;  %v2879_v30 = vpop.permute.xlu0 %2878 }
 0x686   : > { %vm4219_vm9 = vcmp.gt.f32.partialorder %v2879_v30, %v12522_v13  ;;  %3083 = vbcast.lane.b32.xlu1 %v12527_v1, 360  ;;  %v13664_v30 = vld [vmem:[#allocation29_spill] sm:$0xff] }
 0x687   : > { %vm8976_vm10 = vmpackc.low %vm4220_vm7, %vm4219_vm9  ;;  %3079 = vbcast.lane.b32.xlu0 %v12527_v1, 352 }
 0x688   : > { %8977 = vmatpush3.bf16.msk.msra.mxu0 %vm8976_vm10, %v10821_v50  ;;  %v2824_v43 = vpop.permute.xlu1 %2823 }
 0x689   : > { %vm4206_vm11 = vcmp.gt.f32.partialorder %v2824_v43, %v12495_v21  ;;  %v2820_v22 = vpop.permute.xlu0 %2819  ;;  %v12746_v43 = vrot.slane %v12515_v11, %v13664_v30 }
 0x68a   : > { %vm4205_vm12 = vcmp.gt.f32.partialorder %v2820_v22, %v12495_v21  ;;  %3016 = vbcast.lane.b32.xlu1 %v12536_v24, 360 }
 0x68b   : > { %vm8931_vm13 = vmpackc.low %vm4206_vm11, %vm4205_vm12  ;;  %3012 = vbcast.lane.b32.xlu0 %v12536_v24, 352 }
 0x68c   : > { %8932 = vmatprep.subr.msk.bf16.mxu1 %vm8931_vm13, %v10839_v39  ;;  %v2757_v34 = vpop.permute.xlu1 %2756 }
 0x68d   : > { %vm4190_vm8 = vcmp.gt.f32.partialorder %v2757_v34, %v12503_v9  ;;  %v2753_v15 = vpop.permute.xlu0 %2752 }
 0x68e   : > { %vm4189_vm14 = vcmp.gt.f32.partialorder %v2753_v15, %v12503_v9  ;;  %3217 = vbcast.lane.b32.xlu1 %v12545_v53, 360  ;;  %v3683_v9 = vrot.slane %v3661_v59, %v10651_v3 }
 0x68f   : > { %vm8934_vm15 = vmpackc.low %vm4190_vm8, %vm4189_vm14  ;;  %3213 = vbcast.lane.b32.xlu0 %v12545_v53, 352 }
 0x690   : > { %8935 = vmatpush3.bf16.msk.msra.mxu1 %vm8934_vm15, %v10839_v39  ;;  %v2958_v21 = vpop.permute.xlu1 %2957  ;;  %v12690_v40 = vrot.slane %v3683_v9, %v10217_v28  ;;  %v3693_v26 = vcombine.high %v3683_v9, %v3683_v9 }
 0x691   : > { %vm4238_vm1 = vcmp.gt.f32.partialorder %v2958_v21, %v12511_v44  ;;  %v2954_v5 = vpop.permute.xlu0 %2953 }
 0x692   : > { %vm4237_vm2 = vcmp.gt.f32.partialorder %v2954_v5, %v12511_v44  ;;  %3150 = vbcast.lane.b32.xlu1 %v12554_v2, 360  ;;  %v3669_v44 = vrot.slane %v3653_v36, %v10651_v3 }
 0x693   : > { %vm8979_vm3 = vmpackc.low %vm4238_vm1, %vm4237_vm2  ;;  %3146 = vbcast.lane.b32.xlu0 %v12554_v2, 352  ;;  %5794 = vmatmul.mubr.f32.vlgmr.msra.gmra.mrb[40].mxu1 %v751_v10 }
 0x694   : > { %8980 = vmatprep.subr.msk.bf16.mxu0 %vm8979_vm3, %v10839_v39  ;;  %v2891_v14 = vpop.permute.xlu1 %2890  ;;  %5798 = vmatprep.mubr.f32.mxu1 %v784_v7  ;;  %v12698_v18 = vrot.slane %v3669_v44, %v10217_v28  ;;  %v3691_v38 = vcombine.high %v3669_v44, %v3669_v44 }
 0x695   : > { %vm4222_vm4 = vcmp.gt.f32.partialorder %v2891_v14, %v12522_v13  ;;  %v2887_v29 = vpop.permute.xlu0 %2886 }
 0x696   : > { %vm4221_vm5 = vcmp.gt.f32.partialorder %v2887_v29, %v12522_v13  ;;  %3091 = vbcast.lane.b32.xlu1 %v12527_v1, 376  ;;  %v786_v13 = vld [vmem:[#allocation11 + $0x1b8] sm:$0xff]  ;;  %v12714_v41 = vrot.slane %v3691_v38, %v10217_v28 }
 0x697   : > { %vm8982_vm6 = vmpackc.low %vm4222_vm4, %vm4221_vm5  ;;  %3087 = vbcast.lane.b32.xlu0 %v12527_v1, 368  ;;  %5799 = vmatmul.mubr.f32.gmra.mrb[42].mxu1 %v783_v37  ;;  %v848_v1 = vld [vmem:[#allocation11 + $0x3a8] sm:$0xff] }
 0x698   : > { %8983 = vmatpush3.bf16.msk.msra.mxu0 %vm8982_vm6, %v10839_v39  ;;  %v3036_v27 = vpop.permute.xlu1 %3035  ;;  %5803 = vmatprep.mubr.f32.mxu1 %v816_v45 }
 0x699   : > { %vm4256_vm7 = vcmp.gt.f32.partialorder %v3036_v27, %v12690_v40  ;;  %v3032_v49 = vpop.permute.xlu0 %3031 }
 0x69a   : > { %vm4255_vm9 = vcmp.gt.f32.partialorder %v3032_v49, %v12690_v40  ;;  %3024 = vbcast.lane.b32.xlu1 %v12536_v24, 376 }
 0x69b   : > { %vm8985_vm10 = vmpackc.low %vm4256_vm7, %vm4255_vm9  ;;  %3020 = vbcast.lane.b32.xlu0 %v12536_v24, 368  ;;  %5879 = vmatmul.mubr.f32.vlgmr.msra.gmra.mrb[56].mxu0 %v753_v25  ;;  %v12706_v24 = vrot.slane %v3693_v26, %v10217_v28  ;;  %v8172_v25 = vpop.f32.mrb[4].mxu0  ;;  %v12793_v26 = vld [vmem:[%s13665_s11] ss:$0 sm:$0xff]  ;;  %s13162_s11 = scalar_lea.hbm %s13671_s19, %s7289_s17 }
 0x69c   : > { %8986 = vmatprep.subr.msk.bf16.mxu1 %vm8985_vm10, %v10695_v20  ;;  %v2969_v23 = vpop.permute.xlu1 %2968  ;;  %5883 = vmatprep.mubr.f32.mxu0 %v786_v13  ;;  %v1211_v13 = vpop.f32.mrb[5].mxu0 }
 0x69d   : > { %vm4240_vm11 = vcmp.gt.f32.partialorder %v2969_v23, %v12698_v18  ;;  %v2965_v12 = vpop.permute.xlu0 %2964  ;;  %5804 = vmatmul.mubr.f32.gmra.mrb[44].mxu1 %v815_v8 }
 0x69e   : > { %vm4239_vm12 = vcmp.gt.f32.partialorder %v2965_v12, %v12698_v18  ;;  %3225 = vbcast.lane.b32.xlu1 %v12545_v53, 376  ;;  %5808 = vmatprep.mubr.f32.mxu1 %v848_v1  ;;  %v12795_v1 = vpop.f32.mrb[6].mxu0 }
 0x69f   : > { %vm8988_vm13 = vmpackc.low %vm4240_vm11, %vm4239_vm12  ;;  %3221 = vbcast.lane.b32.xlu0 %v12545_v53, 368  ;;  %5884 = vmatmul.mubr.f32.gmra.mrb[58].mxu0 %v785_v17  ;;  %v12719_v53 = vrot.slane %v12515_v11, %v13510_v4  ;;  %v12799_v23 = vpop.f32.mrb[7].mxu0 }
 0x6a0   : > { %8989 = vmatpush3.bf16.msk.msra.mxu1 %vm8988_vm13, %v10695_v20  ;;  %v3170_v47 = vpop.permute.xlu1 %3169  ;;  %5888 = vmatprep.mubr.f32.mxu0 %v818_v63  ;;  %v7378_v17 = vpop.f32.mrb[8].mxu0  ;;  %v1217_v63 = vadd.f32 %v8172_v25, %v12793_v26 }
 0x6a1   : > { %vm4288_vm8 = vcmp.gt.f32.partialorder %v3170_v47, %v12706_v24  ;;  %v3166_v52 = vpop.permute.xlu0 %3165  ;;  %5809 = vmatmul.mubr.f32.gmra.mrb[46].mxu1 %v847_v33  ;;  %v1212_v33 = vadd.f32 %v12793_v26, %v1211_v13  ;;  %v7379_v38 = vpop.f32.mrb[9].mxu0 }
 0x6a2   : > { %vm4287_vm14 = vcmp.gt.f32.partialorder %v3166_v52, %v12706_v24  ;;  %3158 = vbcast.lane.b32.xlu1 %v12554_v2, 376  ;;  %5963 = vmatprep.mubr.f32.mxu1 %v756_v32  ;;  %v7380_v47 = vadd.f32 %v7379_v38, %v7378_v17 }
 0x6a3   : > { %vm9033_vm15 = vmpackc.low %vm4288_vm8, %vm4287_vm14  ;;  %3154 = vbcast.lane.b32.xlu0 %v12554_v2, 368  ;;  %5889 = vmatmul.mubr.f32.gmra.mrb[60].mxu0 %v817_v60  ;;  %v13662_v2 = vld [vmem:[#allocation27_spill] sm:$0xff]  ;;  %v7381_v60 = vpop.f32.mrb[10].mxu0 }
 0x6a4   : > { %9034 = vmatprep.subr.msk.bf16.mxu0 %vm9033_vm15, %v10695_v20  ;;  %v3103_v48 = vpop.permute.xlu1 %3102  ;;  %5893 = vmatprep.mubr.f32.mxu0 %v850_v35  ;;  %v12728_v4 = vrot.slane %v12515_v11, %v13662_v2  ;;  %v7382_v52 = vpop.f32.mrb[11].mxu0 }
 0x6a5   : > { %vm4272_vm1 = vcmp.gt.f32.partialorder %v3103_v48, %v12714_v41  ;;  %v3099_v61 = vpop.permute.xlu0 %3098  ;;  %v7383_v35 = vadd.f32 %v7382_v52, %v7381_v60  ;;  %v7384_v48 = vpop.f32.mrb[12].mxu0 }
 0x6a6   : > { %vm4271_vm2 = vcmp.gt.f32.partialorder %v3099_v61, %v12714_v41  ;;  %3303 = vbcast.lane.b32.xlu1 %v12719_v53, 264  ;;  %v893_v61 = vld [vmem:[#allocation14 + $0x8] sm:$0xff]  ;;  %v7385_v2 = vpop.f32.mrb[13].mxu0  ;;  %v7466_v52 = vpop.f32.mrb[8].mxu1 }
 0x6a7   : > { %vm9036_vm3 = vmpackc.low %vm4272_vm1, %vm4271_vm2  ;;  %3299 = vbcast.lane.b32.xlu0 %v12719_v53, 256  ;;  %5894 = vmatmul.mubr.f32.gmra.mrb[62].mxu0 %v849_v16  ;;  %v892_v16 = vld [vmem:[#allocation14] sm:$0xff] }
 0x6a8   : > { %9037 = vmatpush3.bf16.msk.msra.mxu0 %vm9036_vm3, %v10695_v20  ;;  %v3044_v55 = vpop.permute.xlu1 %3043  ;;  %6048 = vmatprep.mubr.f32.mxu0 %v758_v57 }
 0x6a9   : > { %vm4258_vm4 = vcmp.gt.f32.partialorder %v3044_v55, %v12690_v40  ;;  %v3040_v56 = vpop.permute.xlu0 %3039  ;;  %v1246_v55 = vmul.f32 %v1212_v33, %v892_v16 }
 0x6aa   : > { %vm4257_vm5 = vcmp.gt.f32.partialorder %v3040_v56, %v12690_v40  ;;  %3236 = vbcast.lane.b32.xlu1 %v12728_v4, 264  ;;  %v1247_v56 = vmul.f32 %v1217_v63, %v893_v61 }
 0x6ab   : > { %vm8991_vm6 = vmpackc.low %vm4258_vm4, %vm4257_vm5  ;;  %3232 = vbcast.lane.b32.xlu0 %v12728_v4, 256 }
 0x6ac   : > { %8992 = vmatprep.subr.msk.bf16.mxu1 %vm8991_vm6, %v10712_v51  ;;  %v2977_v46 = vpop.permute.xlu1 %2976 }
 0x6ad   : > { %vm4242_vm7 = vcmp.gt.f32.partialorder %v2977_v46, %v12698_v18  ;;  %v2973_v0 = vpop.permute.xlu0 %2972  ;;  %v897_v46 = vld [vmem:[#allocation14 + $0x28] sm:$0xff] }
 0x6ae   : > { %vm4241_vm9 = vcmp.gt.f32.partialorder %v2973_v0, %v12698_v18  ;;  %3437 = vbcast.lane.b32.xlu1 %v12737_v62, 264  ;;  %v900_v0 = vld [vmem:[#allocation14 + $0x40] sm:$0xff] }
 0x6af   : > { %vm8994_vm10 = vmpackc.low %vm4242_vm7, %vm4241_vm9  ;;  %3433 = vbcast.lane.b32.xlu0 %v12737_v62, 256 }
 0x6b0   : > { %8995 = vmatpush3.bf16.msk.msra.mxu1 %vm8994_vm10, %v10712_v51  ;;  %v3178_v22 = vpop.permute.xlu1 %3177 }
 0x6b1   : > { %vm4290_vm11 = vcmp.gt.f32.partialorder %v3178_v22, %v12706_v24  ;;  %v3174_v36 = vpop.permute.xlu0 %3173  ;;  %v7386_v22 = vadd.f32 %v7385_v2, %v7384_v48 }
 0x6b2   : > { %vm4289_vm12 = vcmp.gt.f32.partialorder %v3174_v36, %v12706_v24  ;;  %3370 = vbcast.lane.b32.xlu1 %v12746_v43, 264  ;;  %v7387_v36 = vpop.f32.mrb[14].mxu0 }
 0x6b3   : > { %vm9039_vm13 = vmpackc.low %vm4290_vm11, %vm4289_vm12  ;;  %3366 = vbcast.lane.b32.xlu0 %v12746_v43, 256 }
 0x6b4   : > { %9040 = vmatprep.subr.msk.bf16.mxu0 %vm9039_vm13, %v10712_v51  ;;  %v3111_v34 = vpop.permute.xlu1 %3110 }
 0x6b5   : > { %vm4274_vm8 = vcmp.gt.f32.partialorder %v3111_v34, %v12714_v41  ;;  %v3107_v15 = vpop.permute.xlu0 %3106  ;;  %v1250_v34 = vmul.f32 %v1212_v33, %v896_v58  ;;  %v7467_v58 = vpop.f32.mrb[9].mxu1 }
 0x6b6   : > { %vm4273_vm14 = vcmp.gt.f32.partialorder %v3107_v15, %v12714_v41  ;;  %3311 = vbcast.lane.b32.xlu1 %v12719_v53, 280  ;;  %v1251_v15 = vmul.f32 %v1217_v63, %v897_v46 }
 0x6b7   : > { %vm9042_vm15 = vmpackc.low %vm4274_vm8, %vm4273_vm14  ;;  %3307 = vbcast.lane.b32.xlu0 %v12719_v53, 272 }
 0x6b8   : > { %9043 = vmatpush3.bf16.msk.msra.mxu0 %vm9042_vm15, %v10712_v51  ;;  %v3052_v59 = vpop.permute.xlu1 %3051 }
 0x6b9   : > { %vm4260_vm1 = vcmp.gt.f32.partialorder %v3052_v59, %v12690_v40  ;;  %v3048_v21 = vpop.permute.xlu0 %3047  ;;  %v901_v59 = vld [vmem:[#allocation14 + $0x48] sm:$0xff] }
 0x6ba   : > { %vm4259_vm2 = vcmp.gt.f32.partialorder %v3048_v21, %v12690_v40  ;;  %3244 = vbcast.lane.b32.xlu1 %v12728_v4, 280  ;;  %v904_v21 = vld [vmem:[#allocation14 + $0x60] sm:$0xff] }
 0x6bb   : > { %vm8997_vm3 = vmpackc.low %vm4260_vm1, %vm4259_vm2  ;;  %3240 = vbcast.lane.b32.xlu0 %v12728_v4, 272 }
 0x6bc   : > { %8998 = vmatprep.subr.msk.bf16.mxu1 %vm8997_vm3, %v10741_v54  ;;  %v2985_v10 = vpop.permute.xlu1 %2984 }
 0x6bd   : > { %vm4244_vm4 = vcmp.gt.f32.partialorder %v2985_v10, %v12698_v18  ;;  %v2981_v5 = vpop.permute.xlu0 %2980  ;;  %v905_v10 = vld [vmem:[#allocation14 + $0x68] sm:$0xff] }
 0x6be   : > { %vm4243_vm5 = vcmp.gt.f32.partialorder %v2981_v5, %v12698_v18  ;;  %3445 = vbcast.lane.b32.xlu1 %v12737_v62, 280  ;;  %v7388_v5 = vpop.f32.mrb[15].mxu0 }
 0x6bf   : > { %vm9000_vm6 = vmpackc.low %vm4244_vm4, %vm4243_vm5  ;;  %3441 = vbcast.lane.b32.xlu0 %v12737_v62, 272 }
 0x6c0   : > { %9001 = vmatpush3.bf16.msk.msra.mxu1 %vm9000_vm6, %v10741_v54  ;;  %v3186_v7 = vpop.permute.xlu1 %3185 }
 0x6c1   : > { %vm4292_vm7 = vcmp.gt.f32.partialorder %v3186_v7, %v12706_v24  ;;  %v3182_v9 = vpop.permute.xlu0 %3181  ;;  %v12813_v7 = vpack.c.bf16 %v1247_v56, %v1246_v55 }
 0x6c2   : > { %vm4291_vm9 = vcmp.gt.f32.partialorder %v3182_v9, %v12706_v24  ;;  %3378 = vbcast.lane.b32.xlu1 %v12746_v43, 280  ;;  %v1254_v9 = vmul.f32 %v1212_v33, %v900_v0  ;;  %v7468_v0 = vadd.f32 %v7467_v58, %v7466_v52 }
 0x6c3   : > { %vm9045_vm10 = vmpackc.low %vm4292_vm7, %vm4291_vm9  ;;  %3374 = vbcast.lane.b32.xlu0 %v12746_v43, 272 }
 0x6c4   : > { %9046 = vmatprep.subr.msk.bf16.mxu0 %vm9045_vm10, %v10741_v54  ;;  %v3119_v14 = vpop.permute.xlu1 %3118 }
 0x6c5   : > { %vm4276_vm11 = vcmp.gt.f32.partialorder %v3119_v14, %v12714_v41  ;;  %v3115_v37 = vpop.permute.xlu0 %3114  ;;  %v1255_v14 = vmul.f32 %v1217_v63, %v901_v59 }
 0x6c6   : > { %vm4275_vm12 = vcmp.gt.f32.partialorder %v3115_v37, %v12714_v41  ;;  %3319 = vbcast.lane.b32.xlu1 %v12719_v53, 296  ;;  %v7389_v37 = vadd.f32 %v7388_v5, %v7387_v36 }
 0x6c7   : > { %vm9048_vm13 = vmpackc.low %vm4276_vm11, %vm4275_vm12  ;;  %3315 = vbcast.lane.b32.xlu0 %v12719_v53, 288  ;;  %v12821_v13 = vpack.c.bf16 %v1255_v14, %v1254_v9 }
 0x6c8   : > { %9049 = vmatpush3.bf16.msk.msra.mxu0 %vm9048_vm13, %v10741_v54  ;;  %v3060_v29 = vpop.permute.xlu1 %3059 }
 0x6c9   : > { %vm4262_vm8 = vcmp.gt.f32.partialorder %v3060_v29, %v12690_v40  ;;  %v3056_v45 = vpop.permute.xlu0 %3055  ;;  %v7422_v29 = vpop.f32.mrb[16].mxu0 }
 0x6ca   : > { %vm4261_vm14 = vcmp.gt.f32.partialorder %v3056_v45, %v12690_v40  ;;  %3252 = vbcast.lane.b32.xlu1 %v12728_v4, 296  ;;  %v12818_v45 = vpack.c.bf16 %v1251_v15, %v1250_v34 }
 0x6cb   : > { %vm9003_vm15 = vmpackc.low %vm4262_vm8, %vm4261_vm14  ;;  %3248 = vbcast.lane.b32.xlu0 %v12728_v4, 288 }
 0x6cc   : > { %9004 = vmatprep.subr.msk.bf16.mxu1 %vm9003_vm15, %v10767_v19  ;;  %v2993_v44 = vpop.permute.xlu1 %2992 }
 0x6cd   : > { %vm4246_vm1 = vcmp.gt.f32.partialorder %v2993_v44, %v12698_v18  ;;  %v2989_v27 = vpop.permute.xlu0 %2988  ;;  %v1258_v44 = vmul.f32 %v1212_v33, %v904_v21 }
 0x6ce   : > { %vm4245_vm2 = vcmp.gt.f32.partialorder %v2989_v27, %v12698_v18  ;;  %3453 = vbcast.lane.b32.xlu1 %v12737_v62, 296  ;;  %v1259_v27 = vmul.f32 %v1217_v63, %v905_v10 }
 0x6cf   : > { %vm9006_vm3 = vmpackc.low %vm4246_vm1, %vm4245_vm2  ;;  %3449 = vbcast.lane.b32.xlu0 %v12737_v62, 288 }
 0x6d0   : > { %9007 = vmatpush3.bf16.msk.msra.mxu1 %vm9006_vm3, %v10767_v19  ;;  %v3194_v49 = vpop.permute.xlu1 %3193  ;;  %v12824_v38 = vpack.c.bf16 %v1259_v27, %v1258_v44 }
 0x6d1   : > { %vm4294_vm4 = vcmp.gt.f32.partialorder %v3194_v49, %v12706_v24  ;;  %v3190_v8 = vpop.permute.xlu0 %3189  ;;  %v7423_v49 = vpop.f32.mrb[17].mxu0 }
 0x6d2   : > { %vm4293_vm5 = vcmp.gt.f32.partialorder %v3190_v8, %v12706_v24  ;;  %3386 = vbcast.lane.b32.xlu1 %v12746_v43, 296  ;;  %v7424_v17 = vadd.f32 %v7423_v49, %v7422_v29 }
 0x6d3   : > { %vm9051_vm6 = vmpackc.low %vm4294_vm4, %vm4293_vm5  ;;  %3382 = vbcast.lane.b32.xlu0 %v12746_v43, 288 }
 0x6d4   : > { %9052 = vmatprep.subr.msk.bf16.mxu0 %vm9051_vm6, %v10767_v19  ;;  %v3127_v12 = vpop.permute.xlu1 %3126  ;;  %v5031_v63 = vadd.f32 %v7424_v17, %v7380_v47 }
 0x6d5   : > { %vm4278_vm7 = vcmp.gt.f32.partialorder %v3127_v12, %v12714_v41  ;;  %v3123_v32 = vpop.permute.xlu0 %3122  ;;  %v7425_v12 = vpop.f32.mrb[18].mxu0 }
 0x6d6   : > { %vm4277_vm9 = vcmp.gt.f32.partialorder %v3123_v32, %v12714_v41  ;;  %3327 = vbcast.lane.b32.xlu1 %v12719_v53, 312  ;;  %v7426_v32 = vpop.f32.mrb[19].mxu0  ;;  %v5116_v21 = vadd.f32 %v7468_v0, %v5031_v63 }
 0x6d7   : > { %vm9054_vm10 = vmpackc.low %vm4278_vm7, %vm4277_vm9  ;;  %3323 = vbcast.lane.b32.xlu0 %v12719_v53, 304  ;;  %v7427_v33 = vadd.f32 %v7426_v32, %v7425_v12  ;;  %v7428_v60 = vpop.f32.mrb[20].mxu0 }
 0x6d8   : > { %9055 = vmatpush3.bf16.msk.msra.mxu0 %vm9054_vm10, %v10767_v19  ;;  %v3068_v57 = vpop.permute.xlu1 %3067  ;;  %v7429_v16 = vpop.f32.mrb[21].mxu0 }
 0x6d9   : > { %vm4264_vm11 = vcmp.gt.f32.partialorder %v3068_v57, %v12690_v40  ;;  %v3064_v30 = vpop.permute.xlu0 %3063  ;;  %v5036_v57 = vadd.f32 %v7427_v33, %v7383_v35  ;;  %v7430_v2 = vadd.f32 %v7429_v16, %v7428_v60  ;;  %v7431_v55 = vpop.f32.mrb[22].mxu0 }
 0x6da   : > { %vm4263_vm12 = vcmp.gt.f32.partialorder %v3064_v30, %v12690_v40  ;;  %3260 = vbcast.lane.b32.xlu1 %v12728_v4, 312  ;;  %v7432_v56 = vpop.f32.mrb[23].mxu0  ;;  %v7469_v30 = vpop.f32.mrb[10].mxu1 }
 0x6db   : > { %vm9009_vm13 = vmpackc.low %vm4264_vm11, %vm4263_vm12  ;;  %3256 = vbcast.lane.b32.xlu0 %v12728_v4, 304  ;;  %v5041_v47 = vadd.f32 %v7430_v2, %v7386_v22  ;;  %v7433_v46 = vadd.f32 %v7432_v56, %v7431_v55  ;;  %v7510_v36 = vpop.f32.mrb[24].mxu0  ;;  %v7470_v35 = vpop.f32.mrb[11].mxu1 }
 0x6dc   : > { %9010 = vmatprep.subr.msk.bf16.mxu1 %vm9009_vm13, %v10785_v31  ;;  %v3001_v25 = vpop.permute.xlu1 %3000  ;;  %v7471_v10 = vadd.f32 %v7470_v35, %v7469_v30  ;;  %v7511_v5 = vpop.f32.mrb[25].mxu0  ;;  %v12851_v35 = vadd.f32 %v12795_v1, %v12793_v26 }
 0x6dd   : > { %vm4248_vm8 = vcmp.gt.f32.partialorder %v3001_v25, %v12698_v18  ;;  %v2997_v8 = vpop.permute.xlu0 %2996  ;;  %v5046_v59 = vadd.f32 %v7433_v46, %v7389_v37  ;;  %v7512_v22 = vadd.f32 %v7511_v5, %v7510_v36  ;;  %v7472_v9 = vpop.f32.mrb[12].mxu1  ;;  %v1222_v5 = vadd.f32 %v12793_v26, %v12799_v23 }
 0x6de   : > { %vm4247_vm14 = vcmp.gt.f32.partialorder %v2997_v8, %v12698_v18  ;;  %3461 = vbcast.lane.b32.xlu1 %v12737_v62, 312  ;;  %v7513_v14 = vpop.f32.mrb[26].mxu0  ;;  %v5121_v29 = vadd.f32 %v7471_v10, %v5036_v57  ;;  %v7473_v44 = vpop.f32.mrb[13].mxu1 }
 0x6df   : > { %vm9012_vm15 = vmpackc.low %vm4248_vm8, %vm4247_vm14  ;;  %3457 = vbcast.lane.b32.xlu0 %v12737_v62, 304  ;;  %v7514_v27 = vpop.f32.mrb[27].mxu0  ;;  %v5201_v37 = vadd.f32 %v7512_v22, %v5116_v21  ;;  %v7474_v49 = vadd.f32 %v7473_v44, %v7472_v9  ;;  %v7475_v17 = vpop.f32.mrb[14].mxu1 }
 0x6e0   : > { %9013 = vmatpush3.bf16.msk.msra.mxu1 %vm9012_vm15, %v10785_v31  ;;  %v3202_v48 = vpop.permute.xlu1 %3201  ;;  %v7515_v8 = vadd.f32 %v7514_v27, %v7513_v14  ;;  %v7516_v32 = vpop.f32.mrb[28].mxu0 }
 0x6e1   : > { %vm4296_vm1 = vcmp.gt.f32.partialorder %v3202_v48, %v12706_v24  ;;  %v3198_v61 = vpop.permute.xlu0 %3197  ;;  %v5126_v63 = vadd.f32 %v7474_v49, %v5041_v47  ;;  %v7476_v60 = vpop.f32.mrb[15].mxu1 }
 0x6e2   : > { %vm4295_vm2 = vcmp.gt.f32.partialorder %v3198_v61, %v12706_v24  ;;  %3394 = vbcast.lane.b32.xlu1 %v12746_v43, 312  ;;  %v5206_v33 = vadd.f32 %v7515_v8, %v5121_v29  ;;  %v7517_v52 = vpop.f32.mrb[29].mxu0  ;;  %v7477_v48 = vadd.f32 %v7476_v60, %v7475_v17  ;;  %v7554_v57 = vpop.f32.mrb[16].mxu1 }
 0x6e3   : > { %vm9057_vm3 = vmpackc.low %vm4296_vm1, %vm4295_vm2  ;;  %3390 = vbcast.lane.b32.xlu0 %v12746_v43, 304  ;;  %v7518_v16 = vadd.f32 %v7517_v52, %v7516_v32  ;;  %v7519_v61 = vpop.f32.mrb[30].mxu0  ;;  %v7555_v0 = vpop.f32.mrb[17].mxu1  ;;  %v895_v32 = vld [vmem:[#allocation14 + $0x18] sm:$0xff] }
 0x6e4   : > { %9058 = vmatprep.subr.msk.bf16.mxu0 %vm9057_vm3, %v10785_v31  ;;  %v3135_v34 = vpop.permute.xlu1 %3134  ;;  %v7520_v55 = vpop.f32.mrb[31].mxu0  ;;  %v5131_v58 = vadd.f32 %v7477_v48, %v5046_v59  ;;  %v7556_v30 = vadd.f32 %v7555_v0, %v7554_v57  ;;  %v1249_v48 = vmul.f32 %v12851_v35, %v895_v32  ;;  %v906_v0 = vld [vmem:[#allocation14 + $0x70] sm:$0xff] }
 0x6e5   : > { %vm4280_vm4 = vcmp.gt.f32.partialorder %v3135_v34, %v12714_v41  ;;  %v3131_v15 = vpop.permute.xlu0 %3130  ;;  %v5211_v46 = vadd.f32 %v7518_v16, %v5126_v63  ;;  %v7521_v47 = vadd.f32 %v7520_v55, %v7519_v61  ;;  %v7557_v36 = vpop.f32.mrb[18].mxu1  ;;  %v899_v16 = vld [vmem:[#allocation14 + $0x38] sm:$0xff]  ;;  %v902_v61 = vld [vmem:[#allocation14 + $0x50] sm:$0xff] }
 0x6e6   : > { %vm4279_vm5 = vcmp.gt.f32.partialorder %v3131_v15, %v12714_v41  ;;  %3335 = vbcast.lane.b32.xlu1 %v12719_v53, 328  ;;  %v7598_v34 = vpop.f32.mrb[32].mxu0  ;;  %v7558_v21 = vpop.f32.mrb[19].mxu1  ;;  %v5286_v22 = vadd.f32 %v7556_v30, %v5201_v37 }
 0x6e7   : > { %vm9060_vm6 = vmpackc.low %vm4280_vm4, %vm4279_vm5  ;;  %3331 = vbcast.lane.b32.xlu0 %v12719_v53, 320  ;;  %v5216_v15 = vadd.f32 %v7521_v47, %v5131_v58  ;;  %v7599_v59 = vpop.f32.mrb[33].mxu0  ;;  %v7559_v9 = vadd.f32 %v7558_v21, %v7557_v36  ;;  %v7560_v29 = vpop.f32.mrb[20].mxu1  ;;  %v903_v47 = vld [vmem:[#allocation14 + $0x58] sm:$0xff] }
 0x6e8   : > { %9061 = vmatpush3.bf16.msk.msra.mxu0 %vm9060_vm6, %v10785_v31  ;;  %v3076_v25 = vpop.permute.xlu1 %3075  ;;  %v7600_v14 = vadd.f32 %v7599_v59, %v7598_v34  ;;  %v7601_v27 = vpop.f32.mrb[34].mxu0 }
 0x6e9   : > { %vm4266_vm7 = vcmp.gt.f32.partialorder %v3076_v25, %v12690_v40  ;;  %v3072_v12 = vpop.permute.xlu0 %3071  ;;  %v5291_v1 = vadd.f32 %v7559_v9, %v5206_v33  ;;  %v7561_v49 = vpop.f32.mrb[21].mxu1  ;;  %v898_v33 = vld [vmem:[#allocation14 + $0x30] sm:$0xff] }
 0x6ea   : > { %vm4265_vm9 = vcmp.gt.f32.partialorder %v3072_v12, %v12690_v40  ;;  %3268 = vbcast.lane.b32.xlu1 %v12728_v4, 328  ;;  %v5371_v25 = vadd.f32 %v7600_v14, %v5286_v22  ;;  %v7602_v8 = vpop.f32.mrb[35].mxu0  ;;  %v7562_v26 = vadd.f32 %v7561_v49, %v7560_v29  ;;  %v7563_v37 = vpop.f32.mrb[22].mxu1  ;;  %v894_v12 = vld [vmem:[#allocation14 + $0x10] sm:$0xff]  ;;  %v1252_v59 = vmul.f32 %v1222_v5, %v898_v33 }
 0x6eb   : > { %vm9015_vm10 = vmpackc.low %vm4266_vm7, %vm4265_vm9  ;;  %3264 = vbcast.lane.b32.xlu0 %v12728_v4, 320  ;;  %v7603_v23 = vadd.f32 %v7602_v8, %v7601_v27  ;;  %v7604_v17 = vpop.f32.mrb[36].mxu0  ;;  %v7564_v60 = vpop.f32.mrb[23].mxu1  ;;  %v1248_v52 = vmul.f32 %v1222_v5, %v894_v12  ;;  %v1253_v14 = vmul.f32 %v12851_v35, %v899_v16  ;;  %v1256_v29 = vmul.f32 %v1222_v5, %v902_v61 }
 0x6ec   : > { %9016 = vmatprep.subr.msk.bf16.mxu1 %vm9015_vm10, %v10803_v42  ;;  %v3009_v2 = vpop.permute.xlu1 %3008  ;;  %v7605_v58 = vpop.f32.mrb[37].mxu0 }
 0x6ed   : > { %vm4250_vm11 = vcmp.gt.f32.partialorder %v3009_v2, %v12698_v18  ;;  %v3005_v56 = vpop.permute.xlu0 %3004  ;;  %v5296_v2 = vadd.f32 %v7562_v26, %v5211_v46  ;;  %v5376_v55 = vadd.f32 %v7603_v23, %v5291_v1  ;;  %v7606_v30 = vadd.f32 %v7605_v58, %v7604_v17  ;;  %v7607_v36 = vpop.f32.mrb[38].mxu0 }
 0x6ee   : > { %vm4249_vm12 = vcmp.gt.f32.partialorder %v3005_v56, %v12698_v18  ;;  %3469 = vbcast.lane.b32.xlu1 %v12737_v62, 328  ;;  %v7565_v56 = vadd.f32 %v7564_v60, %v7563_v37  ;;  %v7642_v34 = vpop.f32.mrb[24].mxu1  ;;  %v12865_v21 = vpack.c.bf16 %v1249_v48, %v1248_v52  ;;  %v7608_v22 = vpop.f32.mrb[39].mxu0  ;;  %v1260_v23 = vmul.f32 %v1222_v5, %v906_v0 }
 0x6ef   : > { %vm9018_vm13 = vmpackc.low %vm4250_vm11, %vm4249_vm12  ;;  %3465 = vbcast.lane.b32.xlu0 %v12737_v62, 320  ;;  %v7643_v9 = vpop.f32.mrb[25].mxu1  ;;  %v5381_v1 = vadd.f32 %v7606_v30, %v5296_v2  ;;  %v7609_v49 = vadd.f32 %v7608_v22, %v7607_v36  ;;  %v7686_v17 = vpop.f32.mrb[40].mxu0 }
 0x6f0   : > { %9019 = vmatpush3.bf16.msk.msra.mxu1 %vm9018_vm13, %v10803_v42  ;;  %v3210_v10 = vpop.permute.xlu1 %3209  ;;  %v5301_v46 = vadd.f32 %v7565_v56, %v5216_v15  ;;  %v7644_v8 = vadd.f32 %v7643_v9, %v7642_v34  ;;  %v7645_v26 = vpop.f32.mrb[26].mxu1  ;;  %v12874_v15 = vpack.c.bf16 %v1253_v14, %v1252_v59 }
 0x6f1   : > { %vm4298_vm8 = vcmp.gt.f32.partialorder %v3210_v10, %v12706_v24  ;;  %v3206_v44 = vpop.permute.xlu0 %3205  ;;  %v907_v10 = vld [vmem:[#allocation14 + $0x78] sm:$0xff]  ;;  %v7646_v52 = vpop.f32.mrb[27].mxu1 }
 0x6f2   : > { %vm4297_vm14 = vcmp.gt.f32.partialorder %v3206_v44, %v12706_v24  ;;  %3402 = vbcast.lane.b32.xlu1 %v12746_v43, 328  ;;  %v1257_v44 = vmul.f32 %v12851_v35, %v903_v47  ;;  %v1261_v32 = vmul.f32 %v12851_v35, %v907_v10  ;;  %v5456_v60 = vadd.f32 %v7644_v8, %v5371_v25  ;;  %v7687_v48 = vpop.f32.mrb[41].mxu0  ;;  %v7648_v16 = vpop.f32.mrb[28].mxu1 }
 0x6f3   : > { %vm9063_vm15 = vmpackc.low %vm4298_vm8, %vm4297_vm14  ;;  %3398 = vbcast.lane.b32.xlu0 %v12746_v43, 320  ;;  %v7647_v5 = vadd.f32 %v7646_v52, %v7645_v26  ;;  %v7688_v33 = vadd.f32 %v7687_v48, %v7686_v17  ;;  %v7689_v61 = vpop.f32.mrb[42].mxu0  ;;  %v7649_v2 = vpop.f32.mrb[29].mxu1 }
 0x6f4   : > { %9064 = vmatprep.subr.msk.bf16.mxu0 %vm9063_vm15, %v10803_v42  ;;  %v3143_v63 = vpop.permute.xlu1 %3142  ;;  %v12876_v12 = vpack.c.bf16 %v1257_v44, %v1256_v29  ;;  %v7650_v47 = vadd.f32 %v7649_v2, %v7648_v16  ;;  %v7690_v0 = vpop.f32.mrb[43].mxu0 }
 0x6f5   : > { %vm4282_vm1 = vcmp.gt.f32.partialorder %v3143_v63, %v12714_v41  ;;  %v3139_v57 = vpop.permute.xlu0 %3138  ;;  %v5386_v63 = vadd.f32 %v7609_v49, %v5301_v46  ;;  %v5461_v58 = vadd.f32 %v7647_v5, %v5376_v55  ;;  %v5541_v25 = vadd.f32 %v7688_v33, %v5456_v60  ;;  %v7651_v36 = vpop.f32.mrb[30].mxu1 }
 0x6f6   : > { %vm4281_vm2 = vcmp.gt.f32.partialorder %v3139_v57, %v12714_v41  ;;  %3343 = vbcast.lane.b32.xlu1 %v12719_v53, 344  ;;  %v12882_v57 = vpack.c.bf16 %v1261_v32, %v1260_v23  ;;  %v7691_v30 = vadd.f32 %v7690_v0, %v7689_v61  ;;  %v7692_v34 = vpop.f32.mrb[44].mxu0  ;;  %v5466_v59 = vadd.f32 %v7650_v47, %v5381_v1  ;;  %v7652_v10 = vpop.f32.mrb[31].mxu1 }
 0x6f7   : > { %vm9066_vm3 = vmpackc.low %vm4282_vm1, %vm4281_vm2  ;;  %3339 = vbcast.lane.b32.xlu0 %v12719_v53, 336  ;;  %v7693_v46 = vpop.f32.mrb[45].mxu0  ;;  %v7653_v9 = vadd.f32 %v7652_v10, %v7651_v36 }
 0x6f8   : > { %9067 = vmatpush3.bf16.msk.msra.mxu0 %vm9066_vm3, %v10803_v42  ;;  %v3084_v27 = vpop.permute.xlu1 %3083  ;;  %v5546_v55 = vadd.f32 %v7691_v30, %v5461_v58  ;;  %v7694_v14 = vadd.f32 %v7693_v46, %v7692_v34  ;;  %v7695_v29 = vpop.f32.mrb[46].mxu0 }
 0x6f9   : > { %vm4268_vm4 = vcmp.gt.f32.partialorder %v3084_v27, %v12690_v40  ;;  %v3080_v37 = vpop.permute.xlu0 %3079  ;;  %v7730_v27 = vpop.f32.mrb[32].mxu1  ;;  %v5471_v49 = vadd.f32 %v7653_v9, %v5386_v63 }
 0x6fa   : > { %vm4267_vm5 = vcmp.gt.f32.partialorder %v3080_v37, %v12690_v40  ;;  %3276 = vbcast.lane.b32.xlu1 %v12728_v4, 344  ;;  %v5551_v8 = vadd.f32 %v7694_v14, %v5466_v59  ;;  %v7696_v1 = vpop.f32.mrb[47].mxu0  ;;  %v7731_v26 = vpop.f32.mrb[33].mxu1 }
 0x6fb   : > { %vm9021_vm6 = vmpackc.low %vm4268_vm4, %vm4267_vm5  ;;  %3272 = vbcast.lane.b32.xlu0 %v12728_v4, 336  ;;  %v7697_v23 = vadd.f32 %v7696_v1, %v7695_v29  ;;  %v7732_v37 = vadd.f32 %v7731_v26, %v7730_v27  ;;  %v7733_v17 = vpop.f32.mrb[34].mxu1  ;;  %v7774_v32 = vpop.f32.mrb[48].mxu0 }
 0x6fc   : > { %9022 = vmatprep.subr.msk.bf16.mxu1 %vm9021_vm6, %v10821_v50  ;;  %v3017_v35 = vpop.permute.xlu1 %3016  ;;  %v7734_v52 = vpop.f32.mrb[35].mxu1 }
 0x6fd   : > { %vm4252_vm7 = vcmp.gt.f32.partialorder %v3017_v35, %v12698_v18  ;;  %v3013_v56 = vpop.permute.xlu0 %3012  ;;  %v5556_v5 = vadd.f32 %v7697_v23, %v5471_v49  ;;  %v5626_v33 = vadd.f32 %v7732_v37, %v5541_v25  ;;  %v7735_v63 = vadd.f32 %v7734_v52, %v7733_v17  ;;  %v7775_v16 = vpop.f32.mrb[49].mxu0  ;;  %v755_v52 = vld [vmem:[#allocation11 + $0xc0] sm:$0xff] }
 0x6fe   : > { %vm4251_vm9 = vcmp.gt.f32.partialorder %v3013_v56, %v12698_v18  ;;  %3477 = vbcast.lane.b32.xlu1 %v12737_v62, 344  ;;  %v7776_v61 = vadd.f32 %v7775_v16, %v7774_v32  ;;  %v7736_v35 = vpop.f32.mrb[36].mxu1  ;;  %v7777_v2 = vpop.f32.mrb[50].mxu0  ;;  %v3646_v56 = vcombine.high %v12515_v11, %v12515_v11 }
 0x6ff   : > { %vm9024_vm10 = vmpackc.low %vm4252_vm7, %vm4251_vm9  ;;  %3473 = vbcast.lane.b32.xlu0 %v12737_v62, 336  ;;  %v5631_v58 = vadd.f32 %v7735_v63, %v5546_v55  ;;  %v7737_v47 = vpop.f32.mrb[37].mxu1  ;;  %v7778_v0 = vpop.f32.mrb[51].mxu0  ;;  %v787_v63 = vld [vmem:[#allocation11 + $0x1c0] sm:$0xff] }
 0x700   : > { %9025 = vmatpush3.bf16.msk.msra.mxu1 %vm9024_vm10, %v10821_v50  ;;  %v3218_v22 = vpop.permute.xlu1 %3217  ;;  %v12902_v30 = vadd.f32 %v7776_v61, %v5626_v33  ;;  %v7738_v36 = vadd.f32 %v7737_v47, %v7736_v35  ;;  %v7779_v34 = vadd.f32 %v7778_v0, %v7777_v2  ;;  %v7739_v59 = vpop.f32.mrb[38].mxu1  ;;  %v3660_v29 = vrot.slane %v3646_v56, %v10651_v3  ;;  %v820_v61 = vld [vmem:[#allocation11 + $0x2c8] sm:$0xff]  ;;  %v819_v56 = vld [vmem:[#allocation11 + $0x2c0] sm:$0xff]  ;;  %v790_v47 = vld [vmem:[#allocation11 + $0x1d8] sm:$0xff] }
 0x701   : > { %vm4300_vm11 = vcmp.gt.f32.partialorder %v3218_v22, %v12706_v24  ;;  %v3214_v44 = vpop.permute.xlu0 %3213  ;;  %v7780_v46 = vpop.f32.mrb[52].mxu0 }
 0x702   : > { %vm4299_vm12 = vcmp.gt.f32.partialorder %v3214_v44, %v12706_v24  ;;  %3410 = vbcast.lane.b32.xlu1 %v12746_v43, 344  ;;  %v5636_v22 = vadd.f32 %v7738_v36, %v5551_v8  ;;  %v12907_v55 = vadd.f32 %v7779_v34, %v5631_v58  ;;  %v7740_v9 = vpop.f32.mrb[39].mxu1  ;;  %v7781_v14 = vpop.f32.mrb[53].mxu0  ;;  %v3662_v17 = vcombine.high %v3660_v29, %v3660_v29  ;;  %v851_v36 = vld [vmem:[#allocation11 + $0x3c0] sm:$0xff] }
 0x703   : > { %vm9069_vm13 = vmpackc.low %vm4300_vm11, %vm4299_vm12  ;;  %3406 = vbcast.lane.b32.xlu0 %v12746_v43, 336  ;;  %v7741_v44 = vadd.f32 %v7740_v9, %v7739_v59  ;;  %v7782_v27 = vadd.f32 %v7781_v14, %v7780_v46  ;;  %v7783_v49 = vpop.f32.mrb[54].mxu0  ;;  %v789_v59 = vld [vmem:[#allocation11 + $0x1d0] sm:$0xff]  ;;  %v760_v46 = vld [vmem:[#allocation11 + $0xe8] sm:$0xff] }
 0x704   : > { %9070 = vmatprep.subr.msk.bf16.mxu0 %vm9069_vm13, %v10821_v50  ;;  %v3151_v60 = vpop.permute.xlu1 %3150  ;;  %v7784_v26 = vpop.f32.mrb[55].mxu0 }
 0x705   : > { %vm4284_vm8 = vcmp.gt.f32.partialorder %v3151_v60, %v12714_v41  ;;  %v3147_v48 = vpop.permute.xlu0 %3146  ;;  %v5641_v8 = vadd.f32 %v7741_v44, %v5556_v5  ;;  %v12913_v23 = vadd.f32 %v7782_v27, %v5636_v22  ;;  %v7785_v37 = vadd.f32 %v7784_v26, %v7783_v49  ;;  %v788_v5 = vld [vmem:[#allocation11 + $0x1c8] sm:$0xff]  ;;  %v854_v44 = vld [vmem:[#allocation11 + $0x3d8] sm:$0xff] }
 0x706   : > { %vm4283_vm14 = vcmp.gt.f32.partialorder %v3147_v48, %v12714_v41  ;;  %3351 = vbcast.lane.b32.xlu1 %v12719_v53, 360  ;;  %v762_v26 = vld [vmem:[#allocation11 + $0xf8] sm:$0xff] }
 0x707   : > { %vm9072_vm15 = vmpackc.low %vm4284_vm8, %vm4283_vm14  ;;  %3347 = vbcast.lane.b32.xlu0 %v12719_v53, 352  ;;  %v12918_v32 = vadd.f32 %v7785_v37, %v5641_v8 }
 0x708   : > { %9073 = vmatpush3.bf16.msk.msra.mxu0 %vm9072_vm15, %v10821_v50  ;;  %v3092_v25 = vpop.permute.xlu1 %3091 }
 0x709   : > { %vm4270_vm1 = vcmp.gt.f32.partialorder %v3092_v25, %v12690_v40  ;;  %v3088_v10 = vpop.permute.xlu0 %3087 }
 0x70a   : > { %vm4269_vm2 = vcmp.gt.f32.partialorder %v3088_v10, %v12690_v40  ;;  %3284 = vbcast.lane.b32.xlu1 %v12728_v4, 360  ;;  %v822_v10 = vld [vmem:[#allocation11 + $0x2d8] sm:$0xff] }
 0x70b   : > { %vm9027_vm3 = vmpackc.low %vm4270_vm1, %vm4269_vm2  ;;  %3280 = vbcast.lane.b32.xlu0 %v12728_v4, 352 }
 0x70c   : > { %9028 = vmatprep.subr.msk.bf16.mxu1 %vm9027_vm3, %v10839_v39  ;;  %v3025_v1 = vpop.permute.xlu1 %3024 }
 0x70d   : > { %vm4254_vm4 = vcmp.gt.f32.partialorder %v3025_v1, %v12698_v18  ;;  %v3021_v40 = vpop.permute.xlu0 %3020  ;;  %v853_v1 = vld [vmem:[#allocation11 + $0x3d0] sm:$0xff] }
 0x70e   : > { %vm4253_vm5 = vcmp.gt.f32.partialorder %v3021_v40, %v12698_v18  ;;  %3485 = vbcast.lane.b32.xlu1 %v12737_v62, 360  ;;  %v3690_v18 = vrot.slane %v3662_v17, %v10651_v3 }
 0x70f   : > { %vm9030_vm6 = vmpackc.low %vm4254_vm4, %vm4253_vm5  ;;  %3481 = vbcast.lane.b32.xlu0 %v12737_v62, 352 }
 0x710   : > { %9031 = vmatpush3.bf16.msk.msra.mxu1 %vm9030_vm6, %v10839_v39  ;;  %v3226_v60 = vpop.permute.xlu1 %3225  ;;  %v12932_v35 = vrot.slane %v3690_v18, %v10217_v28  ;;  %v3694_v0 = vcombine.high %v3690_v18, %v3690_v18 }
 0x711   : > { %vm4302_vm7 = vcmp.gt.f32.partialorder %v3226_v60, %v12706_v24  ;;  %v3222_v48 = vpop.permute.xlu0 %3221 }
 0x712   : > { %vm4301_vm9 = vcmp.gt.f32.partialorder %v3222_v48, %v12706_v24  ;;  %3418 = vbcast.lane.b32.xlu1 %v12746_v43, 360  ;;  %v3676_v24 = vrot.slane %v3660_v29, %v10651_v3  ;;  %v852_v3 = vld [vmem:[#allocation11 + $0x3c8] sm:$0xff]  ;;  %v821_v29 = vld [vmem:[#allocation11 + $0x2d0] sm:$0xff] }
 0x713   : > { %vm9075_vm10 = vmpackc.low %vm4302_vm7, %vm4301_vm9  ;;  %3414 = vbcast.lane.b32.xlu0 %v12746_v43, 352  ;;  %5964 = vmatmul.mubr.f32.vlgmr.msra.gmra.mrb[48].mxu1 %v755_v52 }
 0x714   : > { %9076 = vmatprep.subr.msk.bf16.mxu0 %vm9075_vm10, %v10839_v39  ;;  %v3159_v33 = vpop.permute.xlu1 %3158  ;;  %5968 = vmatprep.mubr.f32.mxu1 %v788_v5  ;;  %v12940_v25 = vrot.slane %v3676_v24, %v10217_v28  ;;  %v3692_v22 = vcombine.high %v3676_v24, %v3676_v24 }
 0x715   : > { %vm4286_vm11 = vcmp.gt.f32.partialorder %v3159_v33, %v12714_v41  ;;  %v3155_v16 = vpop.permute.xlu0 %3154 }
 0x716   : > { %vm4285_vm12 = vcmp.gt.f32.partialorder %v3155_v16, %v12714_v41  ;;  %3359 = vbcast.lane.b32.xlu1 %v12719_v53, 376  ;;  %v757_v41 = vld [vmem:[#allocation11 + $0xd0] sm:$0xff]  ;;  %v12956_v27 = vrot.slane %v3692_v22, %v10217_v28 }
 0x717   : > { %vm9078_vm13 = vmpackc.low %vm4286_vm11, %vm4285_vm12  ;;  %3355 = vbcast.lane.b32.xlu0 %v12719_v53, 368  ;;  %5969 = vmatmul.mubr.f32.gmra.mrb[50].mxu1 %v787_v63 }
 0x718   : > { %9079 = vmatpush3.bf16.msk.msra.mxu0 %vm9078_vm13, %v10839_v39  ;;  %v3304_v2 = vpop.permute.xlu1 %3303  ;;  %5973 = vmatprep.mubr.f32.mxu1 %v820_v61 }
 0x719   : > { %vm4320_vm8 = vcmp.gt.f32.partialorder %v3304_v2, %v12932_v35  ;;  %v3300_v58 = vpop.permute.xlu0 %3299 }
 0x71a   : > { %vm4319_vm14 = vcmp.gt.f32.partialorder %v3300_v58, %v12932_v35  ;;  %3292 = vbcast.lane.b32.xlu1 %v12728_v4, 376 }
 0x71b   : > { %vm9081_vm15 = vmpackc.low %vm4320_vm8, %vm4319_vm14  ;;  %3288 = vbcast.lane.b32.xlu0 %v12728_v4, 368  ;;  %5974 = vmatmul.mubr.f32.gmra.mrb[52].mxu1 %v819_v56  ;;  %v12948_v4 = vrot.slane %v3694_v0, %v10217_v28 }
 0x71c   : > { %6049 = vmatmul.mubr.f32.vlgmr.msra.gmra.mrb[64].mxu0 %v757_v41  ;;  %9082 = vmatprep.subr.msk.bf16.mxu1 %vm9081_vm15, %v10695_v20  ;;  %v3237_v53 = vpop.permute.xlu1 %3236 }
 0x71d   : > { %vm4304_vm1 = vcmp.gt.f32.partialorder %v3237_v53, %v12940_v25  ;;  %v3233_v34 = vpop.permute.xlu0 %3232  ;;  %5978 = vmatprep.mubr.f32.mxu1 %v852_v3  ;;  %6053 = vmatprep.mubr.f32.mxu0 %v790_v47 }
 0x71e   : > { %vm4303_vm2 = vcmp.gt.f32.partialorder %v3233_v34, %v12940_v25  ;;  %3493 = vbcast.lane.b32.xlu1 %v12737_v62, 376 }
 0x71f   : > { %vm9084_vm3 = vmpackc.low %vm4304_vm1, %vm4303_vm2  ;;  %3489 = vbcast.lane.b32.xlu0 %v12737_v62, 368  ;;  %5979 = vmatmul.mubr.f32.gmra.mrb[54].mxu1 %v851_v36 }
 0x720   : > { %6054 = vmatmul.mubr.f32.gmra.mrb[66].mxu0 %v789_v59  ;;  %9085 = vmatpush3.bf16.msk.msra.mxu1 %vm9084_vm3, %v10695_v20  ;;  %v3438_v9 = vpop.permute.xlu1 %3437 }
 0x721   : > { %vm4352_vm4 = vcmp.gt.f32.partialorder %v3438_v9, %v12948_v4  ;;  %v3434_v14 = vpop.permute.xlu0 %3433  ;;  %6058 = vmatprep.mubr.f32.mxu0 %v822_v10  ;;  %6133 = vmatprep.mubr.f32.mxu1 %v760_v46 }
 0x722   : > { %vm4351_vm5 = vcmp.gt.f32.partialorder %v3434_v14, %v12948_v4  ;;  %3426 = vbcast.lane.b32.xlu1 %v12746_v43, 376 }
 0x723   : > { %vm9129_vm6 = vmpackc.low %vm4352_vm4, %vm4351_vm5  ;;  %3422 = vbcast.lane.b32.xlu0 %v12746_v43, 368 }
 0x724   : > { %6059 = vmatmul.mubr.f32.gmra.mrb[68].mxu0 %v821_v29  ;;  %9130 = vmatprep.subr.msk.bf16.mxu0 %vm9129_vm6, %v10695_v20  ;;  %v3371_v62 = vpop.permute.xlu1 %3370 }
 0x725   : > { %vm4336_vm7 = vcmp.gt.f32.partialorder %v3371_v62, %v12956_v27  ;;  %v3367_v49 = vpop.permute.xlu0 %3366  ;;  %6063 = vmatprep.mubr.f32.mxu0 %v854_v44 }
 0x726   : > { %vm4335_vm9 = vcmp.gt.f32.partialorder %v3367_v49, %v12956_v27 }
 0x727   : > { %vm9132_vm10 = vmpackc.low %vm4336_vm7, %vm4335_vm9 }
 0x728   : > { %6064 = vmatmul.mubr.f32.gmra.mrb[70].mxu0 %v853_v1  ;;  %v3312_v40 = vpop.permute.xlu1 %3311 }
 0x729   : > { %9133 = vmatpush3.bf16.msk.msra.mxu0 %vm9132_vm10, %v10695_v20  ;;  %vm4322_vm11 = vcmp.gt.f32.partialorder %v3312_v40, %v12932_v35  ;;  %v3308_v28 = vpop.permute.xlu0 %3307  ;;  %6218 = vmatprep.mubr.f32.mxu0 %v762_v26 }
 0x72a   : > { %vm4321_vm12 = vcmp.gt.f32.partialorder %v3308_v28, %v12932_v35 }
 0x72b   : > { %vm9087_vm13 = vmpackc.low %vm4322_vm11, %vm4321_vm12 }
 0x72c   : > { %9088 = vmatprep.subr.msk.bf16.mxu1 %vm9087_vm13, %v10712_v51  ;;  %v3245_v43 = vpop.permute.xlu1 %3244 }
 0x72d   : > { %vm4306_vm8 = vcmp.gt.f32.partialorder %v3245_v43, %v12940_v25  ;;  %v3241_v8 = vpop.permute.xlu0 %3240 }
 0x72e   : > { %vm4305_vm14 = vcmp.gt.f32.partialorder %v3241_v8, %v12940_v25 }
 0x72f   : > { %vm9090_vm15 = vmpackc.low %vm4306_vm8, %vm4305_vm14 }
 0x730   : > { %9091 = vmatpush3.bf16.msk.msra.mxu1 %vm9090_vm15, %v10712_v51  ;;  %v3446_v37 = vpop.permute.xlu1 %3445 }
 0x731   : > { %vm4354_vm1 = vcmp.gt.f32.partialorder %v3446_v37, %v12948_v4  ;;  %v3442_v17 = vpop.permute.xlu0 %3441 }
 0x732   : > { %vm4353_vm2 = vcmp.gt.f32.partialorder %v3442_v17, %v12948_v4 }
 0x733   : > { %vm9135_vm3 = vmpackc.low %vm4354_vm1, %vm4353_vm2 }
 0x734   : > { %9136 = vmatprep.subr.msk.bf16.mxu0 %vm9135_vm3, %v10712_v51  ;;  %v3379_v60 = vpop.permute.xlu1 %3378 }
 0x735   : > { %vm4338_vm4 = vcmp.gt.f32.partialorder %v3379_v60, %v12956_v27  ;;  %v3375_v52 = vpop.permute.xlu0 %3374 }
 0x736   : > { %vm4337_vm5 = vcmp.gt.f32.partialorder %v3375_v52, %v12956_v27 }
 0x737   : > { %vm9138_vm6 = vmpackc.low %vm4338_vm4, %vm4337_vm5 }
 0x738   : > { %9139 = vmatpush3.bf16.msk.msra.mxu0 %vm9138_vm6, %v10712_v51  ;;  %v3320_v48 = vpop.permute.xlu1 %3319 }
 0x739   : > { %vm4324_vm7 = vcmp.gt.f32.partialorder %v3320_v48, %v12932_v35  ;;  %v3316_v5 = vpop.permute.xlu0 %3315 }
 0x73a   : > { %vm4323_vm9 = vcmp.gt.f32.partialorder %v3316_v5, %v12932_v35 }
 0x73b   : > { %vm9093_vm10 = vmpackc.low %vm4324_vm7, %vm4323_vm9 }
 0x73c   : > { %9094 = vmatprep.subr.msk.bf16.mxu1 %vm9093_vm10, %v10741_v54  ;;  %v3253_v18 = vpop.permute.xlu1 %3252 }
 0x73d   : > { %vm4308_vm11 = vcmp.gt.f32.partialorder %v3253_v18, %v12940_v25  ;;  %v3249_v33 = vpop.permute.xlu0 %3248 }
 0x73e   : > { %vm4307_vm12 = vcmp.gt.f32.partialorder %v3249_v33, %v12940_v25 }
 0x73f   : > { %vm9096_vm13 = vmpackc.low %vm4308_vm11, %vm4307_vm12 }
 0x740   : > { %9097 = vmatpush3.bf16.msk.msra.mxu1 %vm9096_vm13, %v10741_v54  ;;  %v3454_v63 = vpop.permute.xlu1 %3453 }
 0x741   : > { %vm4356_vm8 = vcmp.gt.f32.partialorder %v3454_v63, %v12948_v4  ;;  %v3450_v16 = vpop.permute.xlu0 %3449 }
 0x742   : > { %vm4355_vm14 = vcmp.gt.f32.partialorder %v3450_v16, %v12948_v4 }
 0x743   : > { %vm9141_vm15 = vmpackc.low %vm4356_vm8, %vm4355_vm14 }
 0x744   : > { %9142 = vmatprep.subr.msk.bf16.mxu0 %vm9141_vm15, %v10741_v54  ;;  %v3387_v61 = vpop.permute.xlu1 %3386 }
 0x745   : > { %vm4340_vm1 = vcmp.gt.f32.partialorder %v3387_v61, %v12956_v27  ;;  %v3383_v24 = vpop.permute.xlu0 %3382 }
 0x746   : > { %vm4339_vm2 = vcmp.gt.f32.partialorder %v3383_v24, %v12956_v27 }
 0x747   : > { %vm9144_vm3 = vmpackc.low %vm4340_vm1, %vm4339_vm2 }
 0x748   : > { %9145 = vmatpush3.bf16.msk.msra.mxu0 %vm9144_vm3, %v10741_v54  ;;  %v3328_v2 = vpop.permute.xlu1 %3327 }
 0x749   : > { %vm4326_vm4 = vcmp.gt.f32.partialorder %v3328_v2, %v12932_v35  ;;  %v3324_v56 = vpop.permute.xlu0 %3323 }
 0x74a   : > { %vm4325_vm5 = vcmp.gt.f32.partialorder %v3324_v56, %v12932_v35 }
 0x74b   : > { %vm9099_vm6 = vmpackc.low %vm4326_vm4, %vm4325_vm5 }
 0x74c   : > { %9100 = vmatprep.subr.msk.bf16.mxu1 %vm9099_vm6, %v10767_v19  ;;  %v3261_v58 = vpop.permute.xlu1 %3260 }
 0x74d   : > { %vm4310_vm7 = vcmp.gt.f32.partialorder %v3261_v58, %v12940_v25  ;;  %v3257_v41 = vpop.permute.xlu0 %3256 }
 0x74e   : > { %vm4309_vm9 = vcmp.gt.f32.partialorder %v3257_v41, %v12940_v25 }
 0x74f   : > { %vm9102_vm10 = vmpackc.low %vm4310_vm7, %vm4309_vm9 }
 0x750   : > { %9103 = vmatpush3.bf16.msk.msra.mxu1 %vm9102_vm10, %v10767_v19  ;;  %v3462_v3 = vpop.permute.xlu1 %3461 }
 0x751   : > { %vm4358_vm11 = vcmp.gt.f32.partialorder %v3462_v3, %v12948_v4  ;;  %v3458_v47 = vpop.permute.xlu0 %3457 }
 0x752   : > { %vm4357_vm12 = vcmp.gt.f32.partialorder %v3458_v47, %v12948_v4 }
 0x753   : > { %vm9147_vm13 = vmpackc.low %vm4358_vm11, %vm4357_vm12 }
 0x754   : > { %9148 = vmatprep.subr.msk.bf16.mxu0 %vm9147_vm13, %v10767_v19  ;;  %v3395_v0 = vpop.permute.xlu1 %3394 }
 0x755   : > { %vm4342_vm8 = vcmp.gt.f32.partialorder %v3395_v0, %v12956_v27  ;;  %v3391_v53 = vpop.permute.xlu0 %3390 }
 0x756   : > { %vm4341_vm14 = vcmp.gt.f32.partialorder %v3391_v53, %v12956_v27 }
 0x757   : > { %vm9150_vm15 = vmpackc.low %vm4342_vm8, %vm4341_vm14 }
 0x758   : > { %9151 = vmatpush3.bf16.msk.msra.mxu0 %vm9150_vm15, %v10767_v19  ;;  %v3336_v36 = vpop.permute.xlu1 %3335 }
 0x759   : > { %vm4328_vm1 = vcmp.gt.f32.partialorder %v3336_v36, %v12932_v35  ;;  %v3332_v34 = vpop.permute.xlu0 %3331 }
 0x75a   : > { %vm4327_vm2 = vcmp.gt.f32.partialorder %v3332_v34, %v12932_v35 }
 0x75b   : > { %vm9105_vm3 = vmpackc.low %vm4328_vm1, %vm4327_vm2 }
 0x75c   : > { %9106 = vmatprep.subr.msk.bf16.mxu1 %vm9105_vm3, %v10785_v31  ;;  %v3269_v59 = vpop.permute.xlu1 %3268 }
 0x75d   : > { %vm4312_vm4 = vcmp.gt.f32.partialorder %v3269_v59, %v12940_v25  ;;  %v3265_v10 = vpop.permute.xlu0 %3264 }
 0x75e   : > { %vm4311_vm5 = vcmp.gt.f32.partialorder %v3265_v10, %v12940_v25 }
 0x75f   : > { %vm9108_vm6 = vmpackc.low %vm4312_vm4, %vm4311_vm5 }
 0x760   : > { %9109 = vmatpush3.bf16.msk.msra.mxu1 %vm9108_vm6, %v10785_v31  ;;  %v3470_v46 = vpop.permute.xlu1 %3469 }
 0x761   : > { %vm4360_vm7 = vcmp.gt.f32.partialorder %v3470_v46, %v12948_v4  ;;  %v3466_v22 = vpop.permute.xlu0 %3465 }
 0x762   : > { %vm4359_vm9 = vcmp.gt.f32.partialorder %v3466_v22, %v12948_v4 }
 0x763   : > { %vm9153_vm10 = vmpackc.low %vm4360_vm7, %vm4359_vm9 }
 0x764   : > { %9154 = vmatprep.subr.msk.bf16.mxu0 %vm9153_vm10, %v10785_v31  ;;  %v3403_v9 = vpop.permute.xlu1 %3402 }
 0x765   : > { %vm4344_vm11 = vcmp.gt.f32.partialorder %v3403_v9, %v12956_v27  ;;  %v3399_v14 = vpop.permute.xlu0 %3398 }
 0x766   : > { %vm4343_vm12 = vcmp.gt.f32.partialorder %v3399_v14, %v12956_v27  ;;  %v7818_v29 = vpop.f32.mrb[40].mxu1 }
 0x767   : > { %vm9156_vm13 = vmpackc.low %vm4344_vm11, %vm4343_vm12  ;;  %v7819_v44 = vpop.f32.mrb[41].mxu1 }
 0x768   : > { %9157 = vmatpush3.bf16.msk.msra.mxu0 %vm9156_vm13, %v10785_v31  ;;  %v3344_v62 = vpop.permute.xlu1 %3343  ;;  %v7820_v49 = vadd.f32 %v7819_v44, %v7818_v29 }
 0x769   : > { %vm4330_vm8 = vcmp.gt.f32.partialorder %v3344_v62, %v12932_v35  ;;  %v3340_v1 = vpop.permute.xlu0 %3339 }
 0x76a   : > { %vm4329_vm14 = vcmp.gt.f32.partialorder %v3340_v1, %v12932_v35  ;;  %v5796_v26 = vadd.f32 %v7820_v49, %v12902_v30  ;;  %v7821_v40 = vpop.f32.mrb[42].mxu1 }
 0x76b   : > { %vm9111_vm15 = vmpackc.low %vm4330_vm8, %vm4329_vm14  ;;  %v7822_v28 = vpop.f32.mrb[43].mxu1 }
 0x76c   : > { %9112 = vmatprep.subr.msk.bf16.mxu1 %vm9111_vm15, %v10803_v42  ;;  %v3277_v43 = vpop.permute.xlu1 %3276  ;;  %v7823_v8 = vadd.f32 %v7822_v28, %v7821_v40 }
 0x76d   : > { %vm4314_vm1 = vcmp.gt.f32.partialorder %v3277_v43, %v12940_v25  ;;  %v3273_v37 = vpop.permute.xlu0 %3272 }
 0x76e   : > { %vm4313_vm2 = vcmp.gt.f32.partialorder %v3273_v37, %v12940_v25  ;;  %v7862_v17 = vpop.f32.mrb[56].mxu0  ;;  %v5801_v60 = vadd.f32 %v7823_v8, %v12907_v55 }
 0x76f   : > { %vm9114_vm3 = vmpackc.low %vm4314_vm1, %vm4313_vm2  ;;  %v7863_v52 = vpop.f32.mrb[57].mxu0 }
 0x770   : > { %9115 = vmatpush3.bf16.msk.msra.mxu1 %vm9114_vm3, %v10803_v42  ;;  %v3478_v30 = vpop.permute.xlu1 %3477  ;;  %v7864_v48 = vadd.f32 %v7863_v52, %v7862_v17  ;;  %v7824_v5 = vpop.f32.mrb[44].mxu1  ;;  %v759_v17 = vld [vmem:[#allocation11 + $0xe0] sm:$0xff]  ;;  %v792_v52 = vld [vmem:[#allocation11 + $0x1e8] sm:$0xff] }
 0x771   : > { %vm4362_vm4 = vcmp.gt.f32.partialorder %v3478_v30, %v12948_v4  ;;  %v3474_v18 = vpop.permute.xlu0 %3473  ;;  %v7825_v33 = vpop.f32.mrb[45].mxu1 }
 0x772   : > { %vm4361_vm5 = vcmp.gt.f32.partialorder %v3474_v18, %v12948_v4  ;;  %v13021_v63 = vadd.f32 %v7864_v48, %v5796_v26  ;;  %v7865_v16 = vpop.f32.mrb[58].mxu0  ;;  %v7826_v61 = vadd.f32 %v7825_v33, %v7824_v5  ;;  %v824_v48 = vld [vmem:[#allocation11 + $0x2e8] sm:$0xff]  ;;  %v761_v5 = vld [vmem:[#allocation11 + $0xf0] sm:$0xff]  ;;  %v794_v33 = vld [vmem:[#allocation11 + $0x1f8] sm:$0xff] }
 0x773   : > { %vm9159_vm6 = vmpackc.low %vm4362_vm4, %vm4361_vm5  ;;  %v7866_v24 = vpop.f32.mrb[59].mxu0  ;;  %v856_v18 = vld [vmem:[#allocation11 + $0x3e8] sm:$0xff] }
 0x774   : > { %9160 = vmatprep.subr.msk.bf16.mxu0 %vm9159_vm6, %v10803_v42  ;;  %v3411_v55 = vpop.permute.xlu1 %3410  ;;  %v7867_v2 = vadd.f32 %v7866_v24, %v7865_v16  ;;  %v5806_v56 = vadd.f32 %v7826_v61, %v12913_v23  ;;  %v7827_v58 = vpop.f32.mrb[46].mxu1  ;;  %v826_v16 = vld [vmem:[#allocation11 + $0x2f8] sm:$0xff] }
 0x775   : > { %vm4346_vm7 = vcmp.gt.f32.partialorder %v3411_v55, %v12956_v27  ;;  %v3407_v41 = vpop.permute.xlu0 %3406  ;;  %v7828_v3 = vpop.f32.mrb[47].mxu1  ;;  %v858_v61 = vld [vmem:[#allocation11 + $0x3f8] sm:$0xff] }
 0x776   : > { %vm4345_vm9 = vcmp.gt.f32.partialorder %v3407_v41, %v12956_v27  ;;  %v13027_v47 = vadd.f32 %v7867_v2, %v5801_v60  ;;  %v7868_v0 = vpop.f32.mrb[60].mxu0  ;;  %v7829_v53 = vadd.f32 %v7828_v3, %v7827_v58 }
 0x777   : > { %vm9162_vm10 = vmpackc.low %vm4346_vm7, %vm4345_vm9  ;;  %v7869_v36 = vpop.f32.mrb[61].mxu0 }
 0x778   : > { %9163 = vmatpush3.bf16.msk.msra.mxu0 %vm9162_vm10, %v10803_v42  ;;  %v3352_v34 = vpop.permute.xlu1 %3351  ;;  %v7870_v59 = vadd.f32 %v7869_v36, %v7868_v0  ;;  %v5811_v10 = vadd.f32 %v7829_v53, %v12918_v32 }
 0x779   : > { %vm4332_vm11 = vcmp.gt.f32.partialorder %v3352_v34, %v12932_v35  ;;  %v3348_v23 = vpop.permute.xlu0 %3347 }
 0x77a   : > { %vm4331_vm12 = vcmp.gt.f32.partialorder %v3348_v23, %v12932_v35  ;;  %v13033_v46 = vadd.f32 %v7870_v59, %v5806_v56  ;;  %v7871_v22 = vpop.f32.mrb[62].mxu0 }
 0x77b   : > { %vm9117_vm13 = vmpackc.low %vm4332_vm11, %vm4331_vm12  ;;  %v7872_v9 = vpop.f32.mrb[63].mxu0 }
 0x77c   : > { %9118 = vmatprep.subr.msk.bf16.mxu1 %vm9117_vm13, %v10821_v50  ;;  %v3285_v14 = vpop.permute.xlu1 %3284  ;;  %v7873_v29 = vadd.f32 %v7872_v9, %v7871_v22 }
 0x77d   : > { %vm4316_vm8 = vcmp.gt.f32.partialorder %v3285_v14, %v12940_v25  ;;  %v3281_v44 = vpop.permute.xlu0 %3280 }
 0x77e   : > { %vm4315_vm14 = vcmp.gt.f32.partialorder %v3281_v44, %v12940_v25  ;;  %v13038_v32 = vadd.f32 %v7873_v29, %v5811_v10 }
 0x77f   : > { %vm9120_vm15 = vmpackc.low %vm4316_vm8, %vm4315_vm14 }
 0x780   : > { %9121 = vmatpush3.bf16.msk.msra.mxu1 %vm9120_vm15, %v10821_v50  ;;  %v3486_v62 = vpop.permute.xlu1 %3485 }
 0x781   : > { %vm4364_vm1 = vcmp.gt.f32.partialorder %v3486_v62, %v12948_v4  ;;  %v3482_v49 = vpop.permute.xlu0 %3481 }
 0x782   : > { %vm4363_vm2 = vcmp.gt.f32.partialorder %v3482_v49, %v12948_v4 }
 0x783   : > { %vm9165_vm3 = vmpackc.low %vm4364_vm1, %vm4363_vm2 }
 0x784   : > { %9166 = vmatprep.subr.msk.bf16.mxu0 %vm9165_vm3, %v10821_v50  ;;  %v3419_v1 = vpop.permute.xlu1 %3418 }
 0x785   : > { %vm4348_vm4 = vcmp.gt.f32.partialorder %v3419_v1, %v12956_v27  ;;  %v3415_v26 = vpop.permute.xlu0 %3414 }
 0x786   : > { %vm4347_vm5 = vcmp.gt.f32.partialorder %v3415_v26, %v12956_v27 }
 0x787   : > { %vm9168_vm6 = vmpackc.low %vm4348_vm4, %vm4347_vm5 }
 0x788   : > { %9169 = vmatpush3.bf16.msk.msra.mxu0 %vm9168_vm6, %v10821_v50  ;;  %v3360_v40 = vpop.permute.xlu1 %3359 }
 0x789   : > { %vm4334_vm7 = vcmp.gt.f32.partialorder %v3360_v40, %v12932_v35  ;;  %v3356_v28 = vpop.permute.xlu0 %3355 }
 0x78a   : > { %vm4333_vm9 = vcmp.gt.f32.partialorder %v3356_v28, %v12932_v35 }
 0x78b   : > { %vm9123_vm10 = vmpackc.low %vm4334_vm7, %vm4333_vm9 }
 0x78c   : > { %9124 = vmatprep.subr.msk.bf16.mxu1 %vm9123_vm10, %v10839_v39  ;;  %v3293_v43 = vpop.permute.xlu1 %3292 }
 0x78d   : > { %vm4318_vm11 = vcmp.gt.f32.partialorder %v3293_v43, %v12940_v25  ;;  %v3289_v8 = vpop.permute.xlu0 %3288 }
 0x78e   : > { %vm4317_vm12 = vcmp.gt.f32.partialorder %v3289_v8, %v12940_v25  ;;  %v791_v25 = vld [vmem:[#allocation11 + $0x1e0] sm:$0xff] }
 0x78f   : > { %vm9126_vm13 = vmpackc.low %vm4318_vm11, %vm4317_vm12 }
 0x790   : > { %9127 = vmatpush3.bf16.msk.msra.mxu1 %vm9126_vm13, %v10839_v39  ;;  %v3494_v37 = vpop.permute.xlu1 %3493 }
 0x791   : > { %vm4366_vm8 = vcmp.gt.f32.partialorder %v3494_v37, %v12948_v4  ;;  %v3490_v60 = vpop.permute.xlu0 %3489  ;;  %9177 = vmatprep.subr.bf16.mxu1 %v10695_v20 }
 0x792   : > { %vm4365_vm14 = vcmp.gt.f32.partialorder %v3490_v60, %v12948_v4  ;;  %v823_v4 = vld [vmem:[#allocation11 + $0x2e0] sm:$0xff] }
 0x793   : > { %vm9171_vm15 = vmpackc.low %vm4366_vm8, %vm4365_vm14  ;;  %6134 = vmatmul.mubr.f32.vlgmr.msra.gmra.mrb[56].mxu1 %v759_v17  ;;  %v7279_v60 = vld [vmem:[%s13666_s9] ss:$0 sm:$0xff]  ;;  %s9641_s9 = scalar_lea.vmem %s9640_s16, 1024 }
 0x794   : > { %9172 = vmatprep.subr.msk.bf16.mxu0 %vm9171_vm15, %v10839_v39  ;;  %v3427_v35 = vpop.permute.xlu1 %3426  ;;  %6138 = vmatprep.mubr.f32.mxu1 %v792_v52  ;;  %p9643_p11 = scmp.lt.s32.totalorder %s9641_s9, %s9635_s27 }
 0x795   : > { %vm4350_vm1 = vcmp.gt.f32.partialorder %v3427_v35, %v12956_v27  ;;  %v3423_v30 = vpop.permute.xlu0 %3422  ;;  %9179 = vmatpush3.bf16.msra.mxu1 %v10695_v20  ;;  %v855_v20 = vld [vmem:[#allocation11 + $0x3e0] sm:$0xff] }
 0x796   : > { %vm4349_vm2 = vcmp.gt.f32.partialorder %v3423_v30, %v12956_v27  ;;  %9181 = vmatprep.subr.bf16.mxu1 %v10712_v51  ;;  %v793_v27 = vld [vmem:[#allocation11 + $0x1f0] sm:$0xff]  ;;  %p9644_p3 = por %p9643_p11, %p9642_p8 }
 0x797   : > { %vm9174_vm3 = vmpackc.low %vm4350_vm1, %vm4349_vm2  ;;  %6139 = vmatmul.mubr.f32.gmra.mrb[58].mxu1 %v791_v25 }
 0x798   : > { %9175 = vmatpush3.bf16.msk.msra.mxu0 %vm9174_vm3, %v10839_v39  ;;  %6143 = vmatprep.mubr.f32.mxu1 %v824_v48  ;;  %p9645_p12 = pnand %p9644_p3, %p9638_p9 }
 0x799   : > { %9209 = vmatprep.subr.bf16.mxu0 %v12813_v7  ;;  %9183 = vmatpush3.bf16.msra.mxu1 %v10712_v51  ;;  %v825_v51 = vld [vmem:[#allocation11 + $0x2f0] sm:$0xff] }
 0x79a   : > { %9185 = vmatprep.subr.bf16.mxu1 %v10741_v54 }
 0x79b   : > { %6144 = vmatmul.mubr.f32.gmra.mrb[60].mxu1 %v823_v4  ;;  %6219 = vmatmul.mubr.f32.vlgmr.msra.gmra.mrb[72].mxu0 %v761_v5 }
 0x79c   : > { %9211 = vmatpush3.bf16.msra.mxu0 %v12813_v7  ;;  %6148 = vmatprep.mubr.f32.mxu1 %v856_v18 }
 0x79d   : > { %9213 = vmatprep.subr.bf16.mxu0 %v12865_v21  ;;  %6223 = vmatprep.mubr.f32.mxu0 %v794_v33  ;;  %v13667_v33 = vld [vmem:[#allocation65_spill] sm:$0xff] }
 0x79e   : > { %9187 = vmatpush3.bf16.msra.mxu1 %v10741_v54  ;;  %v857_v54 = vld [vmem:[#allocation11 + $0x3f0] sm:$0xff] }
 0x79f   : > { %6149 = vmatmul.mubr.f32.gmra.mrb[62].mxu1 %v855_v20  ;;  %6224 = vmatmul.mubr.f32.gmra.mrb[74].mxu0 %v793_v27 }
 0x7a0   : > { %9215 = vmatpush3.bf16.msra.mxu0 %v12865_v21  ;;  %6228 = vmatprep.mubr.f32.mxu0 %v826_v16 }
 0x7a1   : > { %9217 = vmatprep.subr.bf16.mxu0 %v12818_v45  ;;  %9189 = vmatprep.subr.bf16.mxu1 %v10767_v19 }
 0x7a2   : > { %9191 = vmatpush3.bf16.msra.mxu1 %v10767_v19 }
 0x7a3   : > { %6229 = vmatmul.mubr.f32.gmra.mrb[76].mxu0 %v825_v51  ;;  %9193 = vmatprep.subr.bf16.mxu1 %v10785_v31 }
 0x7a4   : > { %9219 = vmatpush3.bf16.msra.mxu0 %v12818_v45  ;;  %6233 = vmatprep.mubr.f32.mxu0 %v858_v61 }
 0x7a5   : > { %9221 = vmatprep.subr.bf16.mxu0 %v12874_v15 }
 0x7a6   : > { %9195 = vmatpush3.bf16.msra.mxu1 %v10785_v31 }
 0x7a7   : > { %6234 = vmatmul.mubr.f32.gmra.mrb[78].mxu0 %v857_v54  ;;  %9197 = vmatprep.subr.bf16.mxu1 %v10803_v42 }
 0x7a8   : > { %9223 = vmatpush3.bf16.msra.mxu0 %v12874_v15 }
 0x7a9   : > { %9225 = vmatprep.subr.bf16.mxu0 %v12821_v13 }
 0x7aa   : > { %9199 = vmatpush3.bf16.msra.mxu1 %v10803_v42 }
 0x7ab   : > { %9201 = vmatprep.subr.bf16.mxu1 %v10821_v50 }
 0x7ac   : > { %9227 = vmatpush3.bf16.msra.mxu0 %v12821_v13 }
 0x7ad   : > { %9229 = vmatprep.subr.bf16.mxu0 %v12876_v12 }
 0x7ae   : > { %9203 = vmatpush3.bf16.msra.mxu1 %v10821_v50 }
 0x7af   : > { %9205 = vmatprep.subr.bf16.mxu1 %v10839_v39 }
 0x7b0   : > { %9231 = vmatpush3.bf16.msra.mxu0 %v12876_v12 }
 0x7b1   : > { %9233 = vmatprep.subr.bf16.mxu0 %v12824_v38 }
 0x7b2   : > { %9207 = vmatpush3.bf16.msra.mxu1 %v10839_v39 }
 0x7b4   : > { %9235 = vmatpush3.bf16.msra.mxu0 %v12824_v38 }
 0x7b5   : > { %9237 = vmatprep.subr.bf16.mxu0 %v12882_v57 }
 0x7b8   : > { %9239 = vmatpush3.bf16.msra.mxu0 %v12882_v57 }
 0x7e6   : > { %v7906_v19 = vpop.f32.mrb[48].mxu1 }
 0x7e7   : > { %v7907_v31 = vpop.f32.mrb[49].mxu1 }
 0x7e8   : > { %v7908_v42 = vadd.f32 %v7907_v31, %v7906_v19  ;;  %v13668_v19 = vld [vmem:[#allocation24_spill] sm:$0xff] }
 0x7ea   : > { %v5966_v7 = vadd.f32 %v7908_v42, %v13021_v63  ;;  %v7909_v50 = vpop.f32.mrb[50].mxu1 }
 0x7eb   : > { %v7910_v45 = vpop.f32.mrb[51].mxu1 }
 0x7ec   : > { %v7911_v13 = vadd.f32 %v7910_v45, %v7909_v50 }
 0x7ee   : > { %v5971_v21 = vadd.f32 %v7911_v13, %v13027_v47  ;;  %v7912_v15 = vpop.f32.mrb[52].mxu1 }
 0x7ef   : > { %v7950_v12 = vpop.f32.mrb[64].mxu0  ;;  %v7913_v24 = vpop.f32.mrb[53].mxu1 }
 0x7f0   : > { %v7914_v39 = vadd.f32 %v7913_v24, %v7912_v15  ;;  %v7951_v55 = vpop.f32.mrb[65].mxu0 }
 0x7f1   : > { %v7952_v38 = vadd.f32 %v7951_v55, %v7950_v12 }
 0x7f2   : > { %v5976_v2 = vadd.f32 %v7914_v39, %v13033_v46  ;;  %v7915_v56 = vpop.f32.mrb[54].mxu1 }
 0x7f3   : > { %v6051_v57 = vadd.f32 %v7952_v38, %v5966_v7  ;;  %v7953_v58 = vpop.f32.mrb[66].mxu0  ;;  %v7916_v41 = vpop.f32.mrb[55].mxu1 }
 0x7f4   : > { %v7917_v3 = vadd.f32 %v7916_v41, %v7915_v56  ;;  %v7954_v0 = vpop.f32.mrb[67].mxu0 }
 0x7f5   : > { %v7955_v63 = vadd.f32 %v7954_v0, %v7953_v58 }
 0x7f6   : > { %v5981_v53 = vadd.f32 %v7917_v3, %v13038_v32 }
 0x7f7   : > { %v6056_v36 = vadd.f32 %v7955_v63, %v5971_v21  ;;  %v7956_v34 = vpop.f32.mrb[68].mxu0 }
 0x7f8   : > { %v7957_v47 = vpop.f32.mrb[69].mxu0 }
 0x7f9   : > { %v7958_v59 = vadd.f32 %v7957_v47, %v7956_v34  ;;  %v715_v34 = vld [vmem:[%s13669_s5 + $0x8] sm:$0xff]  ;;  %v716_v47 = vld [vmem:[%s13669_s5 + $0x10] sm:$0xff] }
 0x7fb   : > { %v6061_v10 = vadd.f32 %v7958_v59, %v5976_v2  ;;  %v7959_v23 = vpop.f32.mrb[70].mxu0 }
 0x7fc   : > { %v7960_v22 = vpop.f32.mrb[71].mxu0 }
 0x7fd   : > { %v7961_v9 = vadd.f32 %v7960_v22, %v7959_v23  ;;  %v718_v22 = vld [vmem:[%s13669_s5 + $0x20] sm:$0xff] }
 0x7ff   : > { %v6066_v14 = vadd.f32 %v7961_v9, %v5981_v53  ;;  %v719_v9 = vld [vmem:[%s13669_s5 + $0x28] sm:$0xff] }
 0x866   : > { %v7994_v29 = vpop.f32.mrb[56].mxu1 }
 0x867   : > { %v7995_v46 = vpop.f32.mrb[57].mxu1 }
 0x868   : > { %v7996_v44 = vadd.f32 %v7995_v46, %v7994_v29  ;;  %v720_v29 = vld [vmem:[%s13669_s5 + $0x30] sm:$0xff]  ;;  %v721_v46 = vld [vmem:[%s13669_s5 + $0x38] sm:$0xff] }
 0x86a   : > { %v6136_v62 = vadd.f32 %v7996_v44, %v6051_v57  ;;  %v7997_v49 = vpop.f32.mrb[58].mxu1  ;;  %v9252_v44 = vpack.c.bf16 %v721_v46, %v720_v29 }
 0x86b   : > { %v7998_v1 = vpop.f32.mrb[59].mxu1 }
 0x86c   : > { %v7999_v26 = vadd.f32 %v7998_v1, %v7997_v49  ;;  %v723_v49 = vld [vmem:[%s13669_s5 + $0x48] sm:$0xff] }
 0x86e   : > { %v6141_v40 = vadd.f32 %v7999_v26, %v6056_v36  ;;  %v8000_v28 = vpop.f32.mrb[60].mxu1  ;;  %v8038_v43 = vpop.f32.mrb[72].mxu0  ;;  %v714_v36 = vld [vmem:[%s13669_s5] sm:$0xff]  ;;  %v724_v26 = vld [vmem:[%s13669_s5 + $0x50] sm:$0xff] }
 0x86f   : > { %v8001_v32 = vpop.f32.mrb[61].mxu1  ;;  %v8039_v8 = vpop.f32.mrb[73].mxu0  ;;  %v9240_v59 = vpack.c.bf16 %v715_v34, %v714_v36 }
 0x870   : > { %v8002_v37 = vadd.f32 %v8001_v32, %v8000_v28  ;;  %v8040_v17 = vadd.f32 %v8039_v8, %v8038_v43  ;;  %v726_v43 = vld [vmem:[%s13669_s5 + $0x60] sm:$0xff]  ;;  %v727_v32 = vld [vmem:[%s13669_s5 + $0x68] sm:$0xff] }
 0x871   : > { %9241 = vmatprep.subr.bf16.mxu1 %v9240_v59  ;;  %v9264_v8 = vpack.c.bf16 %v727_v32, %v726_v43 }
 0x872   : > { %v6146_v52 = vadd.f32 %v8002_v37, %v6061_v10  ;;  %v6221_v35 = vadd.f32 %v8040_v17, %v6136_v62  ;;  %v8003_v25 = vpop.f32.mrb[62].mxu1  ;;  %v8041_v30 = vpop.f32.mrb[74].mxu0  ;;  %v717_v10 = vld [vmem:[%s13669_s5 + $0x18] sm:$0xff]  ;;  %v722_v62 = vld [vmem:[%s13669_s5 + $0x40] sm:$0xff]  ;;  %v728_v37 = vld [vmem:[%s13669_s5 + $0x70] sm:$0xff] }
 0x873   : > { %v8004_v48 = vpop.f32.mrb[63].mxu1  ;;  %v8042_v4 = vpop.f32.mrb[75].mxu0  ;;  %v9244_v23 = vpack.c.bf16 %v717_v10, %v716_v47  ;;  %v9256_v1 = vpack.c.bf16 %v723_v49, %v722_v62  ;;  %v729_v17 = vld [vmem:[%s13669_s5 + $0x78] sm:$0xff] }
 0x874   : > { %v8005_v5 = vadd.f32 %v8004_v48, %v8003_v25  ;;  %v8043_v18 = vadd.f32 %v8042_v4, %v8041_v30  ;;  %vm6245_vm4 = vcmp.lt.f32.partialorder %v6221_v35, %v7279_v60 }
 0x875   : > { %v6249_v20 = vsel %vm6245_vm4, %v13667_v33, 0.0 }
 0x876   : > { %v6151_v27 = vadd.f32 %v8005_v5, %v6066_v14  ;;  %v6226_v16 = vadd.f32 %v8043_v18, %v6141_v40  ;;  %v8044_v51 = vpop.f32.mrb[76].mxu0  ;;  %6253 = vmax.xlane.f32.xlu0 %v6249_v20  ;;  %v9248_v14 = vpack.c.bf16 %v719_v9, %v718_v22  ;;  %v725_v40 = vld [vmem:[%s13669_s5 + $0x58] sm:$0xff] }
 0x877   : > { %v8045_v61 = vpop.f32.mrb[77].mxu0  ;;  %v9260_v28 = vpack.c.bf16 %v725_v40, %v724_v26 }
 0x878   : > { %v8046_v54 = vadd.f32 %v8045_v61, %v8044_v51  ;;  %vm6246_vm5 = vcmp.lt.f32.partialorder %v6226_v16, %v7279_v60 }
 0x879   : > { %v6250_v31 = vsel %vm6246_vm5, %v13668_v19, 0.0 }
 0x87a   : > { %v6231_v42 = vadd.f32 %v8046_v54, %v6146_v52  ;;  %v8047_v7 = vpop.f32.mrb[78].mxu0  ;;  %6255 = vmax.xlane.f32.xlu1 %v6250_v31 }
 0x87b   : > { %v8048_v50 = vpop.f32.mrb[79].mxu0 }
 0x87c   : > { %v8049_v45 = vadd.f32 %v8048_v50, %v8047_v7  ;;  %vm6247_vm6 = vcmp.lt.f32.partialorder %v6231_v42, %v7279_v60 }
 0x87d   : > { %v6251_v13 = vsel %vm6247_vm6, %v10965_v6, 0.0 }
 0x87e   : > { %v6236_v21 = vadd.f32 %v8049_v45, %v6151_v27  ;;  %6257 = vmax.xlane.f32.xlu0 %v6251_v13 }
 0x880   : > { %vm6248_vm7 = vcmp.lt.f32.partialorder %v6236_v21, %v7279_v60  ;;  %v9268_v60 = vpack.c.bf16 %v729_v17, %v728_v37 }
 0x881   : > { %v6252_v15 = vsel %vm6248_vm7, %v12515_v11, 0.0 }
 0x882   : > { %6259 = vmax.xlane.f32.xlu0 %v6252_v15 }
 0x903   : > { %v6254_v12 = vpop.xlane.xlu0 %6253 }
 0x904   : > { %v6261_v24 = vsub.f32 %v6249_v20, %v6254_v12 }
 0x906   : > { %v6265_v39 = vmul.f32 1.442695, %v6261_v24 }
 0x907   : > { %v6256_v55 = vpop.xlane.xlu1 %6255 }
 0x908   : > { %9391 = vpow2.f32 %v6265_v39  ;;  %v6262_v38 = vsub.f32 %v6250_v31, %v6256_v55  ;;  %v7280_v31 = vld [vmem:[%s13670_s15] ss:$0 sm:$0xff] }
 0x90a   : > { %v6267_v2 = vmul.f32 1.442695, %v6262_v38 }
 0x90b   : > { %v6258_v56 = vpop.xlane.xlu0 %6257 }
 0x90c   : > { %9393 = vpow2.f32 %v6267_v2  ;;  %v6263_v57 = vsub.f32 %v6251_v13, %v6258_v56 }
 0x90e   : > { %v6269_v58 = vmul.f32 1.442695, %v6263_v57 }
 0x90f   : > { %v6260_v41 = vpop.xlane.xlu0 %6259 }
 0x910   : > { %9395 = vpow2.f32 %v6269_v58  ;;  %v6264_v6 = vsub.f32 %v6252_v15, %v6260_v41 }
 0x912   : > { %v9392_v3 = vpop.eup %9391  ;;  %v6271_v0 = vmul.f32 1.442695, %v6264_v6 }
 0x913   : > { %8246 = vmatprep.mubr.f32.mxu1 %v9392_v3 }
 0x914   : > { %9397 = vpow2.f32 %v6271_v0 }
 0x916   : > { %v9394_v11 = vpop.eup %9393 }
 0x917   : > { %8247 = vmatmul.mubr.f32.vlgmr.msra.gmra.mrb[64].mxu1 %v9394_v11 }
 0x918   : > { %9243 = vmatpush3.bf16.msra.mxu1 %v9240_v59 }
 0x919   : > { %9245 = vmatprep.subr.bf16.mxu1 %v9244_v23 }
 0x91a   : > { %v9396_v63 = vpop.eup %9395 }
 0x91b   : > { %8249 = vmatprep.mubr.f32.mxu1 %v9396_v63 }
 0x91c   : > { %9247 = vmatpush3.bf16.msra.mxu1 %v9244_v23 }
 0x91d   : > { %9249 = vmatprep.subr.bf16.mxu1 %v9248_v14 }
 0x91e   : > { %v9398_v53 = vpop.eup %9397 }
 0x91f   : > { %8250 = vmatmul.mubr.f32.gmra.mrb[66].mxu1 %v9398_v53 }
 0x920   : > { %9251 = vmatpush3.bf16.msra.mxu1 %v9248_v14 }
 0x921   : > { %9253 = vmatprep.subr.bf16.mxu1 %v9252_v44 }
 0x924   : > { %9255 = vmatpush3.bf16.msra.mxu1 %v9252_v44 }
 0x925   : > { %9257 = vmatprep.subr.bf16.mxu1 %v9256_v1 }
 0x928   : > { %9259 = vmatpush3.bf16.msra.mxu1 %v9256_v1 }
 0x929   : > { %9261 = vmatprep.subr.bf16.mxu1 %v9260_v28 }
 0x92c   : > { %9263 = vmatpush3.bf16.msra.mxu1 %v9260_v28 }
 0x92d   : > { %9265 = vmatprep.subr.bf16.mxu1 %v9264_v8 }
 0x930   : > { %9267 = vmatpush3.bf16.msra.mxu1 %v9264_v8 }
 0x931   : > { %9269 = vmatprep.subr.bf16.mxu1 %v9268_v60 }
 0x934   : > { %9271 = vmatpush3.bf16.msra.mxu1 %v9268_v60 }
 0x9ea   : > { %v8248_v52 = vpop.f32.mrb[64].mxu1 }
 0x9eb   : > { %9399 = vrcp.f32 %v8248_v52  ;;  %v6339_v35 = vpop.f32.mrb[65].mxu1 }
 0x9ec   : > { %9401 = vrcp.f32 %v6339_v35 }
 0x9f2   : > { %v8251_v25 = vpop.f32.mrb[66].mxu1 }
 0x9f3   : > { %9403 = vrcp.f32 %v8251_v25  ;;  %v6349_v30 = vpop.f32.mrb[67].mxu1 }
 0x9f4   : > { %9405 = vrcp.f32 %v6349_v30 }
 0x9f5   : > { %v9400_v48 = vpop.eup %9399 }
 0x9f6   : > { %v9402_v4 = vpop.eup %9401  ;;  %v6361_v18 = vmul.f32 %v9400_v48, %v9394_v11 }
 0x9f7   : > { %v6359_v5 = vmul.f32 %v9402_v4, %v9392_v3 }
 0x9f9   : > { %8284 = vmatprep.mubr.f32.mxu0 %v6359_v5 }
 0x9fa   : > { %8285 = vmatmul.mubr.f32.vlgmr.msra.gmra.mrb[80].mxu0 %v6361_v18 }
 0x9fd   : > { %v9404_v33 = vpop.eup %9403 }
 0x9fe   : > { %v9406_v20 = vpop.eup %9405  ;;  %v6365_v16 = vmul.f32 %v9404_v33, %v9398_v53 }
 0x9ff   : > { %v6363_v27 = vmul.f32 %v9406_v20, %v9396_v63 }
 0xa01   : > { %8287 = vmatprep.mubr.f32.mxu0 %v6363_v27 }
 0xa02   : > { %8288 = vmatmul.mubr.f32.gmra.mrb[82].mxu0 %v6365_v16 }
 0xacd   : > { %v8286_v51 = vpop.f32.mrb[80].mxu0 }
 0xace   : > { %v6432_v61 = vpop.f32.mrb[81].mxu0 }
 0xacf   : > { %8322 = vmatprep.mubr.f32.mxu1 %v6432_v61 }
 0xad0   : > { %8323 = vmatmul.mubr.f32.vlgmr.msra.gmra.mrb[68].mxu1 %v8286_v51 }
 0xad5   : > { %v8289_v54 = vpop.f32.mrb[82].mxu0 }
 0xad6   : > { %v6442_v19 = vpop.f32.mrb[83].mxu0 }
 0xad7   : > { %8325 = vmatprep.mubr.f32.mxu1 %v6442_v19 }
 0xad8   : > { %8326 = vmatmul.mubr.f32.gmra.mrb[70].mxu1 %v8289_v54 }
 0xba3   : > { %v8324_v42 = vpop.f32.mrb[68].mxu1 }
 0xba4   : > { %v6529_v7 = vadd.f32 %v8324_v42, %v7280_v31  ;;  %v6523_v50 = vpop.f32.mrb[69].mxu1 }
 0xba5   : > { %v6524_v45 = vadd.f32 %v7280_v31, %v6523_v50 }
 0xba6   : > { %6543 = vst.msk [vmem:[%s681_s12 + $0x8] sm:$0xff] %vm918_vm0, %v6529_v7 }
 0xba7   : > { %6542 = vst.msk [vmem:[%s681_s12] sm:$0xff] %vm918_vm0, %v6524_v45 }
 0xbab   : > { %v8327_v13 = vpop.f32.mrb[70].mxu1 }
 0xbac   : > { %v6539_v21 = vadd.f32 %v8327_v13, %v7280_v31  ;;  %v6533_v15 = vpop.f32.mrb[71].mxu1 }
 0xbad   : > { %v6534_v12 = vadd.f32 %v7280_v31, %v6533_v15 }
 0xbae   : > { %6545 = vst.msk [vmem:[%s681_s12 + $0x18] sm:$0xff] %vm918_vm0, %v6539_v21 }
 0xbaf   : > { %6544 = vst.msk [vmem:[%s681_s12 + $0x10] sm:$0xff] %vm918_vm0, %v6534_v12 }
 0xbb0   : > { %9648 = shalt.err (!%p9645_p12)
}
 0xbb1   : > { %s9649_s3 = scalar_lea.hbm %s13162_s11, 512  ;;  %s9653_s26 = scalar_lea.hbm %s13671_s19, 1024 }
 0xbb2   : > { %p9650_p1 = scmp.ne.s32.totalorder %s13162_s11, %s9649_s3  ;;  %p9654_p6 = scmp.lt.u32.totalorder %s13162_s11, %s13671_s19 }
 0xbb3   : > { %p9655_p2 = scmp.lt.u32.totalorder %s9653_s26, %s9649_s3  ;;  %p9657_p10 = scmp.lt.u32.totalorder %s9649_s3, %s13162_s11 }
 0xbb4   : > { %p9651_p13 = pnand %p9650_p1, %p13672_p5 }
 0xbb5   : > { %p9656_p4 = por %p9655_p2, %p9654_p6 }
 0xbb6   : > { %p9652_p0 = pneg %p9651_p13 }
 0xbb7   : > { %p9658_p7 = por %p9657_p10, %p9656_p4 }
 0xbb9   : > { %p9659_p9 = pnand %p9658_p7, %p9652_p0 }
 0xbbb   : > { %9662 = shalt.err (!%p9659_p9)
}
 0xbbc   : > { %s9737_s17 = smov 128   ;;  %s9738_s0 = smov 8  }
 0xbbd   : > { %9300 = dma.vmem_to_hbm [thread:$0]  (%p13672_p5), %s13157_s14, 512, %s13162_s11, %s6547_s7, %s9737_s17, %s9737_s17, %s9738_s0  }
 0xbbe PF: > { %s6575_s25 = sand.u32 1, %s9709_s21   ;;  %p13673_p8 = scmp.ne.s32.totalorder %s13370_s8, 0 }
 0xbbf   : > { %p13674_p11 = scmp.ge.s32.totalorder %s9721_s24, 2  ;;  %s6576_s27 = scalar_lea.sflag [#allocation4], %s6575_s25 }
 0xbc1   : > { %p9329_p3 = pnand %p13674_p11, %p13673_p8 }
 0xbc3   : > { %9704 = dma.done.wait (!%p9329_p3), %s6576_s27, 512  }
 0xbc4   : > { %9706 = vsyncadd (!%p9329_p3), %s6576_s27, 4294966784  ;;  %p35_p12 = scmp.ge.s32.totalorder %s10015_s29, 4   ;;  %s13675_s21 = smov %s9713_s22 }
 0xbc5   : > { %s13676_s22 = smov %s9717_s23  ;;  %s13677_s23 = smov %s10026_s18 }
 0xbc6   : > { %s13678_s24 = smov %s10015_s29  ;;  %37 = sbr.rel (!%p35_p12) target bundleno = 25 (0x19), region = 169 }
 0xbcd   :  { %6581 = vsyncpa [#allocation3], 1 }
 0xbce   :  { %6583 = vsyncpa [#allocation3 + $0x1], 1 }
 0xbcf   :  { %6584 = vsyncpa [#allocation6], 1 }
 0xbd0   :  { %6586 = vsyncpa [#allocation6 + $0x1], 1 }
 0xbd1   :  { %6587 = vsyncpa [#allocation9], 1 }
 0xbd2   :  { %6588 = vsyncpa [#allocation12], 1 }
 0xbd3   :  { %6589 = vsyncpa [#allocation15], 1 }
 0xbd4   :  { %6590 = vsyncpa [#allocation4], 1 }
 0xbd5   :  { %6592 = vsyncpa [#allocation4 + $0x1], 1 }

</bundles_post_ra>
